<compile_context>
chip_gen: v7x
topology: tpu7x:2x2x1
jax: 0.10.0
libtpu: 0.0.40
codegen_flags: <defaults>
</compile_context>

<pallas_src>
import functools

import jax
import jax.numpy as jnp
import numpy as np
from jax.experimental import pallas as pl
from jax.experimental.pallas import tpu as pltpu

EXPANSION = 4
BN_EPS = 1e-5


def _vmem_capacity_bytes():
    try:
        return int(pltpu.get_tpu_info().vmem_capacity_bytes)
    except Exception:
        return 64 * 1024 * 1024  # conservative (v7x-sized) fallback


_VMEM_CAP = _vmem_capacity_bytes()
# ~half of physical VMEM: 32 MiB on v7x (64 MiB), 64 MiB on v5e/v6e (128 MiB).
_VMEM_LIMIT = int(min(max(_VMEM_CAP // 2, 32 * 1024 * 1024), 96 * 1024 * 1024))
# Row-tile cap for the flattened [M, C] matmuls: bigger tiles on the 128 MiB parts.
_TM_CAP = 512 if _VMEM_CAP <= 64 * 1024 * 1024 else 1024


def _cparams(n_grid_axes=1):
    return pltpu.CompilerParams(
        dimension_semantics=("parallel",) * n_grid_axes,
        vmem_limit_bytes=_VMEM_LIMIT,
    )


def _pick_tm(m):
    """Row tile for flattened [M, C] matmuls: biggest tile <= generation-aware cap."""
    return m if m <= _TM_CAP else _TM_CAP


# ----------------------------------------------------------------------------- kernels

def _bnrelu_matmul_kernel(x_ref, s_ref, b_ref, w_ref, o_ref):
    # o = relu(x*s+b) @ w    (folded BN + ReLU fused as the matmul prologue)
    x = x_ref[...].astype(jnp.float32)
    xa = jnp.maximum(x * s_ref[...] + b_ref[...], 0.0).astype(w_ref.dtype)
    o_ref[...] = jnp.dot(xa, w_ref[...],
                         preferred_element_type=jnp.float32).astype(o_ref.dtype)


def _bnrelu_dual_matmul_kernel(x_ref, s_ref, b_ref, w_ref, o1_ref, o2_ref):
    # pre = relu(x*s+b); one matmul against [w1 | wsc]; split into conv1 / shortcut outs.
    c1 = o1_ref.shape[-1]
    x = x_ref[...].astype(jnp.float32)
    pre = jnp.maximum(x * s_ref[...] + b_ref[...], 0.0).astype(w_ref.dtype)
    res = jnp.dot(pre, w_ref[...], preferred_element_type=jnp.float32)
    o1_ref[...] = res[:, :c1].astype(o1_ref.dtype)
    o2_ref[...] = res[:, c1:].astype(o2_ref.dtype)


def _bnrelu_matmul_add_kernel(x_ref, s_ref, b_ref, w_ref, r_ref, o_ref):
    # o = relu(x*s+b) @ w + r    (bn3+relu, conv3 and the materialized-shortcut add)
    x = x_ref[...].astype(jnp.float32)
    xa = jnp.maximum(x * s_ref[...] + b_ref[...], 0.0).astype(w_ref.dtype)
    acc = jnp.dot(xa, w_ref[...], preferred_element_type=jnp.float32)
    o_ref[...] = (acc + r_ref[...].astype(jnp.float32)).astype(o_ref.dtype)


def _bnrelu_matmul_add_recompute_kernel(h_ref, s3_ref, b3_ref, w_ref,
                                        x_ref, s1_ref, b1_ref, o_ref):
    # Identity-shortcut path: o = relu(h*s3+b3) @ w3 + relu(x*s1+b1).
    # The residual relu(bn1(x)) is recomputed here (cheap VPU work) instead of being
    # written to / read back from HBM as a separate `pre` tensor.
    h = h_ref[...].astype(jnp.float32)
    ha = jnp.maximum(h * s3_ref[...] + b3_ref[...], 0.0).astype(w_ref.dtype)
    acc = jnp.dot(ha, w_ref[...], preferred_element_type=jnp.float32)
    x = x_ref[...].astype(jnp.float32)
    res = jnp.maximum(x * s1_ref[...] + b1_ref[...], 0.0)
    o_ref[...] = (acc + res).astype(o_ref.dtype)


def _bnrelu_strided_proj_kernel(x_ref, s_ref, b_ref, w_ref, o_ref, *, stride, ho, wo):
    # stride != 1 projection shortcut: relu(bn1(x))[::stride, ::stride] @ wsc.
    cin = x_ref.shape[-1]
    cout = o_ref.shape[-1]
    x = x_ref[...].astype(jnp.float32)
    s = s_ref[...].reshape(1, 1, 1, cin)
    b = b_ref[...].reshape(1, 1, 1, cin)
    xa = jnp.maximum(x * s + b, 0.0)
    # TODO(synk): sublane-strided slice; move the stride onto the grid/BlockSpec.
    xs = jax.lax.slice(xa, (0, 0, 0, 0),
                       (1, (ho - 1) * stride + 1, (wo - 1) * stride + 1, cin),
                       (1, stride, stride, 1))
    acc = jnp.dot(xs.reshape(ho * wo, cin).astype(w_ref.dtype), w_ref[...],
                  preferred_element_type=jnp.float32)
    o_ref[...] = acc.reshape(1, ho, wo, cout).astype(o_ref.dtype)


def _bnrelu_conv3x3_kernel(x_ref, s_ref, b_ref, w_ref, o_ref, xp_ref, im_ref,
                           *, stride, ho, wo):
    # o = conv3x3(relu(x*s+b), w), padding=1, given stride, via a single im2col
    # contraction: build the (ho*wo, 9*Cin) patch tile in VMEM, one K=9*Cin jnp.dot.
    _, h, wd, cin = x_ref.shape
    cout = o_ref.shape[-1]

    # Zero only the 1-pixel border of the padded scratch (interior fully overwritten
    # below).  Done every step (cheap) rather than gated on program_id==0, because the
    # grid axis is "parallel" and each core has its own scratch instance.
    zc = jnp.zeros((1, h + 2, 1, cin), xp_ref.dtype)
    zr = jnp.zeros((1, 1, wd + 2, cin), xp_ref.dtype)
    xp_ref[:, :, 0:1, :] = zc
    xp_ref[:, :, wd + 1:wd + 2, :] = zc
    xp_ref[:, 0:1, :, :] = zr
    xp_ref[:, h + 1:h + 2, :, :] = zr

    x = x_ref[...].astype(jnp.float32)
    s = s_ref[...].reshape(1, 1, 1, cin)
    b = b_ref[...].reshape(1, 1, 1, cin)
    xa = jnp.maximum(x * s + b, 0.0)
    xp_ref[:, 1:h + 1, 1:wd + 1, :] = xa.astype(xp_ref.dtype)
    xp = xp_ref[...]                                        # (1, H+2, W+2, Cin)

    # im2col columns ordered (kh, kw, cin), matching w reshaped to (9*Cin, Cout).
    for kh in range(3):
        for kw in range(3):
            # TODO(synk): sublane-strided for stride != 1 (unexercised); fine at stride 1.
            patch = jax.lax.slice(
                xp, (0, kh, kw, 0),
                (1, kh + (ho - 1) * stride + 1, kw + (wo - 1) * stride + 1, cin),
                (1, stride, stride, 1))                     # (1, ho, wo, Cin)
            col = (kh * 3 + kw) * cin
            im_ref[:, col:col + cin] = patch.reshape(ho * wo, cin)

    acc = jnp.dot(im_ref[...], w_ref[...], preferred_element_type=jnp.float32)
    o_ref[...] = acc.reshape(1, ho, wo, cout).astype(o_ref.dtype)


# ----------------------------------------------------------------------------- wrappers

def bnrelu_conv1x1(x, s, b, w):
    """relu(x*s+b) @ w over flattened rows; x NHWC, w (Cin, Cout)."""
    n, h, wd, cin = x.shape
    cout = w.shape[1]
    m = n * h * wd
    tm = _pick_tm(m)
    out = pl.pallas_call(
        _bnrelu_matmul_kernel,
        out_shape=jax.ShapeDtypeStruct((m, cout), x.dtype),
        grid=(pl.cdiv(m, tm),),
        in_specs=[
            pl.BlockSpec((tm, cin), lambda i: (i, 0)),
            pl.BlockSpec((1, cin), lambda i: (0, 0)),
            pl.BlockSpec((1, cin), lambda i: (0, 0)),
            pl.BlockSpec((cin, cout), lambda i: (0, 0)),
        ],
        out_specs=pl.BlockSpec((tm, cout), lambda i: (i, 0)),
        compiler_params=_cparams(),
    )(x.reshape(m, cin), s, b, w)
    return out.reshape(n, h, wd, cout)


def bnrelu_conv1x1_dual(x, s, b, w1, w2):
    """pre = relu(x*s+b); single matmul against [w1 | w2]; returns (pre@w1, pre@w2)."""
    n, h, wd, cin = x.shape
    c1, c2 = w1.shape[1], w2.shape[1]
    w_cat = jnp.concatenate([w1, w2], axis=1)     # (Cin, C1+C2): fills the MXU N dim
    m = n * h * wd
    tm = _pick_tm(m)
    o1, o2 = pl.pallas_call(
        _bnrelu_dual_matmul_kernel,
        out_shape=(jax.ShapeDtypeStruct((m, c1), x.dtype),
                   jax.ShapeDtypeStruct((m, c2), x.dtype)),
        grid=(pl.cdiv(m, tm),),
        in_specs=[
            pl.BlockSpec((tm, cin), lambda i: (i, 0)),
            pl.BlockSpec((1, cin), lambda i: (0, 0)),
            pl.BlockSpec((1, cin), lambda i: (0, 0)),
            pl.BlockSpec((cin, c1 + c2), lambda i: (0, 0)),
        ],
        out_specs=(pl.BlockSpec((tm, c1), lambda i: (i, 0)),
                   pl.BlockSpec((tm, c2), lambda i: (i, 0))),
        compiler_params=_cparams(),
    )(x.reshape(m, cin), s, b, w_cat)
    return o1.reshape(n, h, wd, c1), o2.reshape(n, h, wd, c2)


def bnrelu_conv1x1_add(x, s, b, w, residual):
    """relu(x*s+b) @ w + residual; x NHWC, w (Cin, Cout), residual NHWC."""
    n, h, wd, cin = x.shape
    cout = w.shape[1]
    m = n * h * wd
    tm = _pick_tm(m)
    out = pl.pallas_call(
        _bnrelu_matmul_add_kernel,
        out_shape=jax.ShapeDtypeStruct((m, cout), x.dtype),
        grid=(pl.cdiv(m, tm),),
        in_specs=[
            pl.BlockSpec((tm, cin), lambda i: (i, 0)),
            pl.BlockSpec((1, cin), lambda i: (0, 0)),
            pl.BlockSpec((1, cin), lambda i: (0, 0)),
            pl.BlockSpec((cin, cout), lambda i: (0, 0)),
            pl.BlockSpec((tm, cout), lambda i: (i, 0)),
        ],
        out_specs=pl.BlockSpec((tm, cout), lambda i: (i, 0)),
        compiler_params=_cparams(),
    )(x.reshape(m, cin), s, b, w, residual.reshape(m, cout))
    return out.reshape(n, h, wd, cout)


def bnrelu_conv1x1_add_recompute(h, s3, b3, w, x, s1, b1):
    """relu(h*s3+b3) @ w + relu(x*s1+b1) (identity shortcut recomputed in-kernel)."""
    n, hh, wd, cin = h.shape
    cout = w.shape[1]
    cin_x = x.shape[-1]
    m = n * hh * wd
    assert cin_x == cout and x.shape[0] * x.shape[1] * x.shape[2] == m
    tm = _pick_tm(m)
    out = pl.pallas_call(
        _bnrelu_matmul_add_recompute_kernel,
        out_shape=jax.ShapeDtypeStruct((m, cout), h.dtype),
        grid=(pl.cdiv(m, tm),),
        in_specs=[
            pl.BlockSpec((tm, cin), lambda i: (i, 0)),
            pl.BlockSpec((1, cin), lambda i: (0, 0)),
            pl.BlockSpec((1, cin), lambda i: (0, 0)),
            pl.BlockSpec((cin, cout), lambda i: (0, 0)),
            pl.BlockSpec((tm, cin_x), lambda i: (i, 0)),
            pl.BlockSpec((1, cin_x), lambda i: (0, 0)),
            pl.BlockSpec((1, cin_x), lambda i: (0, 0)),
        ],
        out_specs=pl.BlockSpec((tm, cout), lambda i: (i, 0)),
        compiler_params=_cparams(),
    )(h.reshape(m, cin), s3, b3, w, x.reshape(m, cin_x), s1, b1)
    return out.reshape(n, hh, wd, cout)


def bnrelu_proj_strided(x, s, b, w, stride):
    """Strided 1x1 projection of relu(x*s+b); subsampling done inside the kernel."""
    # TODO(synk): this stride != 1 path is implemented but not exercised by the demo.
    n, h, wd, cin = x.shape
    cout = w.shape[1]
    ho = (h - 1) // stride + 1
    wo = (wd - 1) // stride + 1
    kern = functools.partial(_bnrelu_strided_proj_kernel, stride=stride, ho=ho, wo=wo)
    return pl.pallas_call(
        kern,
        out_shape=jax.ShapeDtypeStruct((n, ho, wo, cout), x.dtype),
        grid=(n,),
        in_specs=[
            pl.BlockSpec((1, h, wd, cin), lambda i: (i, 0, 0, 0)),
            pl.BlockSpec((1, cin), lambda i: (0, 0)),
            pl.BlockSpec((1, cin), lambda i: (0, 0)),
            pl.BlockSpec((cin, cout), lambda i: (0, 0)),
        ],
        out_specs=pl.BlockSpec((1, ho, wo, cout), lambda i: (i, 0, 0, 0)),
        compiler_params=_cparams(),
    )(x, s, b, w)


def bnrelu_conv3x3(x, s, b, w, stride):
    """3x3 conv (pad=1, stride) of relu(x*s+b); x NHWC, w (3, 3, Cin, Cout)."""
    n, h, wd, cin = x.shape
    cout = w.shape[-1]
    ho = (h + 2 - 3) // stride + 1
    wo = (wd + 2 - 3) // stride + 1
    w2d = w.reshape(9 * cin, cout)                 # matches im2col column order
    kern = functools.partial(_bnrelu_conv3x3_kernel, stride=stride, ho=ho, wo=wo)
    # TODO(synk): row-tile over H with a 1-row halo for large feature maps (grid (n, ht));
    # one whole image per grid step is fine at these demo sizes.
    return pl.pallas_call(
        kern,
        out_shape=jax.ShapeDtypeStruct((n, ho, wo, cout), x.dtype),
        grid=(n,),
        in_specs=[
            pl.BlockSpec((1, h, wd, cin), lambda i: (i, 0, 0, 0)),
            pl.BlockSpec((1, cin), lambda i: (0, 0)),
            pl.BlockSpec((1, cin), lambda i: (0, 0)),
            pl.BlockSpec((9 * cin, cout), lambda i: (0, 0)),
        ],
        out_specs=pl.BlockSpec((1, ho, wo, cout), lambda i: (i, 0, 0, 0)),
        scratch_shapes=[pltpu.VMEM((1, h + 2, wd + 2, cin), x.dtype),
                        pltpu.VMEM((ho * wo, 9 * cin), x.dtype)],
        compiler_params=_cparams(),
    )(x, s, b, w2d)


# ----------------------------------------------------------------------------- module

def init_params(key, in_planes, planes):
    """Deterministic synthetic parameters matching PreActBottleneck.__init__ shapes."""
    ks = jax.random.split(key, 16)
    p = {}

    def bn(kg, kb, km, kv, c):
        return dict(
            gamma=jax.random.normal(kg, (c,), jnp.float32) * 0.1 + 1.0,
            beta=jax.random.normal(kb, (c,), jnp.float32) * 0.1,
            mean=jax.random.normal(km, (c,), jnp.float32) * 0.1,
            var=jax.random.uniform(kv, (c,), jnp.float32, 0.5, 1.5),
        )

    p["bn1"] = bn(ks[0], ks[1], ks[2], ks[3], in_planes)
    p["bn2"] = bn(ks[4], ks[5], ks[6], ks[7], planes)
    p["bn3"] = bn(ks[8], ks[9], ks[10], ks[11], planes)
    # PyTorch conv weights are (Cout, Cin, kH, kW); store MXU-friendly layouts.
    w1 = jax.random.normal(ks[12], (planes, in_planes, 1, 1), jnp.float32) * 0.2
    w2 = jax.random.normal(ks[13], (planes, planes, 3, 3), jnp.float32) * 0.2
    w3 = jax.random.normal(ks[14], (EXPANSION * planes, planes, 1, 1), jnp.float32) * 0.2
    wsc = jax.random.normal(ks[15], (EXPANSION * planes, in_planes, 1, 1), jnp.float32) * 0.2
    p["w1"] = jnp.transpose(w1[:, :, 0, 0], (1, 0))             # (Cin, Cout)
    p["w2"] = jnp.transpose(w2, (2, 3, 1, 0))                    # (3, 3, Cin, Cout)
    p["w3"] = jnp.transpose(w3[:, :, 0, 0], (1, 0))              # (Cin, Cout)
    p["wsc"] = jnp.transpose(wsc[:, :, 0, 0], (1, 0))            # (Cin, Cout)
    return p


def _fold_bn(bn):
    # eval-mode BN folded to a per-channel affine; kept in f32.
    s = bn["gamma"] / jnp.sqrt(bn["var"] + BN_EPS)
    b = bn["beta"] - bn["mean"] * s
    return s, b


def preact_bottleneck_forward(x_nchw, params, in_planes, planes, stride,
                              compute_dtype=jnp.float32):
    """Matches PreActBottleneck.forward (eval-mode BN). Input/output are NCHW.

    Per the spec, `shortcut = self.shortcut(out)` with out = relu(bn1(x)) — so the
    identity shortcut is relu(bn1(x)) itself, not the raw input x.
    """
    x = jnp.transpose(x_nchw, (0, 2, 3, 1)).astype(compute_dtype)

    s1, b1 = _fold_bn(params["bn1"])
    s2, b2 = _fold_bn(params["bn2"])
    s3, b3 = _fold_bn(params["bn3"])
    s1, b1 = s1.reshape(1, in_planes), b1.reshape(1, in_planes)
    s2, b2 = s2.reshape(1, planes), b2.reshape(1, planes)
    s3, b3 = s3.reshape(1, planes), b3.reshape(1, planes)

    w1 = params["w1"].astype(compute_dtype)
    w2 = params["w2"].astype(compute_dtype)
    w3 = params["w3"].astype(compute_dtype)
    wsc = params["wsc"].astype(compute_dtype)

    has_proj = (stride != 1) or (in_planes != EXPANSION * planes)

    if has_proj and stride == 1:
        # conv1 and projection shortcut: one fused kernel, one concatenated matmul.
        out1, shortcut = bnrelu_conv1x1_dual(x, s1, b1, w1, wsc)
    elif has_proj:
        out1 = bnrelu_conv1x1(x, s1, b1, w1)
        shortcut = bnrelu_proj_strided(x, s1, b1, wsc, stride)
    else:
        out1 = bnrelu_conv1x1(x, s1, b1, w1)
        shortcut = None   # relu(bn1(x)) is recomputed inside the final fused kernel

    out = bnrelu_conv3x3(out1, s2, b2, w2, stride)          # bn2+relu -> conv2 (im2col)
    if shortcut is None:
        out = bnrelu_conv1x1_add_recompute(out, s3, b3, w3, x, s1, b1)
    else:
        out = bnrelu_conv1x1_add(out, s3, b3, w3, shortcut)  # bn3+relu -> conv3 (+res)

    return jnp.transpose(out, (0, 3, 1, 2))


# ----------------------------------------------------------------------------- reference

def reference_forward(x_nchw, params, in_planes, planes, stride):
    """Pure-JAX f32 reference (NHWC, lax.conv) for correctness checking."""
    x = jnp.transpose(x_nchw, (0, 2, 3, 1))

    def bn_relu(v, bn):
        s, b = _fold_bn(bn)
        return jnp.maximum(v * s + b, 0.0)

    def conv(v, w, st, pad):
        return jax.lax.conv_general_dilated(
            v, w, window_strides=(st, st), padding=pad,
            dimension_numbers=("NHWC", "HWIO", "NHWC"))

    pre = bn_relu(x, params["bn1"])
    has_proj = (stride != 1) or (in_planes != EXPANSION * planes)
    if has_proj:
        shortcut = conv(pre, params["wsc"].reshape(1, 1, in_planes, EXPANSION * planes),
                        stride, "VALID")
    else:
        shortcut = pre
    out = conv(pre, params["w1"].reshape(1, 1, in_planes, planes), 1, "VALID")
    out = conv(bn_relu(out, params["bn2"]), params["w2"], stride, [(1, 1), (1, 1)])
    out = conv(bn_relu(out, params["bn3"]),
               params["w3"].reshape(1, 1, planes, EXPANSION * planes), 1, "VALID")
    out = out + shortcut
    return jnp.transpose(out, (0, 3, 1, 2))


# ----------------------------------------------------------------------------- main

if __name__ == "__main__":
    key = jax.random.PRNGKey(0)

    # (in_planes, planes, stride, compute_dtype, rtol, atol):
    #   projection shortcut (dual fused kernel), identity shortcut (recompute residual),
    #   and a bf16-operand run of the projection path (HBM-bound production mode).
    configs = [
        (4, 4, 1, jnp.float32, 2e-4, 2e-4),
        (16, 4, 1, jnp.float32, 2e-4, 2e-4),
        (4, 4, 1, jnp.bfloat16, 5e-2, 5e-2),
    ]
    for idx, (in_planes, planes, stride, cdt, rtol, atol) in enumerate(configs):
        kx, kp = jax.random.split(jax.random.fold_in(key, idx))
        x = jax.random.normal(kx, (2, in_planes, 16, 16), jnp.float32)  # NCHW
        params = init_params(kp, in_planes, planes)

        fwd = jax.jit(functools.partial(
            preact_bottleneck_forward,
            in_planes=in_planes, planes=planes, stride=stride, compute_dtype=cdt))
        out = jax.block_until_ready(fwd(x, params))

        ref = reference_forward(x, params, in_planes, planes, stride)
        np.testing.assert_allclose(np.asarray(out.astype(jnp.float32)),
                                   np.asarray(ref), rtol=rtol, atol=atol)
        assert out.shape == (2, EXPANSION * planes, 16, 16)

    print("KERNEL_OK")
</pallas_src>

<mosaic_0001>
module attributes {stable_mosaic.version = 11 : i64} {
  func.func @_bnrelu_dual_matmul_kernel(%arg0: i32, %arg1: memref<512x4xf32, #tpu.memory_space<vmem>>, %arg2: memref<1x4xf32, #tpu.memory_space<vmem>>, %arg3: memref<1x4xf32, #tpu.memory_space<vmem>>, %arg4: memref<4x20xf32, #tpu.memory_space<vmem>>, %arg5: memref<512x4xf32, #tpu.memory_space<vmem>>, %arg6: memref<512x16xf32, #tpu.memory_space<vmem>>) attributes {dimension_semantics = [#tpu.dimension_semantics<parallel>], iteration_bounds = array<i64: 1>, scalar_prefetch = 0 : i64, scratch_operands = 0 : i64, tpu.core_type = #tpu.core_type<tc>, window_params = [{transform_indices = @transform_0, window_bounds = array<i64: 512, 4>}, {pipeline_mode = #tpu.pipeline_mode<synchronous>, transform_indices = @transform_1, window_bounds = array<i64: 1, 4>}, {pipeline_mode = #tpu.pipeline_mode<synchronous>, transform_indices = @transform_2, window_bounds = array<i64: 1, 4>}, {pipeline_mode = #tpu.pipeline_mode<synchronous>, transform_indices = @transform_3, window_bounds = array<i64: 4, 20>}, {transform_indices = @transform_4, window_bounds = array<i64: 512, 4>}, {transform_indices = @transform_5, window_bounds = array<i64: 512, 16>}]} {
    %c0 = arith.constant 0 : index
    %c0_0 = arith.constant 0 : index
    %0 = vector.load %arg1[%c0, %c0_0] : memref<512x4xf32, #tpu.memory_space<vmem>>, vector<512x4xf32>
    %c0_1 = arith.constant 0 : index
    %c0_2 = arith.constant 0 : index
    %1 = vector.load %arg2[%c0_1, %c0_2] : memref<1x4xf32, #tpu.memory_space<vmem>>, vector<1x4xf32>
    %2 = vector.broadcast %1 : vector<1x4xf32> to vector<512x4xf32>
    %3 = arith.mulf %0, %2 : vector<512x4xf32>
    %c0_3 = arith.constant 0 : index
    %c0_4 = arith.constant 0 : index
    %4 = vector.load %arg3[%c0_3, %c0_4] : memref<1x4xf32, #tpu.memory_space<vmem>>, vector<1x4xf32>
    %5 = vector.broadcast %4 : vector<1x4xf32> to vector<512x4xf32>
    %6 = arith.addf %3, %5 : vector<512x4xf32>
    %cst = arith.constant 0.000000e+00 : f32
    %7 = vector.broadcast %cst : f32 to vector<512x4xf32>
    %8 = arith.maximumf %6, %7 : vector<512x4xf32>
    %c0_5 = arith.constant 0 : index
    %c0_6 = arith.constant 0 : index
    %9 = vector.load %arg4[%c0_5, %c0_6] : memref<4x20xf32, #tpu.memory_space<vmem>>, vector<4x20xf32>
    %cst_7 = arith.constant dense<0.000000e+00> : vector<512x20xf32>
    %10 = tpu.matmul %8, %9, %cst_7 {dimension_numbers = #tpu.dot_dimension_numbers<[1], [0], [0], [1], [0, 0, 1, 1], [], []>} : vector<512x4xf32>, vector<4x20xf32>, vector<512x20xf32> -> vector<512x20xf32>
    %11 = vector.extract_strided_slice %10 {offsets = [0, 0], sizes = [512, 4], strides = [1, 1]} : vector<512x20xf32> to vector<512x4xf32>
    %c0_8 = arith.constant 0 : index
    %c0_9 = arith.constant 0 : index
    %12 = vector.load %arg5[%c0_8, %c0_9] : memref<512x4xf32, #tpu.memory_space<vmem>>, vector<512x4xf32>
    tpu.vector_store %arg5[%c0_8, %c0_9], %11 {strides = array<i32>} : memref<512x4xf32, #tpu.memory_space<vmem>>, vector<512x4xf32>,
    %13 = vector.extract_strided_slice %10 {offsets = [0, 4], sizes = [512, 16], strides = [1, 1]} : vector<512x20xf32> to vector<512x16xf32>
    %c0_10 = arith.constant 0 : index
    %c0_11 = arith.constant 0 : index
    %14 = vector.load %arg6[%c0_10, %c0_11] : memref<512x16xf32, #tpu.memory_space<vmem>>, vector<512x16xf32>
    tpu.vector_store %arg6[%c0_10, %c0_11], %13 {strides = array<i32>} : memref<512x16xf32, #tpu.memory_space<vmem>>, vector<512x16xf32>,
    return
  }
  func.func @transform_0(%arg0: i32) -> (i32, i32) {
    %c0_i32 = arith.constant 0 : i32
    %c0_i32_0 = arith.constant 0 : i32
    return %arg0, %c0_i32 : i32, i32
  }
  func.func @transform_1(%arg0: i32) -> (i32, i32) {
    %c0_i32 = arith.constant 0 : i32
    %c0_i32_0 = arith.constant 0 : i32
    %c0_i32_1 = arith.constant 0 : i32
    return %c0_i32, %c0_i32_0 : i32, i32
  }
  func.func @transform_2(%arg0: i32) -> (i32, i32) {
    %c0_i32 = arith.constant 0 : i32
    %c0_i32_0 = arith.constant 0 : i32
    %c0_i32_1 = arith.constant 0 : i32
    return %c0_i32, %c0_i32_0 : i32, i32
  }
  func.func @transform_3(%arg0: i32) -> (i32, i32) {
    %c0_i32 = arith.constant 0 : i32
    %c0_i32_0 = arith.constant 0 : i32
    %c0_i32_1 = arith.constant 0 : i32
    return %c0_i32, %c0_i32_0 : i32, i32
  }
  func.func @transform_4(%arg0: i32) -> (i32, i32) {
    %c0_i32 = arith.constant 0 : i32
    %c0_i32_0 = arith.constant 0 : i32
    return %arg0, %c0_i32 : i32, i32
  }
  func.func @transform_5(%arg0: i32) -> (i32, i32) {
    %c0_i32 = arith.constant 0 : i32
    %c0_i32_0 = arith.constant 0 : i32
    return %arg0, %c0_i32 : i32, i32
  }
}

module attributes {stable_mosaic.version = 11 : i64} {
  func.func @_bnrelu_conv3x3_kernel(%arg0: i32, %arg1: memref<1x16x16x4xf32, #tpu.memory_space<vmem>>, %arg2: memref<1x4xf32, #tpu.memory_space<vmem>>, %arg3: memref<1x4xf32, #tpu.memory_space<vmem>>, %arg4: memref<36x4xf32, #tpu.memory_space<vmem>>, %arg5: memref<1x16x16x4xf32, #tpu.memory_space<vmem>>, %arg6: memref<1x18x18x4xf32, #tpu.memory_space<vmem>>, %arg7: memref<256x36xf32, #tpu.memory_space<vmem>>) attributes {dimension_semantics = [#tpu.dimension_semantics<parallel>], iteration_bounds = array<i64: 2>, scalar_prefetch = 0 : i64, scratch_operands = 2 : i64, tpu.core_type = #tpu.core_type<tc>, window_params = [{transform_indices = @transform_0, window_bounds = array<i64: 1, 16, 16, 4>}, {pipeline_mode = #tpu.pipeline_mode<synchronous>, transform_indices = @transform_1, window_bounds = array<i64: 1, 4>}, {pipeline_mode = #tpu.pipeline_mode<synchronous>, transform_indices = @transform_2, window_bounds = array<i64: 1, 4>}, {pipeline_mode = #tpu.pipeline_mode<synchronous>, transform_indices = @transform_3, window_bounds = array<i64: 36, 4>}, {transform_indices = @transform_4, window_bounds = array<i64: 1, 16, 16, 4>}]} {
    %cst = arith.constant 0.000000e+00 : f32
    %0 = vector.broadcast %cst : f32 to vector<1x18x1x4xf32>
    %cst_0 = arith.constant 0.000000e+00 : f32
    %1 = vector.broadcast %cst_0 : f32 to vector<1x1x18x4xf32>
    %c0 = arith.constant 0 : index
    %c0_1 = arith.constant 0 : index
    %c0_2 = arith.constant 0 : index
    %c0_3 = arith.constant 0 : index
    %2 = vector.load %arg6[%c0, %c0_1, %c0_2, %c0_3] : memref<1x18x18x4xf32, #tpu.memory_space<vmem>>, vector<1x18x1x4xf32>
    tpu.vector_store %arg6[%c0, %c0_1, %c0_2, %c0_3], %0 {strides = array<i32>} : memref<1x18x18x4xf32, #tpu.memory_space<vmem>>, vector<1x18x1x4xf32>,
    %c0_4 = arith.constant 0 : index
    %c0_5 = arith.constant 0 : index
    %c17 = arith.constant 17 : index
    %c0_6 = arith.constant 0 : index
    %3 = vector.load %arg6[%c0_4, %c0_5, %c17, %c0_6] : memref<1x18x18x4xf32, #tpu.memory_space<vmem>>, vector<1x18x1x4xf32>
    tpu.vector_store %arg6[%c0_4, %c0_5, %c17, %c0_6], %0 {strides = array<i32>} : memref<1x18x18x4xf32, #tpu.memory_space<vmem>>, vector<1x18x1x4xf32>,
    %c0_7 = arith.constant 0 : index
    %c0_8 = arith.constant 0 : index
    %c0_9 = arith.constant 0 : index
    %c0_10 = arith.constant 0 : index
    %4 = vector.load %arg6[%c0_7, %c0_8, %c0_9, %c0_10] : memref<1x18x18x4xf32, #tpu.memory_space<vmem>>, vector<1x1x18x4xf32>
    tpu.vector_store %arg6[%c0_7, %c0_8, %c0_9, %c0_10], %1 {strides = array<i32>} : memref<1x18x18x4xf32, #tpu.memory_space<vmem>>, vector<1x1x18x4xf32>,
    %c0_11 = arith.constant 0 : index
    %c17_12 = arith.constant 17 : index
    %c0_13 = arith.constant 0 : index
    %c0_14 = arith.constant 0 : index
    %5 = vector.load %arg6[%c0_11, %c17_12, %c0_13, %c0_14] : memref<1x18x18x4xf32, #tpu.memory_space<vmem>>, vector<1x1x18x4xf32>
    tpu.vector_store %arg6[%c0_11, %c17_12, %c0_13, %c0_14], %1 {strides = array<i32>} : memref<1x18x18x4xf32, #tpu.memory_space<vmem>>, vector<1x1x18x4xf32>,
    %c0_15 = arith.constant 0 : index
    %c0_16 = arith.constant 0 : index
    %c0_17 = arith.constant 0 : index
    %c0_18 = arith.constant 0 : index
    %6 = vector.load %arg1[%c0_15, %c0_16, %c0_17, %c0_18] : memref<1x16x16x4xf32, #tpu.memory_space<vmem>>, vector<1x16x16x4xf32>
    %c0_19 = arith.constant 0 : index
    %c0_20 = arith.constant 0 : index
    %7 = vector.load %arg2[%c0_19, %c0_20] : memref<1x4xf32, #tpu.memory_space<vmem>>, vector<1x4xf32>
    %8 = vector.shape_cast %7 : vector<1x4xf32> to vector<1x1x1x4xf32>
    %c0_21 = arith.constant 0 : index
    %c0_22 = arith.constant 0 : index
    %9 = vector.load %arg3[%c0_21, %c0_22] : memref<1x4xf32, #tpu.memory_space<vmem>>, vector<1x4xf32>
    %10 = vector.shape_cast %9 : vector<1x4xf32> to vector<1x1x1x4xf32>
    %11 = vector.broadcast %8 : vector<1x1x1x4xf32> to vector<1x16x16x4xf32>
    %12 = arith.mulf %6, %11 : vector<1x16x16x4xf32>
    %13 = vector.broadcast %10 : vector<1x1x1x4xf32> to vector<1x16x16x4xf32>
    %14 = arith.addf %12, %13 : vector<1x16x16x4xf32>
    %cst_23 = arith.constant 0.000000e+00 : f32
    %15 = vector.broadcast %cst_23 : f32 to vector<1x16x16x4xf32>
    %16 = arith.maximumf %14, %15 : vector<1x16x16x4xf32>
    %c0_24 = arith.constant 0 : index
    %c1 = arith.constant 1 : index
    %c1_25 = arith.constant 1 : index
    %c0_26 = arith.constant 0 : index
    %17 = vector.load %arg6[%c0_24, %c1, %c1_25, %c0_26] : memref<1x18x18x4xf32, #tpu.memory_space<vmem>>, vector<1x16x16x4xf32>
    tpu.vector_store %arg6[%c0_24, %c1, %c1_25, %c0_26], %16 {strides = array<i32>} : memref<1x18x18x4xf32, #tpu.memory_space<vmem>>, vector<1x16x16x4xf32>,
    %c0_27 = arith.constant 0 : index
    %c0_28 = arith.constant 0 : index
    %c0_29 = arith.constant 0 : index
    %c0_30 = arith.constant 0 : index
    %18 = vector.load %arg6[%c0_27, %c0_28, %c0_29, %c0_30] : memref<1x18x18x4xf32, #tpu.memory_space<vmem>>, vector<1x18x18x4xf32>
    %19 = vector.extract_strided_slice %18 {offsets = [0, 0, 0, 0], sizes = [1, 16, 16, 4], strides = [1, 1, 1, 1]} : vector<1x18x18x4xf32> to vector<1x16x16x4xf32>
    %20 = vector.shape_cast %19 : vector<1x16x16x4xf32> to vector<256x4xf32>
    %c0_31 = arith.constant 0 : index
    %c0_32 = arith.constant 0 : index
    %21 = vector.load %arg7[%c0_31, %c0_32] : memref<256x36xf32, #tpu.memory_space<vmem>>, vector<256x4xf32>
    tpu.vector_store %arg7[%c0_31, %c0_32], %20 {strides = array<i32>} : memref<256x36xf32, #tpu.memory_space<vmem>>, vector<256x4xf32>,
    %22 = vector.extract_strided_slice %18 {offsets = [0, 0, 1, 0], sizes = [1, 16, 16, 4], strides = [1, 1, 1, 1]} : vector<1x18x18x4xf32> to vector<1x16x16x4xf32>
    %23 = vector.shape_cast %22 : vector<1x16x16x4xf32> to vector<256x4xf32>
    %c0_33 = arith.constant 0 : index
    %c4 = arith.constant 4 : index
    %24 = vector.load %arg7[%c0_33, %c4] : memref<256x36xf32, #tpu.memory_space<vmem>>, vector<256x4xf32>
    tpu.vector_store %arg7[%c0_33, %c4], %23 {strides = array<i32>} : memref<256x36xf32, #tpu.memory_space<vmem>>, vector<256x4xf32>,
    %25 = vector.extract_strided_slice %18 {offsets = [0, 0, 2, 0], sizes = [1, 16, 16, 4], strides = [1, 1, 1, 1]} : vector<1x18x18x4xf32> to vector<1x16x16x4xf32>
    %26 = vector.shape_cast %25 : vector<1x16x16x4xf32> to vector<256x4xf32>
    %c0_34 = arith.constant 0 : index
    %c8 = arith.constant 8 : index
    %27 = vector.load %arg7[%c0_34, %c8] : memref<256x36xf32, #tpu.memory_space<vmem>>, vector<256x4xf32>
    tpu.vector_store %arg7[%c0_34, %c8], %26 {strides = array<i32>} : memref<256x36xf32, #tpu.memory_space<vmem>>, vector<256x4xf32>,
    %28 = vector.extract_strided_slice %18 {offsets = [0, 1, 0, 0], sizes = [1, 16, 16, 4], strides = [1, 1, 1, 1]} : vector<1x18x18x4xf32> to vector<1x16x16x4xf32>
    %29 = vector.shape_cast %28 : vector<1x16x16x4xf32> to vector<256x4xf32>
    %c0_35 = arith.constant 0 : index
    %c12 = arith.constant 12 : index
    %30 = vector.load %arg7[%c0_35, %c12] : memref<256x36xf32, #tpu.memory_space<vmem>>, vector<256x4xf32>
    tpu.vector_store %arg7[%c0_35, %c12], %29 {strides = array<i32>} : memref<256x36xf32, #tpu.memory_space<vmem>>, vector<256x4xf32>,
    %31 = vector.extract_strided_slice %18 {offsets = [0, 1, 1, 0], sizes = [1, 16, 16, 4], strides = [1, 1, 1, 1]} : vector<1x18x18x4xf32> to vector<1x16x16x4xf32>
    %32 = vector.shape_cast %31 : vector<1x16x16x4xf32> to vector<256x4xf32>
    %c0_36 = arith.constant 0 : index
    %c16 = arith.constant 16 : index
    %33 = vector.load %arg7[%c0_36, %c16] : memref<256x36xf32, #tpu.memory_space<vmem>>, vector<256x4xf32>
    tpu.vector_store %arg7[%c0_36, %c16], %32 {strides = array<i32>} : memref<256x36xf32, #tpu.memory_space<vmem>>, vector<256x4xf32>,
    %34 = vector.extract_strided_slice %18 {offsets = [0, 1, 2, 0], sizes = [1, 16, 16, 4], strides = [1, 1, 1, 1]} : vector<1x18x18x4xf32> to vector<1x16x16x4xf32>
    %35 = vector.shape_cast %34 : vector<1x16x16x4xf32> to vector<256x4xf32>
    %c0_37 = arith.constant 0 : index
    %c20 = arith.constant 20 : index
    %36 = vector.load %arg7[%c0_37, %c20] : memref<256x36xf32, #tpu.memory_space<vmem>>, vector<256x4xf32>
    tpu.vector_store %arg7[%c0_37, %c20], %35 {strides = array<i32>} : memref<256x36xf32, #tpu.memory_space<vmem>>, vector<256x4xf32>,
    %37 = vector.extract_strided_slice %18 {offsets = [0, 2, 0, 0], sizes = [1, 16, 16, 4], strides = [1, 1, 1, 1]} : vector<1x18x18x4xf32> to vector<1x16x16x4xf32>
    %38 = vector.shape_cast %37 : vector<1x16x16x4xf32> to vector<256x4xf32>
    %c0_38 = arith.constant 0 : index
    %c24 = arith.constant 24 : index
    %39 = vector.load %arg7[%c0_38, %c24] : memref<256x36xf32, #tpu.memory_space<vmem>>, vector<256x4xf32>
    tpu.vector_store %arg7[%c0_38, %c24], %38 {strides = array<i32>} : memref<256x36xf32, #tpu.memory_space<vmem>>, vector<256x4xf32>,
    %40 = vector.extract_strided_slice %18 {offsets = [0, 2, 1, 0], sizes = [1, 16, 16, 4], strides = [1, 1, 1, 1]} : vector<1x18x18x4xf32> to vector<1x16x16x4xf32>
    %41 = vector.shape_cast %40 : vector<1x16x16x4xf32> to vector<256x4xf32>
    %c0_39 = arith.constant 0 : index
    %c28 = arith.constant 28 : index
    %42 = vector.load %arg7[%c0_39, %c28] : memref<256x36xf32, #tpu.memory_space<vmem>>, vector<256x4xf32>
    tpu.vector_store %arg7[%c0_39, %c28], %41 {strides = array<i32>} : memref<256x36xf32, #tpu.memory_space<vmem>>, vector<256x4xf32>,
    %43 = vector.extract_strided_slice %18 {offsets = [0, 2, 2, 0], sizes = [1, 16, 16, 4], strides = [1, 1, 1, 1]} : vector<1x18x18x4xf32> to vector<1x16x16x4xf32>
    %44 = vector.shape_cast %43 : vector<1x16x16x4xf32> to vector<256x4xf32>
    %c0_40 = arith.constant 0 : index
    %c32 = arith.constant 32 : index
    %45 = vector.load %arg7[%c0_40, %c32] : memref<256x36xf32, #tpu.memory_space<vmem>>, vector<256x4xf32>
    tpu.vector_store %arg7[%c0_40, %c32], %44 {strides = array<i32>} : memref<256x36xf32, #tpu.memory_space<vmem>>, vector<256x4xf32>,
    %c0_41 = arith.constant 0 : index
    %c0_42 = arith.constant 0 : index
    %46 = vector.load %arg7[%c0_41, %c0_42] : memref<256x36xf32, #tpu.memory_space<vmem>>, vector<256x36xf32>
    %c0_43 = arith.constant 0 : index
    %c0_44 = arith.constant 0 : index
    %47 = vector.load %arg4[%c0_43, %c0_44] : memref<36x4xf32, #tpu.memory_space<vmem>>, vector<36x4xf32>
    %cst_45 = arith.constant dense<0.000000e+00> : vector<256x4xf32>
    %48 = tpu.matmul %46, %47, %cst_45 {dimension_numbers = #tpu.dot_dimension_numbers<[1], [0], [0], [1], [0, 0, 1, 1], [], []>} : vector<256x36xf32>, vector<36x4xf32>, vector<256x4xf32> -> vector<256x4xf32>
    %49 = vector.shape_cast %48 : vector<256x4xf32> to vector<1x16x16x4xf32>
    %c0_46 = arith.constant 0 : index
    %c0_47 = arith.constant 0 : index
    %c0_48 = arith.constant 0 : index
    %c0_49 = arith.constant 0 : index
    %50 = vector.load %arg5[%c0_46, %c0_47, %c0_48, %c0_49] : memref<1x16x16x4xf32, #tpu.memory_space<vmem>>, vector<1x16x16x4xf32>
    tpu.vector_store %arg5[%c0_46, %c0_47, %c0_48, %c0_49], %49 {strides = array<i32>} : memref<1x16x16x4xf32, #tpu.memory_space<vmem>>, vector<1x16x16x4xf32>,
    return
  }
  func.func @transform_0(%arg0: i32) -> (i32, i32, i32, i32) {
    %c0_i32 = arith.constant 0 : i32
    %c0_i32_0 = arith.constant 0 : i32
    %c0_i32_1 = arith.constant 0 : i32
    %c0_i32_2 = arith.constant 0 : i32
    return %arg0, %c0_i32, %c0_i32_0, %c0_i32_1 : i32, i32, i32, i32
  }
  func.func @transform_1(%arg0: i32) -> (i32, i32) {
    %c0_i32 = arith.constant 0 : i32
    %c0_i32_0 = arith.constant 0 : i32
    %c0_i32_1 = arith.constant 0 : i32
    return %c0_i32, %c0_i32_0 : i32, i32
  }
  func.func @transform_2(%arg0: i32) -> (i32, i32) {
    %c0_i32 = arith.constant 0 : i32
    %c0_i32_0 = arith.constant 0 : i32
    %c0_i32_1 = arith.constant 0 : i32
    return %c0_i32, %c0_i32_0 : i32, i32
  }
  func.func @transform_3(%arg0: i32) -> (i32, i32) {
    %c0_i32 = arith.constant 0 : i32
    %c0_i32_0 = arith.constant 0 : i32
    %c0_i32_1 = arith.constant 0 : i32
    return %c0_i32, %c0_i32_0 : i32, i32
  }
  func.func @transform_4(%arg0: i32) -> (i32, i32, i32, i32) {
    %c0_i32 = arith.constant 0 : i32
    %c0_i32_0 = arith.constant 0 : i32
    %c0_i32_1 = arith.constant 0 : i32
    %c0_i32_2 = arith.constant 0 : i32
    return %arg0, %c0_i32, %c0_i32_0, %c0_i32_1 : i32, i32, i32, i32
  }
}

module attributes {stable_mosaic.version = 11 : i64} {
  func.func @_bnrelu_matmul_add_kernel(%arg0: i32, %arg1: memref<512x4xf32, #tpu.memory_space<vmem>>, %arg2: memref<1x4xf32, #tpu.memory_space<vmem>>, %arg3: memref<1x4xf32, #tpu.memory_space<vmem>>, %arg4: memref<4x16xf32, #tpu.memory_space<vmem>>, %arg5: memref<512x16xf32, #tpu.memory_space<vmem>>, %arg6: memref<512x16xf32, #tpu.memory_space<vmem>>) attributes {dimension_semantics = [#tpu.dimension_semantics<parallel>], iteration_bounds = array<i64: 1>, scalar_prefetch = 0 : i64, scratch_operands = 0 : i64, tpu.core_type = #tpu.core_type<tc>, window_params = [{transform_indices = @transform_0, window_bounds = array<i64: 512, 4>}, {pipeline_mode = #tpu.pipeline_mode<synchronous>, transform_indices = @transform_1, window_bounds = array<i64: 1, 4>}, {pipeline_mode = #tpu.pipeline_mode<synchronous>, transform_indices = @transform_2, window_bounds = array<i64: 1, 4>}, {pipeline_mode = #tpu.pipeline_mode<synchronous>, transform_indices = @transform_3, window_bounds = array<i64: 4, 16>}, {transform_indices = @transform_4, window_bounds = array<i64: 512, 16>}, {transform_indices = @transform_5, window_bounds = array<i64: 512, 16>}]} {
    %c0 = arith.constant 0 : index
    %c0_0 = arith.constant 0 : index
    %0 = vector.load %arg1[%c0, %c0_0] : memref<512x4xf32, #tpu.memory_space<vmem>>, vector<512x4xf32>
    %c0_1 = arith.constant 0 : index
    %c0_2 = arith.constant 0 : index
    %1 = vector.load %arg2[%c0_1, %c0_2] : memref<1x4xf32, #tpu.memory_space<vmem>>, vector<1x4xf32>
    %2 = vector.broadcast %1 : vector<1x4xf32> to vector<512x4xf32>
    %3 = arith.mulf %0, %2 : vector<512x4xf32>
    %c0_3 = arith.constant 0 : index
    %c0_4 = arith.constant 0 : index
    %4 = vector.load %arg3[%c0_3, %c0_4] : memref<1x4xf32, #tpu.memory_space<vmem>>, vector<1x4xf32>
    %5 = vector.broadcast %4 : vector<1x4xf32> to vector<512x4xf32>
    %6 = arith.addf %3, %5 : vector<512x4xf32>
    %cst = arith.constant 0.000000e+00 : f32
    %7 = vector.broadcast %cst : f32 to vector<512x4xf32>
    %8 = arith.maximumf %6, %7 : vector<512x4xf32>
    %c0_5 = arith.constant 0 : index
    %c0_6 = arith.constant 0 : index
    %9 = vector.load %arg4[%c0_5, %c0_6] : memref<4x16xf32, #tpu.memory_space<vmem>>, vector<4x16xf32>
    %cst_7 = arith.constant dense<0.000000e+00> : vector<512x16xf32>
    %10 = tpu.matmul %8, %9, %cst_7 {dimension_numbers = #tpu.dot_dimension_numbers<[1], [0], [0], [1], [0, 0, 1, 1], [], []>} : vector<512x4xf32>, vector<4x16xf32>, vector<512x16xf32> -> vector<512x16xf32>
    %c0_8 = arith.constant 0 : index
    %c0_9 = arith.constant 0 : index
    %11 = vector.load %arg5[%c0_8, %c0_9] : memref<512x16xf32, #tpu.memory_space<vmem>>, vector<512x16xf32>
    %12 = arith.addf %10, %11 : vector<512x16xf32>
    %c0_10 = arith.constant 0 : index
    %c0_11 = arith.constant 0 : index
    %13 = vector.load %arg6[%c0_10, %c0_11] : memref<512x16xf32, #tpu.memory_space<vmem>>, vector<512x16xf32>
    tpu.vector_store %arg6[%c0_10, %c0_11], %12 {strides = array<i32>} : memref<512x16xf32, #tpu.memory_space<vmem>>, vector<512x16xf32>,
    return
  }
  func.func @transform_0(%arg0: i32) -> (i32, i32) {
    %c0_i32 = arith.constant 0 : i32
    %c0_i32_0 = arith.constant 0 : i32
    return %arg0, %c0_i32 : i32, i32
  }
  func.func @transform_1(%arg0: i32) -> (i32, i32) {
    %c0_i32 = arith.constant 0 : i32
    %c0_i32_0 = arith.constant 0 : i32
    %c0_i32_1 = arith.constant 0 : i32
    return %c0_i32, %c0_i32_0 : i32, i32
  }
  func.func @transform_2(%arg0: i32) -> (i32, i32) {
    %c0_i32 = arith.constant 0 : i32
    %c0_i32_0 = arith.constant 0 : i32
    %c0_i32_1 = arith.constant 0 : i32
    return %c0_i32, %c0_i32_0 : i32, i32
  }
  func.func @transform_3(%arg0: i32) -> (i32, i32) {
    %c0_i32 = arith.constant 0 : i32
    %c0_i32_0 = arith.constant 0 : i32
    %c0_i32_1 = arith.constant 0 : i32
    return %c0_i32, %c0_i32_0 : i32, i32
  }
  func.func @transform_4(%arg0: i32) -> (i32, i32) {
    %c0_i32 = arith.constant 0 : i32
    %c0_i32_0 = arith.constant 0 : i32
    return %arg0, %c0_i32 : i32, i32
  }
  func.func @transform_5(%arg0: i32) -> (i32, i32) {
    %c0_i32 = arith.constant 0 : i32
    %c0_i32_0 = arith.constant 0 : i32
    return %arg0, %c0_i32 : i32, i32
  }
}

</mosaic_0001>

<bundles_post_ra>
// kernel: preact_bottleneck_forward.3
= control target key start
LH: loop header
LB: loop body
LE: loop exit
PB: predicated region body
PF: predicated region fallthrough
CT: control target
= control target key end

     0   :  { %vm483_vm0 = vcmask 1043456   ;;  %vm290_vm1 = vcmask 31744   ;;  %s1498_s13 = smov 124   ;;  %vm1192_vm2 = vcmask 130048   ;;  %s2570_s3 = inlined_call_operand.vmem [shape: f32[4,20], index: 3, kind: input, shape index: {}]   ;;  %s2571_s0 = inlined_call_operand.vmem [shape: f32[512,4], index: 0, kind: input, shape index: {}]   ;;  %s2572_s1 = inlined_call_operand.vmem [shape: f32[1,4], index: 1, kind: input, shape index: {}]   ;;  %s2573_s2 = inlined_call_operand.vmem [shape: f32[1,4], index: 2, kind: input, shape index: {}]   ;;  %s2574_s4 = inlined_call_operand.vmem [shape: f32[512,4], index: 4, kind: output, shape index: {0}]   ;;  %s2575_s5 = inlined_call_operand.vmem [shape: f32[512,16], index: 5, kind: output, shape index: {1}]  }
   0x1   :  { %v289_v0 = vld [vmem:[%s2570_s3] sm:$0xf]  ;;  %v20_v6 = vld [vmem:[%s2571_s0 + $0x8] sm:$0xff]  ;;  %v21_v10 = vld [vmem:[%s2571_s0 + $0x10] sm:$0xff] }
   0x2   :  { %v19_v1 = vld [vmem:[%s2571_s0] sm:$0xff]  ;;  %1397 = vmatprep.subr.msk.mxu0 %vm483_vm0, %v289_v0  ;;  %1495 = vmatprep.subr.msk.mxu1 %vm483_vm0, %v289_v0  ;;  %v52_v9 = vld [vmem:[%s2571_s0 + $0x108] sm:$0xff]  ;;  %v22_v11 = vld [vmem:[%s2571_s0 + $0x18] sm:$0xff] }
   0x3   :  { %v1538_v2 = vld [vmem:[%s2572_s1] ss:$0 sm:$0xff]  ;;  %1398 = vmatpush3.msk.msra.mxu0 %vm483_vm0, %v289_v0  ;;  %1496 = vmatpush3.msk.msra.mxu1 %vm483_vm0, %v289_v0  ;;  %v53_v16 = vld [vmem:[%s2571_s0 + $0x110] sm:$0xff]  ;;  %v54_v17 = vld [vmem:[%s2571_s0 + $0x118] sm:$0xff] }
   0x4   :  { %v90_v3 = vmul.f32 %v1538_v2, %v19_v1  ;;  %v1544_v4 = vld [vmem:[%s2573_s2] ss:$0 sm:$0xff]  ;;  %v91_v8 = vmul.f32 %v1538_v2, %v20_v6  ;;  %v123_v13 = vmul.f32 %v1538_v2, %v52_v9  ;;  %v92_v14 = vmul.f32 %v1538_v2, %v21_v10  ;;  %v24_v27 = vld [vmem:[%s2571_s0 + $0x28] sm:$0xff]  ;;  %v25_v34 = vld [vmem:[%s2571_s0 + $0x30] sm:$0xff] }
   0x5   :  { %v51_v5 = vld [vmem:[%s2571_s0 + $0x100] sm:$0xff]  ;;  %v93_v15 = vmul.f32 %v1538_v2, %v22_v11  ;;  %v124_v20 = vmul.f32 %v1538_v2, %v53_v16  ;;  %v125_v21 = vmul.f32 %v1538_v2, %v54_v17  ;;  %v56_v33 = vld [vmem:[%s2571_s0 + $0x128] sm:$0xff]  ;;  %v26_v38 = vld [vmem:[%s2571_s0 + $0x38] sm:$0xff]  ;;  %v95_v42 = vmul.f32 %v1538_v2, %v24_v27 }
   0x6   :  { %v122_v7 = vmul.f32 %v1538_v2, %v51_v5  ;;  %v161_v12 = vadd.f32 %v1544_v4, %v90_v3  ;;  %v162_v19 = vadd.f32 %v1544_v4, %v91_v8  ;;  %v23_v22 = vld [vmem:[%s2571_s0 + $0x20] sm:$0xff]  ;;  %v194_v24 = vadd.f32 %v1544_v4, %v123_v13  ;;  %v57_v39 = vld [vmem:[%s2571_s0 + $0x130] sm:$0xff]  ;;  %v58_v44 = vld [vmem:[%s2571_s0 + $0x138] sm:$0xff] }
   0x7   :  { %v163_v25 = vadd.f32 %v1544_v4, %v92_v14  ;;  %v164_v26 = vadd.f32 %v1544_v4, %v93_v15  ;;  %v55_v28 = vld [vmem:[%s2571_s0 + $0x120] sm:$0xff]  ;;  %v195_v31 = vadd.f32 %v1544_v4, %v124_v20  ;;  %v196_v32 = vadd.f32 %v1544_v4, %v125_v21  ;;  %v28_v58 = vld [vmem:[%s2571_s0 + $0x48] sm:$0xff]  ;;  %v29_v1 = vld [vmem:[%s2571_s0 + $0x50] sm:$0xff] }
   0x8   :  { %v193_v18 = vadd.f32 %v1544_v4, %v122_v7  ;;  %v225_v23 = vmax.f32 %v161_v12, 0.0  ;;  %v226_v30 = vmax.f32 %v162_v19, 0.0  ;;  %v258_v35 = vmax.f32 %v194_v24, 0.0  ;;  %v27_v53 = vld [vmem:[%s2571_s0 + $0x40] sm:$0xff]  ;;  %v60_v0 = vld [vmem:[%s2571_s0 + $0x148] sm:$0xff]  ;;  %v30_v8 = vld [vmem:[%s2571_s0 + $0x58] sm:$0xff] }
   0x9   :  { %v227_v36 = vmax.f32 %v163_v25, 0.0  ;;  %v94_v37 = vmul.f32 %v1538_v2, %v23_v22  ;;  %v228_v40 = vmax.f32 %v164_v26, 0.0  ;;  %v259_v41 = vmax.f32 %v195_v31, 0.0  ;;  %v59_v59 = vld [vmem:[%s2571_s0 + $0x140] sm:$0xff]  ;;  %v61_v9 = vld [vmem:[%s2571_s0 + $0x150] sm:$0xff]  ;;  %v62_v14 = vld [vmem:[%s2571_s0 + $0x158] sm:$0xff] }
   0xa   :  { %v257_v29 = vmax.f32 %v193_v18, 0.0  ;;  %1399 = vmatprep.mubr.msk.f32.mxu0 %vm290_vm1, %v225_v23  ;;  %v126_v43 = vmul.f32 %v1538_v2, %v55_v28  ;;  %v260_v45 = vmax.f32 %v196_v32, 0.0  ;;  %v127_v47 = vmul.f32 %v1538_v2, %v56_v33  ;;  %v31_v23 = vld [vmem:[%s2571_s0 + $0x60] sm:$0xff]  ;;  %v32_v28 = vld [vmem:[%s2571_s0 + $0x68] sm:$0xff]  ;;  %v33_v33 = vld [vmem:[%s2571_s0 + $0x70] sm:$0xff] }
   0xb   :  { %1400 = vmatmul.mubr.msk.f32.vlgmr.msra.gmra.mrb[0].mxu0 %vm290_vm1, %v226_v30  ;;  %v165_v46 = vadd.f32 %v1544_v4, %v94_v37  ;;  %v96_v48 = vmul.f32 %v1538_v2, %v25_v34  ;;  %v166_v49 = vadd.f32 %v1544_v4, %v95_v42  ;;  %v97_v51 = vmul.f32 %v1538_v2, %v26_v38  ;;  %v64_v32 = vld [vmem:[%s2571_s0 + $0x168] sm:$0xff]  ;;  %v65_v37 = vld [vmem:[%s2571_s0 + $0x170] sm:$0xff] }
   0xc   :  { %1447 = vmatprep.mubr.msk.f32.mxu1 %vm290_vm1, %v257_v29  ;;  %1402 = vmatprep.mubr.msk.f32.mxu0 %vm290_vm1, %v227_v36  ;;  %v197_v50 = vadd.f32 %v1544_v4, %v126_v43  ;;  %v128_v52 = vmul.f32 %v1538_v2, %v57_v39  ;;  %v198_v55 = vadd.f32 %v1544_v4, %v127_v47  ;;  %v63_v29 = vld [vmem:[%s2571_s0 + $0x160] sm:$0xff]  ;;  %v66_v47 = vld [vmem:[%s2571_s0 + $0x178] sm:$0xff] }
   0xd   :  { %1448 = vmatmul.mubr.msk.f32.vlgmr.msra.gmra.mrb[0].mxu1 %vm290_vm1, %v258_v35  ;;  %v229_v54 = vmax.f32 %v165_v46, 0.0  ;;  %v167_v56 = vadd.f32 %v1544_v4, %v96_v48  ;;  %v129_v57 = vmul.f32 %v1538_v2, %v58_v44  ;;  %v230_v60 = vmax.f32 %v166_v49, 0.0  ;;  %v34_v46 = vld [vmem:[%s2571_s0 + $0x78] sm:$0xff] }
   0xe   :  { %1450 = vmatprep.mubr.msk.f32.mxu1 %vm290_vm1, %v259_v41  ;;  %v261_v61 = vmax.f32 %v197_v50, 0.0  ;;  %v168_v62 = vadd.f32 %v1544_v4, %v97_v51  ;;  %v199_v63 = vadd.f32 %v1544_v4, %v128_v52  ;;  %v262_v3 = vmax.f32 %v198_v55, 0.0  ;;  %v35_v51 = vld [vmem:[%s2571_s0 + $0x80] sm:$0xff] }
   0xf   :  { %1403 = vmatmul.mubr.msk.f32.gmra.mrb[2].mxu0 %vm290_vm1, %v228_v40  ;;  %v231_v5 = vmax.f32 %v167_v56, 0.0  ;;  %v200_v6 = vadd.f32 %v1544_v4, %v129_v57  ;;  %v98_v7 = vmul.f32 %v1538_v2, %v27_v53  ;;  %v99_v12 = vmul.f32 %v1538_v2, %v28_v58  ;;  %v67_v53 = vld [vmem:[%s2571_s0 + $0x180] sm:$0xff] }
  0x10   :  { %1405 = vmatprep.mubr.msk.f32.mxu0 %vm290_vm1, %v229_v54  ;;  %v232_v10 = vmax.f32 %v168_v62, 0.0  ;;  %v263_v11 = vmax.f32 %v199_v63, 0.0  ;;  %v130_v13 = vmul.f32 %v1538_v2, %v59_v59  ;;  %v131_v17 = vmul.f32 %v1538_v2, %v60_v0  ;;  %v36_v62 = vld [vmem:[%s2571_s0 + $0x88] sm:$0xff] }
  0x11   :  { %1451 = vmatmul.mubr.msk.f32.gmra.mrb[2].mxu1 %vm290_vm1, %v260_v45  ;;  %v264_v15 = vmax.f32 %v200_v6, 0.0  ;;  %v169_v16 = vadd.f32 %v1544_v4, %v98_v7  ;;  %v100_v18 = vmul.f32 %v1538_v2, %v29_v1  ;;  %v170_v19 = vadd.f32 %v1544_v4, %v99_v12  ;;  %v69_v7 = vld [vmem:[%s2571_s0 + $0x190] sm:$0xff]  ;;  %v38_v12 = vld [vmem:[%s2571_s0 + $0x98] sm:$0xff] }
  0x12   :  { %1453 = vmatprep.mubr.msk.f32.mxu1 %vm290_vm1, %v261_v61  ;;  %v201_v20 = vadd.f32 %v1544_v4, %v130_v13  ;;  %v101_v21 = vmul.f32 %v1538_v2, %v30_v8  ;;  %v132_v22 = vmul.f32 %v1538_v2, %v61_v9  ;;  %v202_v25 = vadd.f32 %v1544_v4, %v131_v17  ;;  %v70_v17 = vld [vmem:[%s2571_s0 + $0x198] sm:$0xff] }
  0x13   :  { %1406 = vmatmul.mubr.msk.f32.gmra.mrb[4].mxu0 %vm290_vm1, %v230_v60  ;;  %v233_v24 = vmax.f32 %v169_v16, 0.0  ;;  %v171_v26 = vadd.f32 %v1544_v4, %v100_v18  ;;  %v133_v27 = vmul.f32 %v1538_v2, %v62_v14  ;;  %v234_v34 = vmax.f32 %v170_v19, 0.0 }
  0x14   :  { %1408 = vmatprep.mubr.msk.f32.mxu0 %vm290_vm1, %v231_v5  ;;  %v265_v30 = vmax.f32 %v201_v20, 0.0  ;;  %v203_v31 = vadd.f32 %v1544_v4, %v132_v22  ;;  %v172_v35 = vadd.f32 %v1544_v4, %v101_v21  ;;  %v102_v36 = vmul.f32 %v1538_v2, %v31_v23  ;;  %v37_v5 = vld [vmem:[%s2571_s0 + $0x90] sm:$0xff]  ;;  %v39_v21 = vld [vmem:[%s2571_s0 + $0xa0] sm:$0xff] }
  0x15   :  { %1454 = vmatmul.mubr.msk.f32.gmra.mrb[4].mxu1 %vm290_vm1, %v262_v3  ;;  %v266_v38 = vmax.f32 %v202_v25, 0.0  ;;  %v204_v39 = vadd.f32 %v1544_v4, %v133_v27  ;;  %v103_v40 = vmul.f32 %v1538_v2, %v32_v28  ;;  %v134_v41 = vmul.f32 %v1538_v2, %v63_v29  ;;  %v68_v3 = vld [vmem:[%s2571_s0 + $0x188] sm:$0xff]  ;;  %v71_v23 = vld [vmem:[%s2571_s0 + $0x1a0] sm:$0xff] }
  0x16   :  { %1456 = vmatprep.mubr.msk.f32.mxu1 %vm290_vm1, %v263_v11  ;;  %v235_v42 = vmax.f32 %v171_v26, 0.0  ;;  %v173_v43 = vadd.f32 %v1544_v4, %v102_v36  ;;  %v135_v44 = vmul.f32 %v1538_v2, %v64_v32  ;;  %v104_v45 = vmul.f32 %v1538_v2, %v33_v33  ;;  %v40_v32 = vld [vmem:[%s2571_s0 + $0xa8] sm:$0xff] }
  0x17   :  { %1409 = vmatmul.mubr.msk.f32.gmra.mrb[6].mxu0 %vm290_vm1, %v232_v10  ;;  %v267_v48 = vmax.f32 %v203_v31, 0.0  ;;  %v205_v49 = vadd.f32 %v1544_v4, %v134_v41  ;;  %v136_v50 = vmul.f32 %v1538_v2, %v65_v37  ;;  %v174_v52 = vadd.f32 %v1544_v4, %v103_v40  ;;  %v72_v33 = vld [vmem:[%s2571_s0 + $0x1a8] sm:$0xff]  ;;  %v41_v37 = vld [vmem:[%s2571_s0 + $0xb0] sm:$0xff] }
  0x18   :  { %1411 = vmatprep.mubr.msk.f32.mxu0 %vm290_vm1, %v233_v24  ;;  %v236_v54 = vmax.f32 %v172_v35, 0.0  ;;  %v206_v55 = vadd.f32 %v1544_v4, %v135_v44  ;;  %v105_v56 = vmul.f32 %v1538_v2, %v34_v46  ;;  %v137_v57 = vmul.f32 %v1538_v2, %v66_v47 }
  0x19   :  { %1457 = vmatmul.mubr.msk.f32.gmra.mrb[6].mxu1 %vm290_vm1, %v264_v15  ;;  %v268_v58 = vmax.f32 %v204_v39, 0.0  ;;  %v237_v59 = vmax.f32 %v173_v43, 0.0  ;;  %v175_v60 = vadd.f32 %v1544_v4, %v104_v45  ;;  %v106_v61 = vmul.f32 %v1538_v2, %v35_v51  ;;  %v73_v39 = vld [vmem:[%s2571_s0 + $0x1b0] sm:$0xff] }
  0x1a   :  { %1459 = vmatprep.mubr.msk.f32.mxu1 %vm290_vm1, %v265_v30  ;;  %v269_v63 = vmax.f32 %v205_v49, 0.0  ;;  %v207_v0 = vadd.f32 %v1544_v4, %v136_v50  ;;  %v138_v1 = vmul.f32 %v1538_v2, %v67_v53  ;;  %v238_v6 = vmax.f32 %v174_v52, 0.0  ;;  %v74_v52 = vld [vmem:[%s2571_s0 + $0x1b8] sm:$0xff]  ;;  %v43_v53 = vld [vmem:[%s2571_s0 + $0xc0] sm:$0xff] }
  0x1b   :  { %1412 = vmatmul.mubr.msk.f32.gmra.mrb[8].mxu0 %vm290_vm1, %v234_v34  ;;  %v270_v8 = vmax.f32 %v206_v55, 0.0  ;;  %v176_v9 = vadd.f32 %v1544_v4, %v105_v56  ;;  %v208_v10 = vadd.f32 %v1544_v4, %v137_v57  ;;  %v107_v11 = vmul.f32 %v1538_v2, %v36_v62  ;;  %v75_v55 = vld [vmem:[%s2571_s0 + $0x1c0] sm:$0xff] }
  0x1c   :  { %1414 = vmatprep.mubr.msk.f32.mxu0 %vm290_vm1, %v235_v42  ;;  %v239_v13 = vmax.f32 %v175_v60, 0.0  ;;  %v177_v14 = vadd.f32 %v1544_v4, %v106_v61  ;;  %v139_v15 = vmul.f32 %v1538_v2, %v68_v3  ;;  %v108_v16 = vmul.f32 %v1538_v2, %v37_v5  ;;  %v44_v60 = vld [vmem:[%s2571_s0 + $0xc8] sm:$0xff] }
  0x1d   :  { %1460 = vmatmul.mubr.msk.f32.gmra.mrb[8].mxu1 %vm290_vm1, %v266_v38  ;;  %v271_v18 = vmax.f32 %v207_v0, 0.0  ;;  %v209_v19 = vadd.f32 %v1544_v4, %v138_v1  ;;  %v140_v20 = vmul.f32 %v1538_v2, %v69_v7  ;;  %v109_v22 = vmul.f32 %v1538_v2, %v38_v12  ;;  %v76_v1 = vld [vmem:[%s2571_s0 + $0x1c8] sm:$0xff]  ;;  %v45_v7 = vld [vmem:[%s2571_s0 + $0xd0] sm:$0xff] }
  0x1e   :  { %1462 = vmatprep.mubr.msk.f32.mxu1 %vm290_vm1, %v267_v48  ;;  %v240_v24 = vmax.f32 %v176_v9, 0.0  ;;  %v272_v25 = vmax.f32 %v208_v10, 0.0  ;;  %v178_v26 = vadd.f32 %v1544_v4, %v107_v11  ;;  %v141_v27 = vmul.f32 %v1538_v2, %v70_v17  ;;  %v42_v48 = vld [vmem:[%s2571_s0 + $0xb8] sm:$0xff]  ;;  %v77_v9 = vld [vmem:[%s2571_s0 + $0x1d0] sm:$0xff] }
  0x1f   :  { %1415 = vmatmul.mubr.msk.f32.gmra.mrb[10].mxu0 %vm290_vm1, %v236_v54  ;;  %v241_v28 = vmax.f32 %v177_v14, 0.0  ;;  %v210_v29 = vadd.f32 %v1544_v4, %v139_v15  ;;  %v179_v30 = vadd.f32 %v1544_v4, %v108_v16  ;;  %v110_v31 = vmul.f32 %v1538_v2, %v39_v21 }
  0x20   :  { %1417 = vmatprep.mubr.msk.f32.mxu0 %vm290_vm1, %v237_v59  ;;  %v273_v34 = vmax.f32 %v209_v19, 0.0  ;;  %v211_v35 = vadd.f32 %v1544_v4, %v140_v20  ;;  %v142_v36 = vmul.f32 %v1538_v2, %v71_v23  ;;  %v180_v38 = vadd.f32 %v1544_v4, %v109_v22  ;;  %v78_v19 = vld [vmem:[%s2571_s0 + $0x1d8] sm:$0xff]  ;;  %v47_v23 = vld [vmem:[%s2571_s0 + $0xe0] sm:$0xff] }
  0x21   :  { %1463 = vmatmul.mubr.msk.f32.gmra.mrb[10].mxu1 %vm290_vm1, %v268_v58  ;;  %v242_v40 = vmax.f32 %v178_v26, 0.0  ;;  %v212_v41 = vadd.f32 %v1544_v4, %v141_v27  ;;  %v111_v42 = vmul.f32 %v1538_v2, %v40_v32  ;;  %v143_v43 = vmul.f32 %v1538_v2, %v72_v33 }
  0x22   :  { %1465 = vmatprep.mubr.msk.f32.mxu1 %vm290_vm1, %v269_v63  ;;  %v274_v44 = vmax.f32 %v210_v29, 0.0  ;;  %v243_v45 = vmax.f32 %v179_v30, 0.0  ;;  %v181_v46 = vadd.f32 %v1544_v4, %v110_v31  ;;  %v112_v47 = vmul.f32 %v1538_v2, %v41_v37 }
  0x23   :  { %1418 = vmatmul.mubr.msk.f32.gmra.mrb[12].mxu0 %vm290_vm1, %v238_v6  ;;  %v275_v49 = vmax.f32 %v211_v35, 0.0  ;;  %v213_v50 = vadd.f32 %v1544_v4, %v142_v36  ;;  %v144_v51 = vmul.f32 %v1538_v2, %v73_v39  ;;  %v244_v54 = vmax.f32 %v180_v38, 0.0  ;;  %v80_v38 = vld [vmem:[%s2571_s0 + $0x1e8] sm:$0xff]  ;;  %v49_v39 = vld [vmem:[%s2571_s0 + $0xf0] sm:$0xff] }
  0x24   :  { %1420 = vmatprep.mubr.msk.f32.mxu0 %vm290_vm1, %v239_v13  ;;  %v276_v56 = vmax.f32 %v212_v41, 0.0  ;;  %v182_v57 = vadd.f32 %v1544_v4, %v111_v42  ;;  %v214_v58 = vadd.f32 %v1544_v4, %v143_v43  ;;  %v113_v59 = vmul.f32 %v1538_v2, %v42_v48  ;;  %v81_v41 = vld [vmem:[%s2571_s0 + $0x1f0] sm:$0xff] }
  0x25   :  { %1466 = vmatmul.mubr.msk.f32.gmra.mrb[12].mxu1 %vm290_vm1, %v270_v8  ;;  %v245_v61 = vmax.f32 %v181_v46, 0.0  ;;  %v183_v62 = vadd.f32 %v1544_v4, %v112_v47  ;;  %v145_v63 = vmul.f32 %v1538_v2, %v74_v52  ;;  %v114_v0 = vmul.f32 %v1538_v2, %v43_v53 }
  0x26   :  { %1468 = vmatprep.mubr.msk.f32.mxu1 %vm290_vm1, %v271_v18  ;;  %v277_v3 = vmax.f32 %v213_v50, 0.0  ;;  %v215_v5 = vadd.f32 %v1544_v4, %v144_v51  ;;  %v146_v6 = vmul.f32 %v1538_v2, %v75_v55  ;;  %v115_v8 = vmul.f32 %v1538_v2, %v44_v60  ;;  %v46_v18 = vld [vmem:[%s2571_s0 + $0xd8] sm:$0xff] }
  0x27   :  { %1421 = vmatmul.mubr.msk.f32.gmra.mrb[14].mxu0 %vm290_vm1, %v240_v24  ;;  %v246_v10 = vmax.f32 %v182_v57, 0.0  ;;  %v278_v11 = vmax.f32 %v214_v58, 0.0  ;;  %v184_v12 = vadd.f32 %v1544_v4, %v113_v59  ;;  %v147_v13 = vmul.f32 %v1538_v2, %v76_v1  ;;  %v50_v50 = vld [vmem:[%s2571_s0 + $0xf8] sm:$0xff] }
  0x28   :  { %1423 = vmatprep.mubr.msk.f32.mxu0 %vm290_vm1, %v241_v28  ;;  %v247_v14 = vmax.f32 %v183_v62, 0.0  ;;  %v216_v15 = vadd.f32 %v1544_v4, %v145_v63  ;;  %v185_v16 = vadd.f32 %v1544_v4, %v114_v0  ;;  %v116_v17 = vmul.f32 %v1538_v2, %v45_v7 }
  0x29   :  { %1469 = vmatmul.mubr.msk.f32.gmra.mrb[14].mxu1 %vm290_vm1, %v272_v25  ;;  %v279_v20 = vmax.f32 %v215_v5, 0.0  ;;  %v217_v21 = vadd.f32 %v1544_v4, %v146_v6  ;;  %v148_v22 = vmul.f32 %v1538_v2, %v77_v9  ;;  %v186_v24 = vadd.f32 %v1544_v4, %v115_v8  ;;  %v79_v25 = vld [vmem:[%s2571_s0 + $0x1e0] sm:$0xff] }
  0x2a   :  { %1471 = vmatprep.mubr.msk.f32.mxu1 %vm290_vm1, %v273_v34  ;;  %v248_v26 = vmax.f32 %v184_v12, 0.0  ;;  %v218_v27 = vadd.f32 %v1544_v4, %v147_v13  ;;  %v117_v28 = vmul.f32 %v1538_v2, %v46_v18  ;;  %v149_v29 = vmul.f32 %v1538_v2, %v78_v19  ;;  %v48_v34 = vld [vmem:[%s2571_s0 + $0xe8] sm:$0xff] }
  0x2b   :  { %1424 = vmatmul.mubr.msk.f32.gmra.mrb[16].mxu0 %vm290_vm1, %v242_v40  ;;  %v280_v30 = vmax.f32 %v216_v15, 0.0  ;;  %v249_v31 = vmax.f32 %v185_v16, 0.0  ;;  %v187_v32 = vadd.f32 %v1544_v4, %v116_v17  ;;  %v118_v33 = vmul.f32 %v1538_v2, %v47_v23 }
  0x2c   :  { %1426 = vmatprep.mubr.msk.f32.mxu0 %vm290_vm1, %v243_v45  ;;  %v281_v35 = vmax.f32 %v217_v21, 0.0  ;;  %v219_v36 = vadd.f32 %v1544_v4, %v148_v22  ;;  %v150_v37 = vmul.f32 %v1538_v2, %v79_v25  ;;  %v250_v40 = vmax.f32 %v186_v24, 0.0 }
  0x2d   :  { %1472 = vmatmul.mubr.msk.f32.gmra.mrb[16].mxu1 %vm290_vm1, %v274_v44  ;;  %v282_v42 = vmax.f32 %v218_v27, 0.0  ;;  %v188_v43 = vadd.f32 %v1544_v4, %v117_v28  ;;  %v220_v44 = vadd.f32 %v1544_v4, %v149_v29  ;;  %v119_v45 = vmul.f32 %v1538_v2, %v48_v34 }
  0x2e   :  { %1474 = vmatprep.mubr.msk.f32.mxu1 %vm290_vm1, %v275_v49  ;;  %v251_v46 = vmax.f32 %v187_v32, 0.0  ;;  %v189_v47 = vadd.f32 %v1544_v4, %v118_v33  ;;  %v151_v48 = vmul.f32 %v1538_v2, %v80_v38  ;;  %v120_v49 = vmul.f32 %v1538_v2, %v49_v39 }
  0x2f   :  { %1427 = vmatmul.mubr.msk.f32.gmra.mrb[18].mxu0 %vm290_vm1, %v244_v54  ;;  %v283_v51 = vmax.f32 %v219_v36, 0.0  ;;  %v221_v52 = vadd.f32 %v1544_v4, %v150_v37  ;;  %v152_v53 = vmul.f32 %v1538_v2, %v81_v41  ;;  %v82_v54 = vld [vmem:[%s2571_s0 + $0x1f8] sm:$0xff]  ;;  %v252_v55 = vmax.f32 %v188_v43, 0.0 }
  0x30   :  { %1429 = vmatprep.mubr.msk.f32.mxu0 %vm290_vm1, %v245_v61  ;;  %v190_v57 = vadd.f32 %v1544_v4, %v119_v45  ;;  %v121_v58 = vmul.f32 %v1538_v2, %v50_v50  ;;  %v253_v59 = vmax.f32 %v189_v47, 0.0  ;;  %v222_v60 = vadd.f32 %v1544_v4, %v151_v48 }
  0x31   :  { %1475 = vmatmul.mubr.msk.f32.gmra.mrb[18].mxu1 %vm290_vm1, %v276_v56  ;;  %v284_v56 = vmax.f32 %v220_v44, 0.0  ;;  %v191_v61 = vadd.f32 %v1544_v4, %v120_v49  ;;  %v153_v62 = vmul.f32 %v1538_v2, %v82_v54  ;;  %v285_v63 = vmax.f32 %v221_v52, 0.0 }
  0x32   :  { %1477 = vmatprep.mubr.msk.f32.mxu1 %vm290_vm1, %v277_v3  ;;  %v223_v0 = vadd.f32 %v1544_v4, %v152_v53  ;;  %v254_v1 = vmax.f32 %v190_v57, 0.0  ;;  %v192_v3 = vadd.f32 %v1544_v4, %v121_v58  ;;  %v286_v5 = vmax.f32 %v222_v60, 0.0 }
  0x33   :  { %1430 = vmatmul.mubr.msk.f32.gmra.mrb[20].mxu0 %vm290_vm1, %v246_v10  ;;  %v255_v6 = vmax.f32 %v191_v61, 0.0  ;;  %v224_v7 = vadd.f32 %v1544_v4, %v153_v62 }
  0x34   :  { %1432 = vmatprep.mubr.msk.f32.mxu0 %vm290_vm1, %v247_v14  ;;  %v287_v2 = vmax.f32 %v223_v0, 0.0  ;;  %v256_v8 = vmax.f32 %v192_v3, 0.0 }
  0x35   :  { %1478 = vmatmul.mubr.msk.f32.gmra.mrb[20].mxu1 %vm290_vm1, %v278_v11  ;;  %v288_v9 = vmax.f32 %v224_v7, 0.0 }
  0x36   :  { %1480 = vmatprep.mubr.msk.f32.mxu1 %vm290_vm1, %v279_v20 }
  0x37   :  { %1433 = vmatmul.mubr.msk.f32.gmra.mrb[22].mxu0 %vm290_vm1, %v248_v26 }
  0x38   :  { %1435 = vmatprep.mubr.msk.f32.mxu0 %vm290_vm1, %v249_v31 }
  0x39   :  { %1481 = vmatmul.mubr.msk.f32.gmra.mrb[22].mxu1 %vm290_vm1, %v280_v30 }
  0x3a   :  { %1483 = vmatprep.mubr.msk.f32.mxu1 %vm290_vm1, %v281_v35 }
  0x3b   :  { %1436 = vmatmul.mubr.msk.f32.gmra.mrb[24].mxu0 %vm290_vm1, %v250_v40 }
  0x3c   :  { %1438 = vmatprep.mubr.msk.f32.mxu0 %vm290_vm1, %v251_v46 }
  0x3d   :  { %1484 = vmatmul.mubr.msk.f32.gmra.mrb[24].mxu1 %vm290_vm1, %v282_v42 }
  0x3e   :  { %1486 = vmatprep.mubr.msk.f32.mxu1 %vm290_vm1, %v283_v51 }
  0x3f   :  { %1439 = vmatmul.mubr.msk.f32.gmra.mrb[26].mxu0 %vm290_vm1, %v252_v55 }
  0x40   :  { %1441 = vmatprep.mubr.msk.f32.mxu0 %vm290_vm1, %v253_v59 }
  0x41   :  { %1487 = vmatmul.mubr.msk.f32.gmra.mrb[26].mxu1 %vm290_vm1, %v284_v56 }
  0x42   :  { %1489 = vmatprep.mubr.msk.f32.mxu1 %vm290_vm1, %v285_v63 }
  0x43   :  { %1442 = vmatmul.mubr.msk.f32.gmra.mrb[28].mxu0 %vm290_vm1, %v254_v1 }
  0x44   :  { %1444 = vmatprep.mubr.msk.f32.mxu0 %vm290_vm1, %v255_v6 }
  0x45   :  { %1490 = vmatmul.mubr.msk.f32.gmra.mrb[28].mxu1 %vm290_vm1, %v286_v5 }
  0x46   :  { %1492 = vmatprep.mubr.msk.f32.mxu1 %vm290_vm1, %v287_v2 }
  0x47   :  { %1445 = vmatmul.mubr.msk.f32.gmra.mrb[30].mxu0 %vm290_vm1, %v256_v8 }
  0x49   :  { %1493 = vmatmul.mubr.msk.f32.gmra.mrb[30].mxu1 %vm290_vm1, %v288_v9 }
  0xde   :  { %v1401_v10 = vpop.f32.mrb[0].mxu0 }
  0xdf   :  { %873 = vst.msk [vmem:[%s2574_s4 + $0x8] sm:$0xff] %vm290_vm1, %v1401_v10  ;;  %1002 = vrot.lane.b32.xlu0 %v1401_v10, %s1498_s13  ;;  %v553_v11 = vpop.f32.mrb[1].mxu0 }
  0xe0   :  { %v1449_v4 = vpop.f32.mrb[0].mxu1  ;;  %872 = vst.msk [vmem:[%s2574_s4] sm:$0xff] %vm290_vm1, %v553_v11 }
  0xe1   :  { %905 = vst.msk [vmem:[%s2574_s4 + $0x108] sm:$0xff] %vm290_vm1, %v1449_v4  ;;  %1066 = vrot.lane.b32.xlu1 %v1449_v4, %s1498_s13  ;;  %v713_v12 = vpop.f32.mrb[1].mxu1 }
  0xe2   :  { %904 = vst.msk [vmem:[%s2574_s4 + $0x100] sm:$0xff] %vm290_vm1, %v713_v12  ;;  %v1404_v13 = vpop.f32.mrb[2].mxu0 }
  0xe3   :  { %875 = vst.msk [vmem:[%s2574_s4 + $0x18] sm:$0xff] %vm290_vm1, %v1404_v13  ;;  %1000 = vrot.lane.b32.xlu0 %v553_v11, %s1498_s13  ;;  %v563_v14 = vpop.f32.mrb[3].mxu0 }
  0xe4   :  { %v1452_v15 = vpop.f32.mrb[2].mxu1  ;;  %874 = vst.msk [vmem:[%s2574_s4 + $0x10] sm:$0xff] %vm290_vm1, %v563_v14 }
  0xe5   :  { %1006 = vrot.lane.b32.xlu1 %v1404_v13, %s1498_s13  ;;  %907 = vst.msk [vmem:[%s2574_s4 + $0x118] sm:$0xff] %vm290_vm1, %v1452_v15  ;;  %v723_v16 = vpop.f32.mrb[3].mxu1 }
  0xe6   :  { %906 = vst.msk [vmem:[%s2574_s4 + $0x110] sm:$0xff] %vm290_vm1, %v723_v16  ;;  %v1407_v17 = vpop.f32.mrb[4].mxu0 }
  0xe7   :  { %1064 = vrot.lane.b32.xlu0 %v713_v12, %s1498_s13  ;;  %877 = vst.msk [vmem:[%s2574_s4 + $0x28] sm:$0xff] %vm290_vm1, %v1407_v17  ;;  %v573_v18 = vpop.f32.mrb[5].mxu0 }
  0xe8   :  { %v1455_v19 = vpop.f32.mrb[4].mxu1  ;;  %876 = vst.msk [vmem:[%s2574_s4 + $0x20] sm:$0xff] %vm290_vm1, %v573_v18 }
  0xe9   :  { %1070 = vrot.lane.b32.xlu1 %v1452_v15, %s1498_s13  ;;  %909 = vst.msk [vmem:[%s2574_s4 + $0x128] sm:$0xff] %vm290_vm1, %v1455_v19  ;;  %v733_v20 = vpop.f32.mrb[5].mxu1 }
  0xea   :  { %908 = vst.msk [vmem:[%s2574_s4 + $0x120] sm:$0xff] %vm290_vm1, %v733_v20  ;;  %v1410_v21 = vpop.f32.mrb[6].mxu0 }
  0xeb   :  { %1068 = vrot.lane.b32.xlu0 %v723_v16, %s1498_s13  ;;  %879 = vst.msk [vmem:[%s2574_s4 + $0x38] sm:$0xff] %vm290_vm1, %v1410_v21  ;;  %v583_v22 = vpop.f32.mrb[7].mxu0 }
  0xec   :  { %v1458_v23 = vpop.f32.mrb[6].mxu1  ;;  %878 = vst.msk [vmem:[%s2574_s4 + $0x30] sm:$0xff] %vm290_vm1, %v583_v22 }
  0xed   :  { %1004 = vrot.lane.b32.xlu1 %v563_v14, %s1498_s13  ;;  %911 = vst.msk [vmem:[%s2574_s4 + $0x138] sm:$0xff] %vm290_vm1, %v1458_v23  ;;  %v743_v24 = vpop.f32.mrb[7].mxu1 }
  0xee   :  { %910 = vst.msk [vmem:[%s2574_s4 + $0x130] sm:$0xff] %vm290_vm1, %v743_v24  ;;  %v1413_v25 = vpop.f32.mrb[8].mxu0 }
  0xef   :  { %1008 = vrot.lane.b32.xlu0 %v573_v18, %s1498_s13  ;;  %881 = vst.msk [vmem:[%s2574_s4 + $0x48] sm:$0xff] %vm290_vm1, %v1413_v25  ;;  %v593_v26 = vpop.f32.mrb[9].mxu0 }
  0xf0   :  { %v1461_v27 = vpop.f32.mrb[8].mxu1  ;;  %880 = vst.msk [vmem:[%s2574_s4 + $0x40] sm:$0xff] %vm290_vm1, %v593_v26 }
  0xf1   :  { %1010 = vrot.lane.b32.xlu1 %v1407_v17, %s1498_s13  ;;  %913 = vst.msk [vmem:[%s2574_s4 + $0x148] sm:$0xff] %vm290_vm1, %v1461_v27  ;;  %v753_v28 = vpop.f32.mrb[9].mxu1 }
  0xf2   :  { %912 = vst.msk [vmem:[%s2574_s4 + $0x140] sm:$0xff] %vm290_vm1, %v753_v28  ;;  %v1416_v29 = vpop.f32.mrb[10].mxu0 }
  0xf3   :  { %1072 = vrot.lane.b32.xlu0 %v733_v20, %s1498_s13  ;;  %883 = vst.msk [vmem:[%s2574_s4 + $0x58] sm:$0xff] %vm290_vm1, %v1416_v29  ;;  %v603_v30 = vpop.f32.mrb[11].mxu0 }
  0xf4   :  { %v1464_v31 = vpop.f32.mrb[10].mxu1  ;;  %882 = vst.msk [vmem:[%s2574_s4 + $0x50] sm:$0xff] %vm290_vm1, %v603_v30 }
  0xf5   :  { %1074 = vrot.lane.b32.xlu1 %v1455_v19, %s1498_s13  ;;  %915 = vst.msk [vmem:[%s2574_s4 + $0x158] sm:$0xff] %vm290_vm1, %v1464_v31  ;;  %v763_v32 = vpop.f32.mrb[11].mxu1 }
  0xf6   :  { %914 = vst.msk [vmem:[%s2574_s4 + $0x150] sm:$0xff] %vm290_vm1, %v763_v32  ;;  %v2034_v33 = vpop.f32.mrb[12].mxu0 }
  0xf7   :  { %1012 = vrot.lane.b32.xlu0 %v583_v22, %s1498_s13  ;;  %885 = vst.msk [vmem:[%s2574_s4 + $0x68] sm:$0xff] %vm290_vm1, %v2034_v33  ;;  %v613_v34 = vpop.f32.mrb[13].mxu0 }
  0xf8   :  { %v2042_v35 = vpop.f32.mrb[12].mxu1  ;;  %884 = vst.msk [vmem:[%s2574_s4 + $0x60] sm:$0xff] %vm290_vm1, %v613_v34 }
  0xf9   :  { %1014 = vrot.lane.b32.xlu1 %v1410_v21, %s1498_s13  ;;  %917 = vst.msk [vmem:[%s2574_s4 + $0x168] sm:$0xff] %vm290_vm1, %v2042_v35  ;;  %v773_v36 = vpop.f32.mrb[13].mxu1 }
  0xfa   :  { %916 = vst.msk [vmem:[%s2574_s4 + $0x160] sm:$0xff] %vm290_vm1, %v773_v36  ;;  %v2058_v37 = vpop.f32.mrb[14].mxu0 }
  0xfb   :  { %1076 = vrot.lane.b32.xlu0 %v743_v24, %s1498_s13  ;;  %887 = vst.msk [vmem:[%s2574_s4 + $0x78] sm:$0xff] %vm290_vm1, %v2058_v37  ;;  %v2066_v38 = vpop.f32.mrb[15].mxu0 }
  0xfc   :  { %v2068_v39 = vpop.f32.mrb[14].mxu1  ;;  %886 = vst.msk [vmem:[%s2574_s4 + $0x70] sm:$0xff] %vm290_vm1, %v2066_v38 }
  0xfd   :  { %1078 = vrot.lane.b32.xlu1 %v1458_v23, %s1498_s13  ;;  %919 = vst.msk [vmem:[%s2574_s4 + $0x178] sm:$0xff] %vm290_vm1, %v2068_v39  ;;  %v2081_v40 = vpop.f32.mrb[15].mxu1 }
  0xfe   :  { %918 = vst.msk [vmem:[%s2574_s4 + $0x170] sm:$0xff] %vm290_vm1, %v2081_v40  ;;  %v2088_v41 = vpop.f32.mrb[16].mxu0 }
  0xff   :  { %1016 = vrot.lane.b32.xlu0 %v593_v26, %s1498_s13  ;;  %889 = vst.msk [vmem:[%s2574_s4 + $0x88] sm:$0xff] %vm290_vm1, %v2088_v41  ;;  %v2096_v42 = vpop.f32.mrb[17].mxu0 }
 0x100   :  { %v2098_v43 = vpop.f32.mrb[16].mxu1  ;;  %888 = vst.msk [vmem:[%s2574_s4 + $0x80] sm:$0xff] %vm290_vm1, %v2096_v42 }
 0x101   :  { %1018 = vrot.lane.b32.xlu1 %v1413_v25, %s1498_s13  ;;  %921 = vst.msk [vmem:[%s2574_s4 + $0x188] sm:$0xff] %vm290_vm1, %v2098_v43  ;;  %v2111_v44 = vpop.f32.mrb[17].mxu1 }
 0x102   :  { %920 = vst.msk [vmem:[%s2574_s4 + $0x180] sm:$0xff] %vm290_vm1, %v2111_v44  ;;  %v2118_v45 = vpop.f32.mrb[18].mxu0 }
 0x103   :  { %1080 = vrot.lane.b32.xlu0 %v753_v28, %s1498_s13  ;;  %891 = vst.msk [vmem:[%s2574_s4 + $0x98] sm:$0xff] %vm290_vm1, %v2118_v45  ;;  %v2126_v46 = vpop.f32.mrb[19].mxu0 }
 0x104   :  { %v2128_v47 = vpop.f32.mrb[18].mxu1  ;;  %890 = vst.msk [vmem:[%s2574_s4 + $0x90] sm:$0xff] %vm290_vm1, %v2126_v46 }
 0x105   :  { %1082 = vrot.lane.b32.xlu1 %v1461_v27, %s1498_s13  ;;  %923 = vst.msk [vmem:[%s2574_s4 + $0x198] sm:$0xff] %vm290_vm1, %v2128_v47  ;;  %v2141_v48 = vpop.f32.mrb[19].mxu1 }
 0x106   :  { %922 = vst.msk [vmem:[%s2574_s4 + $0x190] sm:$0xff] %vm290_vm1, %v2141_v48  ;;  %v2148_v49 = vpop.f32.mrb[20].mxu0 }
 0x107   :  { %1020 = vrot.lane.b32.xlu0 %v603_v30, %s1498_s13  ;;  %893 = vst.msk [vmem:[%s2574_s4 + $0xa8] sm:$0xff] %vm290_vm1, %v2148_v49  ;;  %v2156_v50 = vpop.f32.mrb[21].mxu0 }
 0x108   :  { %v2158_v51 = vpop.f32.mrb[20].mxu1  ;;  %892 = vst.msk [vmem:[%s2574_s4 + $0xa0] sm:$0xff] %vm290_vm1, %v2156_v50 }
 0x109   :  { %1022 = vrot.lane.b32.xlu1 %v1416_v29, %s1498_s13  ;;  %925 = vst.msk [vmem:[%s2574_s4 + $0x1a8] sm:$0xff] %vm290_vm1, %v2158_v51  ;;  %v813_v52 = vpop.f32.mrb[21].mxu1 }
 0x10a   :  { %924 = vst.msk [vmem:[%s2574_s4 + $0x1a0] sm:$0xff] %vm290_vm1, %v813_v52  ;;  %v1434_v53 = vpop.f32.mrb[22].mxu0 }
 0x10b   :  { %1084 = vrot.lane.b32.xlu0 %v763_v32, %s1498_s13  ;;  %895 = vst.msk [vmem:[%s2574_s4 + $0xb8] sm:$0xff] %vm290_vm1, %v1434_v53  ;;  %v663_v54 = vpop.f32.mrb[23].mxu0 }
 0x10c   :  { %v1482_v55 = vpop.f32.mrb[22].mxu1  ;;  %894 = vst.msk [vmem:[%s2574_s4 + $0xb0] sm:$0xff] %vm290_vm1, %v663_v54 }
 0x10d   :  { %1086 = vrot.lane.b32.xlu1 %v1464_v31, %s1498_s13  ;;  %927 = vst.msk [vmem:[%s2574_s4 + $0x1b8] sm:$0xff] %vm290_vm1, %v1482_v55  ;;  %v823_v56 = vpop.f32.mrb[23].mxu1 }
 0x10e   :  { %926 = vst.msk [vmem:[%s2574_s4 + $0x1b0] sm:$0xff] %vm290_vm1, %v823_v56  ;;  %v1437_v57 = vpop.f32.mrb[24].mxu0 }
 0x10f   :  { %1024 = vrot.lane.b32.xlu0 %v613_v34, %s1498_s13  ;;  %897 = vst.msk [vmem:[%s2574_s4 + $0xc8] sm:$0xff] %vm290_vm1, %v1437_v57  ;;  %v673_v58 = vpop.f32.mrb[25].mxu0 }
 0x110   :  { %v1485_v59 = vpop.f32.mrb[24].mxu1  ;;  %896 = vst.msk [vmem:[%s2574_s4 + $0xc0] sm:$0xff] %vm290_vm1, %v673_v58 }
 0x111   :  { %1026 = vrot.lane.b32.xlu1 %v2034_v33, %s1498_s13  ;;  %929 = vst.msk [vmem:[%s2574_s4 + $0x1c8] sm:$0xff] %vm290_vm1, %v1485_v59  ;;  %v833_v60 = vpop.f32.mrb[25].mxu1 }
 0x112   :  { %928 = vst.msk [vmem:[%s2574_s4 + $0x1c0] sm:$0xff] %vm290_vm1, %v833_v60  ;;  %v1440_v61 = vpop.f32.mrb[26].mxu0 }
 0x113   :  { %1088 = vrot.lane.b32.xlu0 %v773_v36, %s1498_s13  ;;  %899 = vst.msk [vmem:[%s2574_s4 + $0xd8] sm:$0xff] %vm290_vm1, %v1440_v61  ;;  %v683_v62 = vpop.f32.mrb[27].mxu0 }
 0x114   :  { %v1488_v63 = vpop.f32.mrb[26].mxu1  ;;  %898 = vst.msk [vmem:[%s2574_s4 + $0xd0] sm:$0xff] %vm290_vm1, %v683_v62 }
 0x115   :  { %1090 = vrot.lane.b32.xlu1 %v2042_v35, %s1498_s13  ;;  %931 = vst.msk [vmem:[%s2574_s4 + $0x1d8] sm:$0xff] %vm290_vm1, %v1488_v63  ;;  %v843_v0 = vpop.f32.mrb[27].mxu1 }
 0x116   :  { %930 = vst.msk [vmem:[%s2574_s4 + $0x1d0] sm:$0xff] %vm290_vm1, %v843_v0  ;;  %v1443_v1 = vpop.f32.mrb[28].mxu0 }
 0x117   :  { %1028 = vrot.lane.b32.xlu0 %v2066_v38, %s1498_s13  ;;  %901 = vst.msk [vmem:[%s2574_s4 + $0xe8] sm:$0xff] %vm290_vm1, %v1443_v1  ;;  %v693_v3 = vpop.f32.mrb[29].mxu0 }
 0x118   :  { %v1491_v5 = vpop.f32.mrb[28].mxu1  ;;  %900 = vst.msk [vmem:[%s2574_s4 + $0xe0] sm:$0xff] %vm290_vm1, %v693_v3 }
 0x119   :  { %1030 = vrot.lane.b32.xlu1 %v2058_v37, %s1498_s13  ;;  %933 = vst.msk [vmem:[%s2574_s4 + $0x1e8] sm:$0xff] %vm290_vm1, %v1491_v5  ;;  %v853_v6 = vpop.f32.mrb[29].mxu1 }
 0x11a   :  { %932 = vst.msk [vmem:[%s2574_s4 + $0x1e0] sm:$0xff] %vm290_vm1, %v853_v6  ;;  %v1446_v7 = vpop.f32.mrb[30].mxu0 }
 0x11b   :  { %1092 = vrot.lane.b32.xlu0 %v2081_v40, %s1498_s13  ;;  %903 = vst.msk [vmem:[%s2574_s4 + $0xf8] sm:$0xff] %vm290_vm1, %v1446_v7  ;;  %v703_v2 = vpop.f32.mrb[31].mxu0 }
 0x11c   :  { %v1494_v8 = vpop.f32.mrb[30].mxu1  ;;  %902 = vst.msk [vmem:[%s2574_s4 + $0xf0] sm:$0xff] %vm290_vm1, %v703_v2 }
 0x11d   :  { %1094 = vrot.lane.b32.xlu1 %v2068_v39, %s1498_s13  ;;  %935 = vst.msk [vmem:[%s2574_s4 + $0x1f8] sm:$0xff] %vm290_vm1, %v1494_v8  ;;  %v863_v9 = vpop.f32.mrb[31].mxu1 }
 0x11e   :  { %934 = vst.msk [vmem:[%s2574_s4 + $0x1f0] sm:$0xff] %vm290_vm1, %v863_v9 }
 0x11f   :  { %1032 = vrot.lane.b32.xlu0 %v2096_v42, %s1498_s13 }
 0x121   :  { %1034 = vrot.lane.b32.xlu1 %v2088_v41, %s1498_s13 }
 0x123   :  { %1096 = vrot.lane.b32.xlu0 %v2111_v44, %s1498_s13 }
 0x125   :  { %1098 = vrot.lane.b32.xlu1 %v2098_v43, %s1498_s13 }
 0x127   :  { %1036 = vrot.lane.b32.xlu0 %v2126_v46, %s1498_s13 }
 0x129   :  { %1038 = vrot.lane.b32.xlu1 %v2118_v45, %s1498_s13 }
 0x12b   :  { %1100 = vrot.lane.b32.xlu0 %v2141_v48, %s1498_s13 }
 0x12d   :  { %1102 = vrot.lane.b32.xlu1 %v2128_v47, %s1498_s13 }
 0x12f   :  { %1040 = vrot.lane.b32.xlu0 %v2156_v50, %s1498_s13 }
 0x131   :  { %1042 = vrot.lane.b32.xlu1 %v2148_v49, %s1498_s13 }
 0x133   :  { %1104 = vrot.lane.b32.xlu0 %v813_v52, %s1498_s13 }
 0x135   :  { %1106 = vrot.lane.b32.xlu1 %v2158_v51, %s1498_s13 }
 0x137   :  { %1044 = vrot.lane.b32.xlu0 %v663_v54, %s1498_s13 }
 0x139   :  { %1046 = vrot.lane.b32.xlu1 %v1434_v53, %s1498_s13 }
 0x13b   :  { %1108 = vrot.lane.b32.xlu0 %v823_v56, %s1498_s13 }
 0x13d   :  { %1110 = vrot.lane.b32.xlu1 %v1482_v55, %s1498_s13 }
 0x13f   :  { %1048 = vrot.lane.b32.xlu0 %v673_v58, %s1498_s13 }
 0x141   :  { %1050 = vrot.lane.b32.xlu1 %v1437_v57, %s1498_s13 }
 0x143   :  { %1112 = vrot.lane.b32.xlu0 %v833_v60, %s1498_s13 }
 0x145   :  { %1114 = vrot.lane.b32.xlu1 %v1485_v59, %s1498_s13 }
 0x147   :  { %1052 = vrot.lane.b32.xlu0 %v683_v62, %s1498_s13 }
 0x149   :  { %1054 = vrot.lane.b32.xlu1 %v1440_v61, %s1498_s13 }
 0x14b   :  { %1116 = vrot.lane.b32.xlu0 %v843_v0, %s1498_s13 }
 0x14d   :  { %1118 = vrot.lane.b32.xlu1 %v1488_v63, %s1498_s13 }
 0x14f   :  { %1056 = vrot.lane.b32.xlu0 %v693_v3, %s1498_s13 }
 0x151   :  { %1058 = vrot.lane.b32.xlu1 %v1443_v1, %s1498_s13  ;;  %v1003_v10 = vpop.permute.xlu0 %1002 }
 0x152   :  { %1194 = vst.msk [vmem:[%s2575_s5 + $0x8] sm:$0xff] %vm1192_vm2, %v1003_v10 }
 0x153   :  { %v1067_v4 = vpop.permute.xlu1 %1066  ;;  %1120 = vrot.lane.b32.xlu0 %v853_v6, %s1498_s13 }
 0x154   :  { %1226 = vst.msk [vmem:[%s2575_s5 + $0x108] sm:$0xff] %vm1192_vm2, %v1067_v4 }
 0x155   :  { %1122 = vrot.lane.b32.xlu1 %v1491_v5, %s1498_s13  ;;  %v1001_v11 = vpop.permute.xlu0 %1000 }
 0x156   :  { %1193 = vst.msk [vmem:[%s2575_s5] sm:$0xff] %vm1192_vm2, %v1001_v11 }
 0x157   :  { %v1007_v12 = vpop.permute.xlu1 %1006  ;;  %1060 = vrot.lane.b32.xlu0 %v703_v2, %s1498_s13 }
 0x158   :  { %1196 = vst.msk [vmem:[%s2575_s5 + $0x18] sm:$0xff] %vm1192_vm2, %v1007_v12 }
 0x159   :  { %1062 = vrot.lane.b32.xlu1 %v1446_v7, %s1498_s13  ;;  %v1065_v13 = vpop.permute.xlu0 %1064 }
 0x15a   :  { %1225 = vst.msk [vmem:[%s2575_s5 + $0x100] sm:$0xff] %vm1192_vm2, %v1065_v13 }
 0x15b   :  { %v1071_v14 = vpop.permute.xlu1 %1070  ;;  %1124 = vrot.lane.b32.xlu0 %v863_v9, %s1498_s13 }
 0x15c   :  { %1228 = vst.msk [vmem:[%s2575_s5 + $0x118] sm:$0xff] %vm1192_vm2, %v1071_v14 }
 0x15d   :  { %1126 = vrot.lane.b32.xlu1 %v1494_v8, %s1498_s13  ;;  %v1069_v15 = vpop.permute.xlu0 %1068 }
 0x15e   :  { %1227 = vst.msk [vmem:[%s2575_s5 + $0x110] sm:$0xff] %vm1192_vm2, %v1069_v15 }
 0x15f   :  { %v1005_v16 = vpop.permute.xlu1 %1004 }
 0x160   :  { %1195 = vst.msk [vmem:[%s2575_s5 + $0x10] sm:$0xff] %vm1192_vm2, %v1005_v16 }
 0x161   :  { %v1009_v17 = vpop.permute.xlu0 %1008 }
 0x162   :  { %1197 = vst.msk [vmem:[%s2575_s5 + $0x20] sm:$0xff] %vm1192_vm2, %v1009_v17 }
 0x163   :  { %v1011_v18 = vpop.permute.xlu1 %1010 }
 0x164   :  { %1198 = vst.msk [vmem:[%s2575_s5 + $0x28] sm:$0xff] %vm1192_vm2, %v1011_v18 }
 0x165   :  { %v1073_v19 = vpop.permute.xlu0 %1072 }
 0x166   :  { %1229 = vst.msk [vmem:[%s2575_s5 + $0x120] sm:$0xff] %vm1192_vm2, %v1073_v19 }
 0x167   :  { %v1075_v20 = vpop.permute.xlu1 %1074 }
 0x168   :  { %1230 = vst.msk [vmem:[%s2575_s5 + $0x128] sm:$0xff] %vm1192_vm2, %v1075_v20 }
 0x169   :  { %v1013_v21 = vpop.permute.xlu0 %1012 }
 0x16a   :  { %1199 = vst.msk [vmem:[%s2575_s5 + $0x30] sm:$0xff] %vm1192_vm2, %v1013_v21 }
 0x16b   :  { %v1015_v22 = vpop.permute.xlu1 %1014 }
 0x16c   :  { %1200 = vst.msk [vmem:[%s2575_s5 + $0x38] sm:$0xff] %vm1192_vm2, %v1015_v22 }
 0x16d   :  { %v1077_v23 = vpop.permute.xlu0 %1076 }
 0x16e   :  { %1231 = vst.msk [vmem:[%s2575_s5 + $0x130] sm:$0xff] %vm1192_vm2, %v1077_v23 }
 0x16f   :  { %v1079_v24 = vpop.permute.xlu1 %1078 }
 0x170   :  { %1232 = vst.msk [vmem:[%s2575_s5 + $0x138] sm:$0xff] %vm1192_vm2, %v1079_v24 }
 0x171   :  { %v1017_v25 = vpop.permute.xlu0 %1016 }
 0x172   :  { %1201 = vst.msk [vmem:[%s2575_s5 + $0x40] sm:$0xff] %vm1192_vm2, %v1017_v25 }
 0x173   :  { %v1019_v26 = vpop.permute.xlu1 %1018 }
 0x174   :  { %1202 = vst.msk [vmem:[%s2575_s5 + $0x48] sm:$0xff] %vm1192_vm2, %v1019_v26 }
 0x175   :  { %v1081_v27 = vpop.permute.xlu0 %1080 }
 0x176   :  { %1233 = vst.msk [vmem:[%s2575_s5 + $0x140] sm:$0xff] %vm1192_vm2, %v1081_v27 }
 0x177   :  { %v1083_v28 = vpop.permute.xlu1 %1082 }
 0x178   :  { %1234 = vst.msk [vmem:[%s2575_s5 + $0x148] sm:$0xff] %vm1192_vm2, %v1083_v28 }
 0x179   :  { %v1021_v29 = vpop.permute.xlu0 %1020 }
 0x17a   :  { %1203 = vst.msk [vmem:[%s2575_s5 + $0x50] sm:$0xff] %vm1192_vm2, %v1021_v29 }
 0x17b   :  { %v1023_v30 = vpop.permute.xlu1 %1022 }
 0x17c   :  { %1204 = vst.msk [vmem:[%s2575_s5 + $0x58] sm:$0xff] %vm1192_vm2, %v1023_v30 }
 0x17d   :  { %v1085_v31 = vpop.permute.xlu0 %1084 }
 0x17e   :  { %1235 = vst.msk [vmem:[%s2575_s5 + $0x150] sm:$0xff] %vm1192_vm2, %v1085_v31 }
 0x17f   :  { %v1087_v32 = vpop.permute.xlu1 %1086 }
 0x180   :  { %1236 = vst.msk [vmem:[%s2575_s5 + $0x158] sm:$0xff] %vm1192_vm2, %v1087_v32 }
 0x181   :  { %v1025_v33 = vpop.permute.xlu0 %1024 }
 0x182   :  { %1205 = vst.msk [vmem:[%s2575_s5 + $0x60] sm:$0xff] %vm1192_vm2, %v1025_v33 }
 0x183   :  { %v1027_v34 = vpop.permute.xlu1 %1026 }
 0x184   :  { %1206 = vst.msk [vmem:[%s2575_s5 + $0x68] sm:$0xff] %vm1192_vm2, %v1027_v34 }
 0x185   :  { %v1089_v35 = vpop.permute.xlu0 %1088 }
 0x186   :  { %1237 = vst.msk [vmem:[%s2575_s5 + $0x160] sm:$0xff] %vm1192_vm2, %v1089_v35 }
 0x187   :  { %v1091_v36 = vpop.permute.xlu1 %1090 }
 0x188   :  { %1238 = vst.msk [vmem:[%s2575_s5 + $0x168] sm:$0xff] %vm1192_vm2, %v1091_v36 }
 0x189   :  { %v1029_v37 = vpop.permute.xlu0 %1028 }
 0x18a   :  { %1207 = vst.msk [vmem:[%s2575_s5 + $0x70] sm:$0xff] %vm1192_vm2, %v1029_v37 }
 0x18b   :  { %v1031_v38 = vpop.permute.xlu1 %1030 }
 0x18c   :  { %1208 = vst.msk [vmem:[%s2575_s5 + $0x78] sm:$0xff] %vm1192_vm2, %v1031_v38 }
 0x18d   :  { %v1093_v39 = vpop.permute.xlu0 %1092 }
 0x18e   :  { %1239 = vst.msk [vmem:[%s2575_s5 + $0x170] sm:$0xff] %vm1192_vm2, %v1093_v39 }
 0x18f   :  { %v1095_v40 = vpop.permute.xlu1 %1094 }
 0x190   :  { %1240 = vst.msk [vmem:[%s2575_s5 + $0x178] sm:$0xff] %vm1192_vm2, %v1095_v40 }
 0x191   :  { %v1033_v41 = vpop.permute.xlu0 %1032 }
 0x192   :  { %1209 = vst.msk [vmem:[%s2575_s5 + $0x80] sm:$0xff] %vm1192_vm2, %v1033_v41 }
 0x193   :  { %v1035_v42 = vpop.permute.xlu1 %1034 }
 0x194   :  { %1210 = vst.msk [vmem:[%s2575_s5 + $0x88] sm:$0xff] %vm1192_vm2, %v1035_v42 }
 0x195   :  { %v1097_v43 = vpop.permute.xlu0 %1096 }
 0x196   :  { %1241 = vst.msk [vmem:[%s2575_s5 + $0x180] sm:$0xff] %vm1192_vm2, %v1097_v43 }
 0x197   :  { %v1099_v44 = vpop.permute.xlu1 %1098 }
 0x198   :  { %1242 = vst.msk [vmem:[%s2575_s5 + $0x188] sm:$0xff] %vm1192_vm2, %v1099_v44 }
 0x199   :  { %v1037_v45 = vpop.permute.xlu0 %1036 }
 0x19a   :  { %1211 = vst.msk [vmem:[%s2575_s5 + $0x90] sm:$0xff] %vm1192_vm2, %v1037_v45 }
 0x19b   :  { %v1039_v46 = vpop.permute.xlu1 %1038 }
 0x19c   :  { %1212 = vst.msk [vmem:[%s2575_s5 + $0x98] sm:$0xff] %vm1192_vm2, %v1039_v46 }
 0x19d   :  { %v1101_v47 = vpop.permute.xlu0 %1100 }
 0x19e   :  { %1243 = vst.msk [vmem:[%s2575_s5 + $0x190] sm:$0xff] %vm1192_vm2, %v1101_v47 }
 0x19f   :  { %v1103_v48 = vpop.permute.xlu1 %1102 }
 0x1a0   :  { %1244 = vst.msk [vmem:[%s2575_s5 + $0x198] sm:$0xff] %vm1192_vm2, %v1103_v48 }
 0x1a1   :  { %v1041_v49 = vpop.permute.xlu0 %1040 }
 0x1a2   :  { %1213 = vst.msk [vmem:[%s2575_s5 + $0xa0] sm:$0xff] %vm1192_vm2, %v1041_v49 }
 0x1a3   :  { %v1043_v50 = vpop.permute.xlu1 %1042 }
 0x1a4   :  { %1214 = vst.msk [vmem:[%s2575_s5 + $0xa8] sm:$0xff] %vm1192_vm2, %v1043_v50 }
 0x1a5   :  { %v1105_v51 = vpop.permute.xlu0 %1104 }
 0x1a6   :  { %1245 = vst.msk [vmem:[%s2575_s5 + $0x1a0] sm:$0xff] %vm1192_vm2, %v1105_v51 }
 0x1a7   :  { %v1107_v52 = vpop.permute.xlu1 %1106 }
 0x1a8   :  { %1246 = vst.msk [vmem:[%s2575_s5 + $0x1a8] sm:$0xff] %vm1192_vm2, %v1107_v52 }
 0x1a9   :  { %v1045_v53 = vpop.permute.xlu0 %1044 }
 0x1aa   :  { %1215 = vst.msk [vmem:[%s2575_s5 + $0xb0] sm:$0xff] %vm1192_vm2, %v1045_v53 }
 0x1ab   :  { %v1047_v54 = vpop.permute.xlu1 %1046 }
 0x1ac   :  { %1216 = vst.msk [vmem:[%s2575_s5 + $0xb8] sm:$0xff] %vm1192_vm2, %v1047_v54 }
 0x1ad   :  { %v1109_v55 = vpop.permute.xlu0 %1108 }
 0x1ae   :  { %1247 = vst.msk [vmem:[%s2575_s5 + $0x1b0] sm:$0xff] %vm1192_vm2, %v1109_v55 }
 0x1af   :  { %v1111_v56 = vpop.permute.xlu1 %1110 }
 0x1b0   :  { %1248 = vst.msk [vmem:[%s2575_s5 + $0x1b8] sm:$0xff] %vm1192_vm2, %v1111_v56 }
 0x1b1   :  { %v1049_v57 = vpop.permute.xlu0 %1048 }
 0x1b2   :  { %1217 = vst.msk [vmem:[%s2575_s5 + $0xc0] sm:$0xff] %vm1192_vm2, %v1049_v57 }
 0x1b3   :  { %v1051_v58 = vpop.permute.xlu1 %1050 }
 0x1b4   :  { %1218 = vst.msk [vmem:[%s2575_s5 + $0xc8] sm:$0xff] %vm1192_vm2, %v1051_v58 }
 0x1b5   :  { %v1113_v59 = vpop.permute.xlu0 %1112 }
 0x1b6   :  { %1249 = vst.msk [vmem:[%s2575_s5 + $0x1c0] sm:$0xff] %vm1192_vm2, %v1113_v59 }
 0x1b7   :  { %v1115_v60 = vpop.permute.xlu1 %1114 }
 0x1b8   :  { %1250 = vst.msk [vmem:[%s2575_s5 + $0x1c8] sm:$0xff] %vm1192_vm2, %v1115_v60 }
 0x1b9   :  { %v1053_v61 = vpop.permute.xlu0 %1052 }
 0x1ba   :  { %1219 = vst.msk [vmem:[%s2575_s5 + $0xd0] sm:$0xff] %vm1192_vm2, %v1053_v61 }
 0x1bb   :  { %v1055_v62 = vpop.permute.xlu1 %1054 }
 0x1bc   :  { %1220 = vst.msk [vmem:[%s2575_s5 + $0xd8] sm:$0xff] %vm1192_vm2, %v1055_v62 }
 0x1bd   :  { %v1117_v63 = vpop.permute.xlu0 %1116 }
 0x1be   :  { %1251 = vst.msk [vmem:[%s2575_s5 + $0x1d0] sm:$0xff] %vm1192_vm2, %v1117_v63 }
 0x1bf   :  { %v1119_v0 = vpop.permute.xlu1 %1118 }
 0x1c0   :  { %1252 = vst.msk [vmem:[%s2575_s5 + $0x1d8] sm:$0xff] %vm1192_vm2, %v1119_v0 }
 0x1c1   :  { %v1057_v1 = vpop.permute.xlu0 %1056 }
 0x1c2   :  { %1221 = vst.msk [vmem:[%s2575_s5 + $0xe0] sm:$0xff] %vm1192_vm2, %v1057_v1 }
 0x1c3   :  { %v1059_v3 = vpop.permute.xlu1 %1058 }
 0x1c4   :  { %1222 = vst.msk [vmem:[%s2575_s5 + $0xe8] sm:$0xff] %vm1192_vm2, %v1059_v3 }
 0x1c5   :  { %v1121_v5 = vpop.permute.xlu0 %1120 }
 0x1c6   :  { %1253 = vst.msk [vmem:[%s2575_s5 + $0x1e0] sm:$0xff] %vm1192_vm2, %v1121_v5 }
 0x1c7   :  { %v1123_v6 = vpop.permute.xlu1 %1122 }
 0x1c8   :  { %1254 = vst.msk [vmem:[%s2575_s5 + $0x1e8] sm:$0xff] %vm1192_vm2, %v1123_v6 }
 0x1c9   :  { %v1061_v7 = vpop.permute.xlu0 %1060 }
 0x1ca   :  { %1223 = vst.msk [vmem:[%s2575_s5 + $0xf0] sm:$0xff] %vm1192_vm2, %v1061_v7 }
 0x1cb   :  { %v1063_v2 = vpop.permute.xlu1 %1062 }
 0x1cc   :  { %1224 = vst.msk [vmem:[%s2575_s5 + $0xf8] sm:$0xff] %vm1192_vm2, %v1063_v2 }
 0x1cd   :  { %v1125_v8 = vpop.permute.xlu0 %1124 }
 0x1ce   :  { %1255 = vst.msk [vmem:[%s2575_s5 + $0x1f0] sm:$0xff] %vm1192_vm2, %v1125_v8 }
 0x1cf   :  { %v1127_v9 = vpop.permute.xlu1 %1126 }
 0x1d0   :  { %1256 = vst.msk [vmem:[%s2575_s5 + $0x1f8] sm:$0xff] %vm1192_vm2, %v1127_v9 }

// kernel: preact_bottleneck_forward.5
= control target key start
LH: loop header
LB: loop body
LE: loop exit
PB: predicated region body
PF: predicated region fallthrough
CT: control target
= control target key end

     0   :  { %vm548_vm0 = vcmask 1043456   ;;  %vm355_vm1 = vcmask 31744   ;;  %vm937_vm2 = vcmask 130048   ;;  %s2113_s3 = inlined_call_operand.vmem [shape: f32[4,16], index: 3, kind: input, shape index: {}]   ;;  %s2114_s0 = inlined_call_operand.vmem [shape: f32[512,4], index: 0, kind: input, shape index: {}]   ;;  %s2115_s1 = inlined_call_operand.vmem [shape: f32[1,4], index: 1, kind: input, shape index: {}]   ;;  %s2116_s2 = inlined_call_operand.vmem [shape: f32[1,4], index: 2, kind: input, shape index: {}]   ;;  %s2117_s4 = inlined_call_operand.vmem [shape: f32[512,16], index: 4, kind: input, shape index: {}]   ;;  %s2118_s5 = inlined_call_operand.vmem [shape: f32[512,16], index: 5, kind: output, shape index: {}]  }
   0x1   :  { %v290_v0 = vld [vmem:[%s2113_s3] sm:$0xf]  ;;  %v21_v6 = vld [vmem:[%s2114_s0 + $0x8] sm:$0xff]  ;;  %v22_v10 = vld [vmem:[%s2114_s0 + $0x10] sm:$0xff] }
   0x2   :  { %v20_v1 = vld [vmem:[%s2114_s0] sm:$0xff]  ;;  %1138 = vmatprep.subr.msk.mxu0 %vm548_vm0, %v290_v0  ;;  %1236 = vmatprep.subr.msk.mxu1 %vm548_vm0, %v290_v0  ;;  %v53_v9 = vld [vmem:[%s2114_s0 + $0x108] sm:$0xff]  ;;  %v54_v11 = vld [vmem:[%s2114_s0 + $0x110] sm:$0xff] }
   0x3   :  { %v1277_v2 = vld [vmem:[%s2115_s1] ss:$0 sm:$0xff]  ;;  %1139 = vmatpush3.msk.msra.mxu0 %vm548_vm0, %v290_v0  ;;  %1237 = vmatpush3.msk.msra.mxu1 %vm548_vm0, %v290_v0  ;;  %v23_v16 = vld [vmem:[%s2114_s0 + $0x18] sm:$0xff]  ;;  %v25_v28 = vld [vmem:[%s2114_s0 + $0x28] sm:$0xff] }
   0x4   :  { %v91_v3 = vmul.f32 %v1277_v2, %v20_v1  ;;  %v1283_v4 = vld [vmem:[%s2116_s2] ss:$0 sm:$0xff]  ;;  %v92_v8 = vmul.f32 %v1277_v2, %v21_v6  ;;  %v124_v13 = vmul.f32 %v1277_v2, %v53_v9  ;;  %v93_v14 = vmul.f32 %v1277_v2, %v22_v10  ;;  %v55_v17 = vld [vmem:[%s2114_s0 + $0x118] sm:$0xff]  ;;  %v57_v33 = vld [vmem:[%s2114_s0 + $0x128] sm:$0xff] }
   0x5   :  { %v52_v5 = vld [vmem:[%s2114_s0 + $0x100] sm:$0xff]  ;;  %v125_v15 = vmul.f32 %v1277_v2, %v54_v11  ;;  %v94_v20 = vmul.f32 %v1277_v2, %v23_v16  ;;  %v126_v21 = vmul.f32 %v1277_v2, %v55_v17  ;;  %v26_v34 = vld [vmem:[%s2114_s0 + $0x30] sm:$0xff]  ;;  %v27_v40 = vld [vmem:[%s2114_s0 + $0x38] sm:$0xff]  ;;  %v96_v43 = vmul.f32 %v1277_v2, %v25_v28 }
   0x6   :  { %v123_v7 = vmul.f32 %v1277_v2, %v52_v5  ;;  %v162_v12 = vadd.f32 %v1283_v4, %v91_v3  ;;  %v163_v19 = vadd.f32 %v1283_v4, %v92_v8  ;;  %v24_v22 = vld [vmem:[%s2114_s0 + $0x20] sm:$0xff]  ;;  %v195_v24 = vadd.f32 %v1283_v4, %v124_v13  ;;  %v58_v39 = vld [vmem:[%s2114_s0 + $0x130] sm:$0xff]  ;;  %v59_v44 = vld [vmem:[%s2114_s0 + $0x138] sm:$0xff] }
   0x7   :  { %v164_v25 = vadd.f32 %v1283_v4, %v93_v14  ;;  %v196_v26 = vadd.f32 %v1283_v4, %v125_v15  ;;  %v56_v27 = vld [vmem:[%s2114_s0 + $0x120] sm:$0xff]  ;;  %v165_v31 = vadd.f32 %v1283_v4, %v94_v20  ;;  %v197_v32 = vadd.f32 %v1283_v4, %v126_v21  ;;  %v29_v59 = vld [vmem:[%s2114_s0 + $0x48] sm:$0xff]  ;;  %v30_v1 = vld [vmem:[%s2114_s0 + $0x50] sm:$0xff] }
   0x8   :  { %v194_v18 = vadd.f32 %v1283_v4, %v123_v7  ;;  %v226_v23 = vmax.f32 %v162_v12, 0.0  ;;  %v227_v30 = vmax.f32 %v163_v19, 0.0  ;;  %v259_v35 = vmax.f32 %v195_v24, 0.0  ;;  %v28_v53 = vld [vmem:[%s2114_s0 + $0x40] sm:$0xff]  ;;  %v61_v0 = vld [vmem:[%s2114_s0 + $0x148] sm:$0xff]  ;;  %v62_v8 = vld [vmem:[%s2114_s0 + $0x150] sm:$0xff] }
   0x9   :  { %v228_v36 = vmax.f32 %v164_v25, 0.0  ;;  %v260_v37 = vmax.f32 %v196_v26, 0.0  ;;  %v95_v38 = vmul.f32 %v1277_v2, %v24_v22  ;;  %v229_v41 = vmax.f32 %v165_v31, 0.0  ;;  %v60_v58 = vld [vmem:[%s2114_s0 + $0x140] sm:$0xff]  ;;  %v31_v9 = vld [vmem:[%s2114_s0 + $0x58] sm:$0xff] }
   0xa   :  { %v258_v29 = vmax.f32 %v194_v18, 0.0  ;;  %1140 = vmatprep.mubr.msk.f32.mxu0 %vm355_vm1, %v226_v23  ;;  %v127_v42 = vmul.f32 %v1277_v2, %v56_v27  ;;  %v261_v45 = vmax.f32 %v197_v32, 0.0  ;;  %v128_v47 = vmul.f32 %v1277_v2, %v57_v33  ;;  %v63_v14 = vld [vmem:[%s2114_s0 + $0x158] sm:$0xff]  ;;  %v32_v23 = vld [vmem:[%s2114_s0 + $0x60] sm:$0xff]  ;;  %v65_v32 = vld [vmem:[%s2114_s0 + $0x168] sm:$0xff] }
   0xb   :  { %1141 = vmatmul.mubr.msk.f32.vlgmr.msra.gmra.mrb[0].mxu0 %vm355_vm1, %v227_v30  ;;  %v166_v46 = vadd.f32 %v1283_v4, %v95_v38  ;;  %v97_v48 = vmul.f32 %v1277_v2, %v26_v34  ;;  %v167_v50 = vadd.f32 %v1283_v4, %v96_v43  ;;  %v129_v51 = vmul.f32 %v1277_v2, %v58_v39  ;;  %v64_v28 = vld [vmem:[%s2114_s0 + $0x160] sm:$0xff]  ;;  %v34_v33 = vld [vmem:[%s2114_s0 + $0x70] sm:$0xff] }
   0xc   :  { %1188 = vmatprep.mubr.msk.f32.mxu1 %vm355_vm1, %v258_v29  ;;  %1143 = vmatprep.mubr.msk.f32.mxu0 %vm355_vm1, %v228_v36  ;;  %v198_v49 = vadd.f32 %v1283_v4, %v127_v42  ;;  %v98_v52 = vmul.f32 %v1277_v2, %v27_v40  ;;  %v199_v55 = vadd.f32 %v1283_v4, %v128_v47  ;;  %v33_v29 = vld [vmem:[%s2114_s0 + $0x68] sm:$0xff]  ;;  %v67_v47 = vld [vmem:[%s2114_s0 + $0x178] sm:$0xff] }
   0xd   :  { %1189 = vmatmul.mubr.msk.f32.vlgmr.msra.gmra.mrb[0].mxu1 %vm355_vm1, %v259_v35  ;;  %v230_v54 = vmax.f32 %v166_v46, 0.0  ;;  %v168_v56 = vadd.f32 %v1283_v4, %v97_v48  ;;  %v130_v57 = vmul.f32 %v1277_v2, %v59_v44  ;;  %v231_v61 = vmax.f32 %v167_v50, 0.0  ;;  %v35_v46 = vld [vmem:[%s2114_s0 + $0x78] sm:$0xff] }
   0xe   :  { %1191 = vmatprep.mubr.msk.f32.mxu1 %vm355_vm1, %v260_v37  ;;  %v262_v60 = vmax.f32 %v198_v49, 0.0  ;;  %v200_v62 = vadd.f32 %v1283_v4, %v129_v51  ;;  %v169_v63 = vadd.f32 %v1283_v4, %v98_v52  ;;  %v263_v3 = vmax.f32 %v199_v55, 0.0  ;;  %v66_v37 = vld [vmem:[%s2114_s0 + $0x170] sm:$0xff]  ;;  %v36_v51 = vld [vmem:[%s2114_s0 + $0x80] sm:$0xff] }
   0xf   :  { %1144 = vmatmul.mubr.msk.f32.gmra.mrb[2].mxu0 %vm355_vm1, %v229_v41  ;;  %v232_v5 = vmax.f32 %v168_v56, 0.0  ;;  %v201_v6 = vadd.f32 %v1283_v4, %v130_v57  ;;  %v99_v7 = vmul.f32 %v1277_v2, %v28_v53  ;;  %v131_v12 = vmul.f32 %v1277_v2, %v60_v58  ;;  %v68_v53 = vld [vmem:[%s2114_s0 + $0x180] sm:$0xff] }
  0x10   :  { %1146 = vmatprep.mubr.msk.f32.mxu0 %vm355_vm1, %v230_v54  ;;  %v264_v10 = vmax.f32 %v200_v62, 0.0  ;;  %v233_v11 = vmax.f32 %v169_v63, 0.0  ;;  %v100_v13 = vmul.f32 %v1277_v2, %v29_v59  ;;  %v132_v17 = vmul.f32 %v1277_v2, %v61_v0  ;;  %v37_v62 = vld [vmem:[%s2114_s0 + $0x88] sm:$0xff] }
  0x11   :  { %1192 = vmatmul.mubr.msk.f32.gmra.mrb[2].mxu1 %vm355_vm1, %v261_v45  ;;  %v265_v15 = vmax.f32 %v201_v6, 0.0  ;;  %v170_v16 = vadd.f32 %v1283_v4, %v99_v7  ;;  %v101_v18 = vmul.f32 %v1277_v2, %v30_v1  ;;  %v202_v19 = vadd.f32 %v1283_v4, %v131_v12  ;;  %v70_v7 = vld [vmem:[%s2114_s0 + $0x190] sm:$0xff]  ;;  %v39_v12 = vld [vmem:[%s2114_s0 + $0x98] sm:$0xff] }
  0x12   :  { %1194 = vmatprep.mubr.msk.f32.mxu1 %vm355_vm1, %v262_v60  ;;  %v171_v20 = vadd.f32 %v1283_v4, %v100_v13  ;;  %v133_v21 = vmul.f32 %v1277_v2, %v62_v8  ;;  %v102_v22 = vmul.f32 %v1277_v2, %v31_v9  ;;  %v203_v25 = vadd.f32 %v1283_v4, %v132_v17  ;;  %v71_v17 = vld [vmem:[%s2114_s0 + $0x198] sm:$0xff] }
  0x13   :  { %1147 = vmatmul.mubr.msk.f32.gmra.mrb[4].mxu0 %vm355_vm1, %v231_v61  ;;  %v234_v24 = vmax.f32 %v170_v16, 0.0  ;;  %v172_v26 = vadd.f32 %v1283_v4, %v101_v18  ;;  %v134_v27 = vmul.f32 %v1277_v2, %v63_v14  ;;  %v266_v30 = vmax.f32 %v202_v19, 0.0 }
  0x14   :  { %1149 = vmatprep.mubr.msk.f32.mxu0 %vm355_vm1, %v232_v5  ;;  %v204_v31 = vadd.f32 %v1283_v4, %v133_v21  ;;  %v235_v34 = vmax.f32 %v171_v20, 0.0  ;;  %v173_v35 = vadd.f32 %v1283_v4, %v102_v22  ;;  %v103_v36 = vmul.f32 %v1277_v2, %v32_v23  ;;  %v38_v5 = vld [vmem:[%s2114_s0 + $0x90] sm:$0xff]  ;;  %v40_v21 = vld [vmem:[%s2114_s0 + $0xa0] sm:$0xff] }
  0x15   :  { %1195 = vmatmul.mubr.msk.f32.gmra.mrb[4].mxu1 %vm355_vm1, %v263_v3  ;;  %v267_v38 = vmax.f32 %v203_v25, 0.0  ;;  %v205_v39 = vadd.f32 %v1283_v4, %v134_v27  ;;  %v135_v40 = vmul.f32 %v1277_v2, %v64_v28  ;;  %v104_v41 = vmul.f32 %v1277_v2, %v33_v29  ;;  %v69_v3 = vld [vmem:[%s2114_s0 + $0x188] sm:$0xff]  ;;  %v72_v23 = vld [vmem:[%s2114_s0 + $0x1a0] sm:$0xff] }
  0x16   :  { %1197 = vmatprep.mubr.msk.f32.mxu1 %vm355_vm1, %v264_v10  ;;  %v236_v42 = vmax.f32 %v172_v26, 0.0  ;;  %v174_v43 = vadd.f32 %v1283_v4, %v103_v36  ;;  %v136_v44 = vmul.f32 %v1277_v2, %v65_v32  ;;  %v105_v45 = vmul.f32 %v1277_v2, %v34_v33  ;;  %v41_v32 = vld [vmem:[%s2114_s0 + $0xa8] sm:$0xff] }
  0x17   :  { %1150 = vmatmul.mubr.msk.f32.gmra.mrb[6].mxu0 %vm355_vm1, %v233_v11  ;;  %v268_v48 = vmax.f32 %v204_v31, 0.0  ;;  %v206_v49 = vadd.f32 %v1283_v4, %v135_v40  ;;  %v137_v50 = vmul.f32 %v1277_v2, %v66_v37  ;;  %v175_v52 = vadd.f32 %v1283_v4, %v104_v41  ;;  %v73_v33 = vld [vmem:[%s2114_s0 + $0x1a8] sm:$0xff]  ;;  %v42_v37 = vld [vmem:[%s2114_s0 + $0xb0] sm:$0xff] }
  0x18   :  { %1152 = vmatprep.mubr.msk.f32.mxu0 %vm355_vm1, %v234_v24  ;;  %v237_v54 = vmax.f32 %v173_v35, 0.0  ;;  %v207_v55 = vadd.f32 %v1283_v4, %v136_v44  ;;  %v106_v56 = vmul.f32 %v1277_v2, %v35_v46  ;;  %v138_v57 = vmul.f32 %v1277_v2, %v67_v47 }
  0x19   :  { %1198 = vmatmul.mubr.msk.f32.gmra.mrb[6].mxu1 %vm355_vm1, %v265_v15  ;;  %v269_v58 = vmax.f32 %v205_v39, 0.0  ;;  %v238_v59 = vmax.f32 %v174_v43, 0.0  ;;  %v176_v60 = vadd.f32 %v1283_v4, %v105_v45  ;;  %v107_v61 = vmul.f32 %v1277_v2, %v36_v51  ;;  %v74_v39 = vld [vmem:[%s2114_s0 + $0x1b0] sm:$0xff] }
  0x1a   :  { %1200 = vmatprep.mubr.msk.f32.mxu1 %vm355_vm1, %v266_v30  ;;  %v270_v63 = vmax.f32 %v206_v49, 0.0  ;;  %v208_v0 = vadd.f32 %v1283_v4, %v137_v50  ;;  %v139_v1 = vmul.f32 %v1277_v2, %v68_v53  ;;  %v239_v6 = vmax.f32 %v175_v52, 0.0  ;;  %v75_v52 = vld [vmem:[%s2114_s0 + $0x1b8] sm:$0xff]  ;;  %v44_v53 = vld [vmem:[%s2114_s0 + $0xc0] sm:$0xff] }
  0x1b   :  { %1153 = vmatmul.mubr.msk.f32.gmra.mrb[8].mxu0 %vm355_vm1, %v235_v34  ;;  %v271_v8 = vmax.f32 %v207_v55, 0.0  ;;  %v177_v9 = vadd.f32 %v1283_v4, %v106_v56  ;;  %v209_v10 = vadd.f32 %v1283_v4, %v138_v57  ;;  %v108_v11 = vmul.f32 %v1277_v2, %v37_v62  ;;  %v76_v55 = vld [vmem:[%s2114_s0 + $0x1c0] sm:$0xff] }
  0x1c   :  { %1155 = vmatprep.mubr.msk.f32.mxu0 %vm355_vm1, %v236_v42  ;;  %v240_v13 = vmax.f32 %v176_v60, 0.0  ;;  %v178_v14 = vadd.f32 %v1283_v4, %v107_v61  ;;  %v140_v15 = vmul.f32 %v1277_v2, %v69_v3  ;;  %v109_v16 = vmul.f32 %v1277_v2, %v38_v5  ;;  %v45_v60 = vld [vmem:[%s2114_s0 + $0xc8] sm:$0xff] }
  0x1d   :  { %1201 = vmatmul.mubr.msk.f32.gmra.mrb[8].mxu1 %vm355_vm1, %v267_v38  ;;  %v272_v18 = vmax.f32 %v208_v0, 0.0  ;;  %v210_v19 = vadd.f32 %v1283_v4, %v139_v1  ;;  %v141_v20 = vmul.f32 %v1277_v2, %v70_v7  ;;  %v110_v22 = vmul.f32 %v1277_v2, %v39_v12  ;;  %v77_v1 = vld [vmem:[%s2114_s0 + $0x1c8] sm:$0xff]  ;;  %v46_v7 = vld [vmem:[%s2114_s0 + $0xd0] sm:$0xff] }
  0x1e   :  { %1203 = vmatprep.mubr.msk.f32.mxu1 %vm355_vm1, %v268_v48  ;;  %v241_v24 = vmax.f32 %v177_v9, 0.0  ;;  %v273_v25 = vmax.f32 %v209_v10, 0.0  ;;  %v179_v26 = vadd.f32 %v1283_v4, %v108_v11  ;;  %v142_v27 = vmul.f32 %v1277_v2, %v71_v17  ;;  %v43_v48 = vld [vmem:[%s2114_s0 + $0xb8] sm:$0xff]  ;;  %v78_v9 = vld [vmem:[%s2114_s0 + $0x1d0] sm:$0xff] }
  0x1f   :  { %1156 = vmatmul.mubr.msk.f32.gmra.mrb[10].mxu0 %vm355_vm1, %v237_v54  ;;  %v242_v28 = vmax.f32 %v178_v14, 0.0  ;;  %v211_v29 = vadd.f32 %v1283_v4, %v140_v15  ;;  %v180_v30 = vadd.f32 %v1283_v4, %v109_v16  ;;  %v111_v31 = vmul.f32 %v1277_v2, %v40_v21 }
  0x20   :  { %1158 = vmatprep.mubr.msk.f32.mxu0 %vm355_vm1, %v238_v59  ;;  %v274_v34 = vmax.f32 %v210_v19, 0.0  ;;  %v212_v35 = vadd.f32 %v1283_v4, %v141_v20  ;;  %v143_v36 = vmul.f32 %v1277_v2, %v72_v23  ;;  %v181_v38 = vadd.f32 %v1283_v4, %v110_v22  ;;  %v79_v19 = vld [vmem:[%s2114_s0 + $0x1d8] sm:$0xff]  ;;  %v48_v23 = vld [vmem:[%s2114_s0 + $0xe0] sm:$0xff] }
  0x21   :  { %1204 = vmatmul.mubr.msk.f32.gmra.mrb[10].mxu1 %vm355_vm1, %v269_v58  ;;  %v243_v40 = vmax.f32 %v179_v26, 0.0  ;;  %v213_v41 = vadd.f32 %v1283_v4, %v142_v27  ;;  %v112_v42 = vmul.f32 %v1277_v2, %v41_v32  ;;  %v144_v43 = vmul.f32 %v1277_v2, %v73_v33 }
  0x22   :  { %1206 = vmatprep.mubr.msk.f32.mxu1 %vm355_vm1, %v270_v63  ;;  %v275_v44 = vmax.f32 %v211_v29, 0.0  ;;  %v244_v45 = vmax.f32 %v180_v30, 0.0  ;;  %v182_v46 = vadd.f32 %v1283_v4, %v111_v31  ;;  %v113_v47 = vmul.f32 %v1277_v2, %v42_v37 }
  0x23   :  { %1159 = vmatmul.mubr.msk.f32.gmra.mrb[12].mxu0 %vm355_vm1, %v239_v6  ;;  %v276_v49 = vmax.f32 %v212_v35, 0.0  ;;  %v214_v50 = vadd.f32 %v1283_v4, %v143_v36  ;;  %v145_v51 = vmul.f32 %v1277_v2, %v74_v39  ;;  %v245_v54 = vmax.f32 %v181_v38, 0.0  ;;  %v81_v38 = vld [vmem:[%s2114_s0 + $0x1e8] sm:$0xff]  ;;  %v50_v39 = vld [vmem:[%s2114_s0 + $0xf0] sm:$0xff] }
  0x24   :  { %1161 = vmatprep.mubr.msk.f32.mxu0 %vm355_vm1, %v240_v13  ;;  %v277_v56 = vmax.f32 %v213_v41, 0.0  ;;  %v183_v57 = vadd.f32 %v1283_v4, %v112_v42  ;;  %v215_v58 = vadd.f32 %v1283_v4, %v144_v43  ;;  %v114_v59 = vmul.f32 %v1277_v2, %v43_v48  ;;  %v82_v41 = vld [vmem:[%s2114_s0 + $0x1f0] sm:$0xff] }
  0x25   :  { %1207 = vmatmul.mubr.msk.f32.gmra.mrb[12].mxu1 %vm355_vm1, %v271_v8  ;;  %v246_v61 = vmax.f32 %v182_v46, 0.0  ;;  %v184_v62 = vadd.f32 %v1283_v4, %v113_v47  ;;  %v146_v63 = vmul.f32 %v1277_v2, %v75_v52  ;;  %v115_v0 = vmul.f32 %v1277_v2, %v44_v53 }
  0x26   :  { %1209 = vmatprep.mubr.msk.f32.mxu1 %vm355_vm1, %v272_v18  ;;  %v278_v3 = vmax.f32 %v214_v50, 0.0  ;;  %v216_v5 = vadd.f32 %v1283_v4, %v145_v51  ;;  %v147_v6 = vmul.f32 %v1277_v2, %v76_v55  ;;  %v116_v8 = vmul.f32 %v1277_v2, %v45_v60  ;;  %v47_v18 = vld [vmem:[%s2114_s0 + $0xd8] sm:$0xff] }
  0x27   :  { %1162 = vmatmul.mubr.msk.f32.gmra.mrb[14].mxu0 %vm355_vm1, %v241_v24  ;;  %v247_v10 = vmax.f32 %v183_v57, 0.0  ;;  %v279_v11 = vmax.f32 %v215_v58, 0.0  ;;  %v185_v12 = vadd.f32 %v1283_v4, %v114_v59  ;;  %v148_v13 = vmul.f32 %v1277_v2, %v77_v1  ;;  %v51_v50 = vld [vmem:[%s2114_s0 + $0xf8] sm:$0xff] }
  0x28   :  { %1164 = vmatprep.mubr.msk.f32.mxu0 %vm355_vm1, %v242_v28  ;;  %v248_v14 = vmax.f32 %v184_v62, 0.0  ;;  %v217_v15 = vadd.f32 %v1283_v4, %v146_v63  ;;  %v186_v16 = vadd.f32 %v1283_v4, %v115_v0  ;;  %v117_v17 = vmul.f32 %v1277_v2, %v46_v7 }
  0x29   :  { %1210 = vmatmul.mubr.msk.f32.gmra.mrb[14].mxu1 %vm355_vm1, %v273_v25  ;;  %v280_v20 = vmax.f32 %v216_v5, 0.0  ;;  %v218_v21 = vadd.f32 %v1283_v4, %v147_v6  ;;  %v149_v22 = vmul.f32 %v1277_v2, %v78_v9  ;;  %v187_v24 = vadd.f32 %v1283_v4, %v116_v8  ;;  %v80_v25 = vld [vmem:[%s2114_s0 + $0x1e0] sm:$0xff] }
  0x2a   :  { %1212 = vmatprep.mubr.msk.f32.mxu1 %vm355_vm1, %v274_v34  ;;  %v249_v26 = vmax.f32 %v185_v12, 0.0  ;;  %v219_v27 = vadd.f32 %v1283_v4, %v148_v13  ;;  %v118_v28 = vmul.f32 %v1277_v2, %v47_v18  ;;  %v150_v29 = vmul.f32 %v1277_v2, %v79_v19  ;;  %v49_v34 = vld [vmem:[%s2114_s0 + $0xe8] sm:$0xff]  ;;  %v323_v13 = vld [vmem:[%s2117_s4 + $0x100] sm:$0xff] }
  0x2b   :  { %1165 = vmatmul.mubr.msk.f32.gmra.mrb[16].mxu0 %vm355_vm1, %v243_v40  ;;  %v281_v30 = vmax.f32 %v217_v15, 0.0  ;;  %v250_v31 = vmax.f32 %v186_v16, 0.0  ;;  %v188_v32 = vadd.f32 %v1283_v4, %v117_v17  ;;  %v119_v33 = vmul.f32 %v1277_v2, %v48_v23  ;;  %v293_v23 = vld [vmem:[%s2117_s4 + $0x10] sm:$0xff] }
  0x2c   :  { %1167 = vmatprep.mubr.msk.f32.mxu0 %vm355_vm1, %v244_v45  ;;  %v282_v35 = vmax.f32 %v218_v21, 0.0  ;;  %v220_v36 = vadd.f32 %v1283_v4, %v149_v22  ;;  %v151_v37 = vmul.f32 %v1277_v2, %v80_v25  ;;  %v251_v40 = vmax.f32 %v187_v24, 0.0  ;;  %v326_v22 = vld [vmem:[%s2117_s4 + $0x118] sm:$0xff]  ;;  %v325_v25 = vld [vmem:[%s2117_s4 + $0x110] sm:$0xff] }
  0x2d   :  { %1213 = vmatmul.mubr.msk.f32.gmra.mrb[16].mxu1 %vm355_vm1, %v275_v44  ;;  %v283_v42 = vmax.f32 %v219_v27, 0.0  ;;  %v189_v43 = vadd.f32 %v1283_v4, %v118_v28  ;;  %v221_v44 = vadd.f32 %v1283_v4, %v150_v29  ;;  %v120_v45 = vmul.f32 %v1277_v2, %v49_v34  ;;  %v328_v34 = vld [vmem:[%s2117_s4 + $0x128] sm:$0xff] }
  0x2e   :  { %1215 = vmatprep.mubr.msk.f32.mxu1 %vm355_vm1, %v276_v49  ;;  %v252_v46 = vmax.f32 %v188_v32, 0.0  ;;  %v190_v47 = vadd.f32 %v1283_v4, %v119_v33  ;;  %v152_v48 = vmul.f32 %v1277_v2, %v81_v38  ;;  %v121_v49 = vmul.f32 %v1277_v2, %v50_v39  ;;  %v296_v32 = vld [vmem:[%s2117_s4 + $0x28] sm:$0xff] }
  0x2f   :  { %1168 = vmatmul.mubr.msk.f32.gmra.mrb[18].mxu0 %vm355_vm1, %v245_v54  ;;  %v284_v51 = vmax.f32 %v220_v36, 0.0  ;;  %v222_v52 = vadd.f32 %v1283_v4, %v151_v37  ;;  %v153_v53 = vmul.f32 %v1277_v2, %v82_v41  ;;  %v83_v54 = vld [vmem:[%s2114_s0 + $0x1f8] sm:$0xff]  ;;  %v253_v55 = vmax.f32 %v189_v43, 0.0  ;;  %v327_v37 = vld [vmem:[%s2117_s4 + $0x120] sm:$0xff] }
  0x30   :  { %1170 = vmatprep.mubr.msk.f32.mxu0 %vm355_vm1, %v246_v61  ;;  %v191_v57 = vadd.f32 %v1283_v4, %v120_v45  ;;  %v122_v58 = vmul.f32 %v1277_v2, %v51_v50  ;;  %v254_v59 = vmax.f32 %v190_v47, 0.0  ;;  %v223_v60 = vadd.f32 %v1283_v4, %v152_v48  ;;  %v297_v47 = vld [vmem:[%s2117_s4 + $0x30] sm:$0xff] }
  0x31   :  { %1216 = vmatmul.mubr.msk.f32.gmra.mrb[18].mxu1 %vm355_vm1, %v277_v56  ;;  %v285_v56 = vmax.f32 %v221_v44, 0.0  ;;  %v192_v61 = vadd.f32 %v1283_v4, %v121_v49  ;;  %v154_v62 = vmul.f32 %v1277_v2, %v83_v54  ;;  %v286_v63 = vmax.f32 %v222_v52, 0.0  ;;  %v298_v44 = vld [vmem:[%s2117_s4 + $0x38] sm:$0xff]  ;;  %v329_v49 = vld [vmem:[%s2117_s4 + $0x130] sm:$0xff] }
  0x32   :  { %1218 = vmatprep.mubr.msk.f32.mxu1 %vm355_vm1, %v278_v3  ;;  %v224_v0 = vadd.f32 %v1283_v4, %v153_v53  ;;  %v255_v1 = vmax.f32 %v191_v57, 0.0  ;;  %v193_v3 = vadd.f32 %v1283_v4, %v122_v58  ;;  %v287_v5 = vmax.f32 %v223_v60, 0.0  ;;  %v332_v58 = vld [vmem:[%s2117_s4 + $0x148] sm:$0xff] }
  0x33   :  { %1171 = vmatmul.mubr.msk.f32.gmra.mrb[20].mxu0 %vm355_vm1, %v247_v10  ;;  %v256_v6 = vmax.f32 %v192_v61, 0.0  ;;  %v225_v7 = vadd.f32 %v1283_v4, %v154_v62  ;;  %v292_v4 = vld [vmem:[%s2117_s4 + $0x8] sm:$0xff]  ;;  %v331_v61 = vld [vmem:[%s2117_s4 + $0x140] sm:$0xff] }
  0x34   :  { %1173 = vmatprep.mubr.msk.f32.mxu0 %vm355_vm1, %v248_v14  ;;  %v288_v2 = vmax.f32 %v224_v0, 0.0  ;;  %v257_v8 = vmax.f32 %v193_v3, 0.0  ;;  %v324_v10 = vld [vmem:[%s2117_s4 + $0x108] sm:$0xff] }
  0x35   :  { %1219 = vmatmul.mubr.msk.f32.gmra.mrb[20].mxu1 %vm355_vm1, %v279_v11  ;;  %v289_v9 = vmax.f32 %v225_v7, 0.0  ;;  %v291_v11 = vld [vmem:[%s2117_s4] sm:$0xff] }
  0x36   :  { %1221 = vmatprep.mubr.msk.f32.mxu1 %vm355_vm1, %v280_v20  ;;  %v294_v20 = vld [vmem:[%s2117_s4 + $0x18] sm:$0xff] }
  0x37   :  { %1174 = vmatmul.mubr.msk.f32.gmra.mrb[22].mxu0 %vm355_vm1, %v249_v26 }
  0x38   :  { %1176 = vmatprep.mubr.msk.f32.mxu0 %vm355_vm1, %v250_v31 }
  0x39   :  { %1222 = vmatmul.mubr.msk.f32.gmra.mrb[22].mxu1 %vm355_vm1, %v281_v30 }
  0x3a   :  { %1224 = vmatprep.mubr.msk.f32.mxu1 %vm355_vm1, %v282_v35  ;;  %v295_v35 = vld [vmem:[%s2117_s4 + $0x20] sm:$0xff] }
  0x3b   :  { %1177 = vmatmul.mubr.msk.f32.gmra.mrb[24].mxu0 %vm355_vm1, %v251_v40 }
  0x3c   :  { %1179 = vmatprep.mubr.msk.f32.mxu0 %vm355_vm1, %v252_v46  ;;  %v330_v46 = vld [vmem:[%s2117_s4 + $0x138] sm:$0xff] }
  0x3d   :  { %1225 = vmatmul.mubr.msk.f32.gmra.mrb[24].mxu1 %vm355_vm1, %v283_v42 }
  0x3e   :  { %1227 = vmatprep.mubr.msk.f32.mxu1 %vm355_vm1, %v284_v51 }
  0x3f   :  { %1180 = vmatmul.mubr.msk.f32.gmra.mrb[26].mxu0 %vm355_vm1, %v253_v55 }
  0x40   :  { %1182 = vmatprep.mubr.msk.f32.mxu0 %vm355_vm1, %v254_v59  ;;  %v299_v59 = vld [vmem:[%s2117_s4 + $0x40] sm:$0xff] }
  0x41   :  { %1228 = vmatmul.mubr.msk.f32.gmra.mrb[26].mxu1 %vm355_vm1, %v285_v56  ;;  %v300_v56 = vld [vmem:[%s2117_s4 + $0x48] sm:$0xff] }
  0x42   :  { %1230 = vmatprep.mubr.msk.f32.mxu1 %vm355_vm1, %v286_v63 }
  0x43   :  { %1183 = vmatmul.mubr.msk.f32.gmra.mrb[28].mxu0 %vm355_vm1, %v255_v1 }
  0x44   :  { %1185 = vmatprep.mubr.msk.f32.mxu0 %vm355_vm1, %v256_v6  ;;  %v302_v6 = vld [vmem:[%s2117_s4 + $0x58] sm:$0xff] }
  0x45   :  { %1231 = vmatmul.mubr.msk.f32.gmra.mrb[28].mxu1 %vm355_vm1, %v287_v5 }
  0x46   :  { %1233 = vmatprep.mubr.msk.f32.mxu1 %vm355_vm1, %v288_v2  ;;  %v334_v2 = vld [vmem:[%s2117_s4 + $0x158] sm:$0xff] }
  0x47   :  { %1186 = vmatmul.mubr.msk.f32.gmra.mrb[30].mxu0 %vm355_vm1, %v257_v8  ;;  %v301_v8 = vld [vmem:[%s2117_s4 + $0x50] sm:$0xff] }
  0x49   :  { %1234 = vmatmul.mubr.msk.f32.gmra.mrb[30].mxu1 %vm355_vm1, %v289_v9 }
  0xde   :  { %v1142_v12 = vpop.f32.mrb[0].mxu0 }
  0xdf   :  { %v624_v14 = vadd.f32 %v1142_v12, %v292_v4  ;;  %v618_v16 = vpop.f32.mrb[1].mxu0  ;;  %v333_v4 = vld [vmem:[%s2117_s4 + $0x150] sm:$0xff] }
  0xe0   :  { %v1190_v15 = vpop.f32.mrb[0].mxu1  ;;  %v619_v18 = vadd.f32 %v618_v16, %v291_v11  ;;  %v304_v16 = vld [vmem:[%s2117_s4 + $0x68] sm:$0xff] }
  0xe1   :  { %v784_v17 = vadd.f32 %v1190_v15, %v324_v10  ;;  %v778_v19 = vpop.f32.mrb[1].mxu1  ;;  %939 = vst.msk [vmem:[%s2118_s5 + $0x8] sm:$0xff] %vm937_vm2, %v624_v14 }
  0xe2   :  { %v779_v21 = vadd.f32 %v778_v19, %v323_v13  ;;  %938 = vst.msk [vmem:[%s2118_s5] sm:$0xff] %vm937_vm2, %v619_v18  ;;  %v1145_v24 = vpop.f32.mrb[2].mxu0  ;;  %v336_v18 = vld [vmem:[%s2117_s4 + $0x168] sm:$0xff]  ;;  %v303_v19 = vld [vmem:[%s2117_s4 + $0x60] sm:$0xff] }
  0xe3   :  { %971 = vst.msk [vmem:[%s2118_s5 + $0x108] sm:$0xff] %vm937_vm2, %v784_v17  ;;  %v634_v26 = vadd.f32 %v1145_v24, %v294_v20  ;;  %v628_v28 = vpop.f32.mrb[3].mxu0 }
  0xe4   :  { %970 = vst.msk [vmem:[%s2118_s5 + $0x100] sm:$0xff] %vm937_vm2, %v779_v21  ;;  %v1193_v27 = vpop.f32.mrb[2].mxu1  ;;  %v629_v30 = vadd.f32 %v628_v28, %v293_v23  ;;  %v335_v21 = vld [vmem:[%s2117_s4 + $0x160] sm:$0xff]  ;;  %v306_v28 = vld [vmem:[%s2117_s4 + $0x78] sm:$0xff] }
  0xe5   :  { %v794_v29 = vadd.f32 %v1193_v27, %v326_v22  ;;  %v788_v31 = vpop.f32.mrb[3].mxu1  ;;  %941 = vst.msk [vmem:[%s2118_s5 + $0x18] sm:$0xff] %vm937_vm2, %v634_v26 }
  0xe6   :  { %v789_v33 = vadd.f32 %v788_v31, %v325_v25  ;;  %940 = vst.msk [vmem:[%s2118_s5 + $0x10] sm:$0xff] %vm937_vm2, %v629_v30  ;;  %v1148_v36 = vpop.f32.mrb[4].mxu0  ;;  %v338_v30 = vld [vmem:[%s2117_s4 + $0x178] sm:$0xff]  ;;  %v305_v31 = vld [vmem:[%s2117_s4 + $0x70] sm:$0xff] }
  0xe7   :  { %973 = vst.msk [vmem:[%s2118_s5 + $0x118] sm:$0xff] %vm937_vm2, %v794_v29  ;;  %v644_v38 = vadd.f32 %v1148_v36, %v296_v32  ;;  %v638_v40 = vpop.f32.mrb[5].mxu0 }
  0xe8   :  { %972 = vst.msk [vmem:[%s2118_s5 + $0x110] sm:$0xff] %vm937_vm2, %v789_v33  ;;  %v1196_v39 = vpop.f32.mrb[4].mxu1  ;;  %v639_v42 = vadd.f32 %v638_v40, %v295_v35  ;;  %v337_v33 = vld [vmem:[%s2117_s4 + $0x170] sm:$0xff]  ;;  %v308_v40 = vld [vmem:[%s2117_s4 + $0x88] sm:$0xff] }
  0xe9   :  { %v804_v41 = vadd.f32 %v1196_v39, %v328_v34  ;;  %v798_v43 = vpop.f32.mrb[5].mxu1  ;;  %943 = vst.msk [vmem:[%s2118_s5 + $0x28] sm:$0xff] %vm937_vm2, %v644_v38 }
  0xea   :  { %v799_v45 = vadd.f32 %v798_v43, %v327_v37  ;;  %942 = vst.msk [vmem:[%s2118_s5 + $0x20] sm:$0xff] %vm937_vm2, %v639_v42  ;;  %v1151_v48 = vpop.f32.mrb[6].mxu0  ;;  %v340_v42 = vld [vmem:[%s2117_s4 + $0x188] sm:$0xff]  ;;  %v307_v43 = vld [vmem:[%s2117_s4 + $0x80] sm:$0xff] }
  0xeb   :  { %975 = vst.msk [vmem:[%s2118_s5 + $0x128] sm:$0xff] %vm937_vm2, %v804_v41  ;;  %v654_v50 = vadd.f32 %v1151_v48, %v298_v44  ;;  %v648_v52 = vpop.f32.mrb[7].mxu0 }
  0xec   :  { %974 = vst.msk [vmem:[%s2118_s5 + $0x120] sm:$0xff] %vm937_vm2, %v799_v45  ;;  %v1199_v51 = vpop.f32.mrb[6].mxu1  ;;  %v649_v54 = vadd.f32 %v648_v52, %v297_v47  ;;  %v339_v45 = vld [vmem:[%s2117_s4 + $0x180] sm:$0xff]  ;;  %v310_v52 = vld [vmem:[%s2117_s4 + $0x98] sm:$0xff] }
  0xed   :  { %v814_v53 = vadd.f32 %v1199_v51, %v330_v46  ;;  %v808_v55 = vpop.f32.mrb[7].mxu1  ;;  %945 = vst.msk [vmem:[%s2118_s5 + $0x38] sm:$0xff] %vm937_vm2, %v654_v50 }
  0xee   :  { %v809_v57 = vadd.f32 %v808_v55, %v329_v49  ;;  %944 = vst.msk [vmem:[%s2118_s5 + $0x30] sm:$0xff] %vm937_vm2, %v649_v54  ;;  %v1154_v60 = vpop.f32.mrb[8].mxu0  ;;  %v342_v54 = vld [vmem:[%s2117_s4 + $0x198] sm:$0xff]  ;;  %v309_v55 = vld [vmem:[%s2117_s4 + $0x90] sm:$0xff] }
  0xef   :  { %977 = vst.msk [vmem:[%s2118_s5 + $0x138] sm:$0xff] %vm937_vm2, %v814_v53  ;;  %v664_v62 = vadd.f32 %v1154_v60, %v300_v56  ;;  %v658_v0 = vpop.f32.mrb[9].mxu0 }
  0xf0   :  { %976 = vst.msk [vmem:[%s2118_s5 + $0x130] sm:$0xff] %vm937_vm2, %v809_v57  ;;  %v1202_v63 = vpop.f32.mrb[8].mxu1  ;;  %v659_v3 = vadd.f32 %v658_v0, %v299_v59  ;;  %v341_v57 = vld [vmem:[%s2117_s4 + $0x190] sm:$0xff]  ;;  %v312_v0 = vld [vmem:[%s2117_s4 + $0xa8] sm:$0xff] }
  0xf1   :  { %v824_v1 = vadd.f32 %v1202_v63, %v332_v58  ;;  %v818_v5 = vpop.f32.mrb[9].mxu1  ;;  %947 = vst.msk [vmem:[%s2118_s5 + $0x48] sm:$0xff] %vm937_vm2, %v664_v62 }
  0xf2   :  { %v819_v7 = vadd.f32 %v818_v5, %v331_v61  ;;  %946 = vst.msk [vmem:[%s2118_s5 + $0x40] sm:$0xff] %vm937_vm2, %v659_v3  ;;  %v1157_v9 = vpop.f32.mrb[10].mxu0  ;;  %v344_v3 = vld [vmem:[%s2117_s4 + $0x1a8] sm:$0xff]  ;;  %v311_v5 = vld [vmem:[%s2117_s4 + $0xa0] sm:$0xff] }
  0xf3   :  { %979 = vst.msk [vmem:[%s2118_s5 + $0x148] sm:$0xff] %vm937_vm2, %v824_v1  ;;  %v674_v10 = vadd.f32 %v1157_v9, %v302_v6  ;;  %v668_v12 = vpop.f32.mrb[11].mxu0 }
  0xf4   :  { %978 = vst.msk [vmem:[%s2118_s5 + $0x140] sm:$0xff] %vm937_vm2, %v819_v7  ;;  %v1205_v11 = vpop.f32.mrb[10].mxu1  ;;  %v669_v14 = vadd.f32 %v668_v12, %v301_v8  ;;  %v343_v7 = vld [vmem:[%s2117_s4 + $0x1a0] sm:$0xff]  ;;  %v314_v12 = vld [vmem:[%s2117_s4 + $0xb8] sm:$0xff] }
  0xf5   :  { %v834_v13 = vadd.f32 %v1205_v11, %v334_v2  ;;  %v828_v15 = vpop.f32.mrb[11].mxu1  ;;  %949 = vst.msk [vmem:[%s2118_s5 + $0x58] sm:$0xff] %vm937_vm2, %v674_v10 }
  0xf6   :  { %v829_v17 = vadd.f32 %v828_v15, %v333_v4  ;;  %948 = vst.msk [vmem:[%s2118_s5 + $0x50] sm:$0xff] %vm937_vm2, %v669_v14  ;;  %v1160_v20 = vpop.f32.mrb[12].mxu0  ;;  %v346_v14 = vld [vmem:[%s2117_s4 + $0x1b8] sm:$0xff]  ;;  %v313_v15 = vld [vmem:[%s2117_s4 + $0xb0] sm:$0xff] }
  0xf7   :  { %981 = vst.msk [vmem:[%s2118_s5 + $0x158] sm:$0xff] %vm937_vm2, %v834_v13  ;;  %v684_v22 = vadd.f32 %v1160_v20, %v304_v16  ;;  %v678_v24 = vpop.f32.mrb[13].mxu0 }
  0xf8   :  { %980 = vst.msk [vmem:[%s2118_s5 + $0x150] sm:$0xff] %vm937_vm2, %v829_v17  ;;  %v1208_v23 = vpop.f32.mrb[12].mxu1  ;;  %v679_v26 = vadd.f32 %v678_v24, %v303_v19  ;;  %v345_v17 = vld [vmem:[%s2117_s4 + $0x1b0] sm:$0xff]  ;;  %v316_v24 = vld [vmem:[%s2117_s4 + $0xc8] sm:$0xff] }
  0xf9   :  { %v844_v25 = vadd.f32 %v1208_v23, %v336_v18  ;;  %v838_v27 = vpop.f32.mrb[13].mxu1  ;;  %951 = vst.msk [vmem:[%s2118_s5 + $0x68] sm:$0xff] %vm937_vm2, %v684_v22 }
  0xfa   :  { %v839_v29 = vadd.f32 %v838_v27, %v335_v21  ;;  %950 = vst.msk [vmem:[%s2118_s5 + $0x60] sm:$0xff] %vm937_vm2, %v679_v26  ;;  %v1163_v32 = vpop.f32.mrb[14].mxu0  ;;  %v348_v26 = vld [vmem:[%s2117_s4 + $0x1c8] sm:$0xff]  ;;  %v315_v27 = vld [vmem:[%s2117_s4 + $0xc0] sm:$0xff] }
  0xfb   :  { %983 = vst.msk [vmem:[%s2118_s5 + $0x168] sm:$0xff] %vm937_vm2, %v844_v25  ;;  %v694_v34 = vadd.f32 %v1163_v32, %v306_v28  ;;  %v688_v36 = vpop.f32.mrb[15].mxu0 }
  0xfc   :  { %982 = vst.msk [vmem:[%s2118_s5 + $0x160] sm:$0xff] %vm937_vm2, %v839_v29  ;;  %v1211_v35 = vpop.f32.mrb[14].mxu1  ;;  %v689_v38 = vadd.f32 %v688_v36, %v305_v31  ;;  %v347_v29 = vld [vmem:[%s2117_s4 + $0x1c0] sm:$0xff]  ;;  %v318_v36 = vld [vmem:[%s2117_s4 + $0xd8] sm:$0xff] }
  0xfd   :  { %v854_v37 = vadd.f32 %v1211_v35, %v338_v30  ;;  %v848_v39 = vpop.f32.mrb[15].mxu1  ;;  %953 = vst.msk [vmem:[%s2118_s5 + $0x78] sm:$0xff] %vm937_vm2, %v694_v34 }
  0xfe   :  { %v849_v41 = vadd.f32 %v848_v39, %v337_v33  ;;  %952 = vst.msk [vmem:[%s2118_s5 + $0x70] sm:$0xff] %vm937_vm2, %v689_v38  ;;  %v1166_v44 = vpop.f32.mrb[16].mxu0  ;;  %v350_v38 = vld [vmem:[%s2117_s4 + $0x1d8] sm:$0xff]  ;;  %v317_v39 = vld [vmem:[%s2117_s4 + $0xd0] sm:$0xff] }
  0xff   :  { %985 = vst.msk [vmem:[%s2118_s5 + $0x178] sm:$0xff] %vm937_vm2, %v854_v37  ;;  %v704_v46 = vadd.f32 %v1166_v44, %v308_v40  ;;  %v698_v48 = vpop.f32.mrb[17].mxu0 }
 0x100   :  { %984 = vst.msk [vmem:[%s2118_s5 + $0x170] sm:$0xff] %vm937_vm2, %v849_v41  ;;  %v1214_v47 = vpop.f32.mrb[16].mxu1  ;;  %v699_v50 = vadd.f32 %v698_v48, %v307_v43  ;;  %v349_v41 = vld [vmem:[%s2117_s4 + $0x1d0] sm:$0xff]  ;;  %v320_v48 = vld [vmem:[%s2117_s4 + $0xe8] sm:$0xff] }
 0x101   :  { %v864_v49 = vadd.f32 %v1214_v47, %v340_v42  ;;  %v858_v51 = vpop.f32.mrb[17].mxu1  ;;  %955 = vst.msk [vmem:[%s2118_s5 + $0x88] sm:$0xff] %vm937_vm2, %v704_v46 }
 0x102   :  { %v859_v53 = vadd.f32 %v858_v51, %v339_v45  ;;  %954 = vst.msk [vmem:[%s2118_s5 + $0x80] sm:$0xff] %vm937_vm2, %v699_v50  ;;  %v1169_v56 = vpop.f32.mrb[18].mxu0  ;;  %v352_v50 = vld [vmem:[%s2117_s4 + $0x1e8] sm:$0xff]  ;;  %v319_v51 = vld [vmem:[%s2117_s4 + $0xe0] sm:$0xff] }
 0x103   :  { %987 = vst.msk [vmem:[%s2118_s5 + $0x188] sm:$0xff] %vm937_vm2, %v864_v49  ;;  %v714_v58 = vadd.f32 %v1169_v56, %v310_v52  ;;  %v708_v60 = vpop.f32.mrb[19].mxu0 }
 0x104   :  { %986 = vst.msk [vmem:[%s2118_s5 + $0x180] sm:$0xff] %vm937_vm2, %v859_v53  ;;  %v1217_v59 = vpop.f32.mrb[18].mxu1  ;;  %v709_v62 = vadd.f32 %v708_v60, %v309_v55  ;;  %v351_v53 = vld [vmem:[%s2117_s4 + $0x1e0] sm:$0xff]  ;;  %v322_v60 = vld [vmem:[%s2117_s4 + $0xf8] sm:$0xff] }
 0x105   :  { %v874_v61 = vadd.f32 %v1217_v59, %v342_v54  ;;  %v868_v63 = vpop.f32.mrb[19].mxu1  ;;  %957 = vst.msk [vmem:[%s2118_s5 + $0x98] sm:$0xff] %vm937_vm2, %v714_v58 }
 0x106   :  { %v869_v1 = vadd.f32 %v868_v63, %v341_v57  ;;  %956 = vst.msk [vmem:[%s2118_s5 + $0x90] sm:$0xff] %vm937_vm2, %v709_v62  ;;  %v1172_v6 = vpop.f32.mrb[20].mxu0  ;;  %v354_v62 = vld [vmem:[%s2117_s4 + $0x1f8] sm:$0xff]  ;;  %v321_v63 = vld [vmem:[%s2117_s4 + $0xf0] sm:$0xff] }
 0x107   :  { %989 = vst.msk [vmem:[%s2118_s5 + $0x198] sm:$0xff] %vm937_vm2, %v874_v61  ;;  %v724_v2 = vadd.f32 %v1172_v6, %v312_v0  ;;  %v718_v9 = vpop.f32.mrb[21].mxu0 }
 0x108   :  { %988 = vst.msk [vmem:[%s2118_s5 + $0x190] sm:$0xff] %vm937_vm2, %v869_v1  ;;  %v1220_v8 = vpop.f32.mrb[20].mxu1  ;;  %v719_v10 = vadd.f32 %v718_v9, %v311_v5  ;;  %v353_v1 = vld [vmem:[%s2117_s4 + $0x1f0] sm:$0xff] }
 0x109   :  { %v884_v4 = vadd.f32 %v1220_v8, %v344_v3  ;;  %v878_v11 = vpop.f32.mrb[21].mxu1  ;;  %959 = vst.msk [vmem:[%s2118_s5 + $0xa8] sm:$0xff] %vm937_vm2, %v724_v2 }
 0x10a   :  { %v879_v13 = vadd.f32 %v878_v11, %v343_v7  ;;  %958 = vst.msk [vmem:[%s2118_s5 + $0xa0] sm:$0xff] %vm937_vm2, %v719_v10  ;;  %v1175_v16 = vpop.f32.mrb[22].mxu0 }
 0x10b   :  { %991 = vst.msk [vmem:[%s2118_s5 + $0x1a8] sm:$0xff] %vm937_vm2, %v884_v4  ;;  %v734_v18 = vadd.f32 %v1175_v16, %v314_v12  ;;  %v728_v20 = vpop.f32.mrb[23].mxu0 }
 0x10c   :  { %990 = vst.msk [vmem:[%s2118_s5 + $0x1a0] sm:$0xff] %vm937_vm2, %v879_v13  ;;  %v1223_v19 = vpop.f32.mrb[22].mxu1  ;;  %v729_v22 = vadd.f32 %v728_v20, %v313_v15 }
 0x10d   :  { %v894_v21 = vadd.f32 %v1223_v19, %v346_v14  ;;  %v888_v23 = vpop.f32.mrb[23].mxu1  ;;  %961 = vst.msk [vmem:[%s2118_s5 + $0xb8] sm:$0xff] %vm937_vm2, %v734_v18 }
 0x10e   :  { %v889_v25 = vadd.f32 %v888_v23, %v345_v17  ;;  %960 = vst.msk [vmem:[%s2118_s5 + $0xb0] sm:$0xff] %vm937_vm2, %v729_v22  ;;  %v1178_v28 = vpop.f32.mrb[24].mxu0 }
 0x10f   :  { %993 = vst.msk [vmem:[%s2118_s5 + $0x1b8] sm:$0xff] %vm937_vm2, %v894_v21  ;;  %v744_v30 = vadd.f32 %v1178_v28, %v316_v24  ;;  %v738_v32 = vpop.f32.mrb[25].mxu0 }
 0x110   :  { %992 = vst.msk [vmem:[%s2118_s5 + $0x1b0] sm:$0xff] %vm937_vm2, %v889_v25  ;;  %v1226_v31 = vpop.f32.mrb[24].mxu1  ;;  %v739_v34 = vadd.f32 %v738_v32, %v315_v27 }
 0x111   :  { %v904_v33 = vadd.f32 %v1226_v31, %v348_v26  ;;  %v898_v35 = vpop.f32.mrb[25].mxu1  ;;  %963 = vst.msk [vmem:[%s2118_s5 + $0xc8] sm:$0xff] %vm937_vm2, %v744_v30 }
 0x112   :  { %v899_v37 = vadd.f32 %v898_v35, %v347_v29  ;;  %962 = vst.msk [vmem:[%s2118_s5 + $0xc0] sm:$0xff] %vm937_vm2, %v739_v34  ;;  %v1181_v40 = vpop.f32.mrb[26].mxu0 }
 0x113   :  { %995 = vst.msk [vmem:[%s2118_s5 + $0x1c8] sm:$0xff] %vm937_vm2, %v904_v33  ;;  %v754_v42 = vadd.f32 %v1181_v40, %v318_v36  ;;  %v748_v44 = vpop.f32.mrb[27].mxu0 }
 0x114   :  { %994 = vst.msk [vmem:[%s2118_s5 + $0x1c0] sm:$0xff] %vm937_vm2, %v899_v37  ;;  %v1229_v43 = vpop.f32.mrb[26].mxu1  ;;  %v749_v46 = vadd.f32 %v748_v44, %v317_v39 }
 0x115   :  { %v914_v45 = vadd.f32 %v1229_v43, %v350_v38  ;;  %v908_v47 = vpop.f32.mrb[27].mxu1  ;;  %965 = vst.msk [vmem:[%s2118_s5 + $0xd8] sm:$0xff] %vm937_vm2, %v754_v42 }
 0x116   :  { %v909_v49 = vadd.f32 %v908_v47, %v349_v41  ;;  %964 = vst.msk [vmem:[%s2118_s5 + $0xd0] sm:$0xff] %vm937_vm2, %v749_v46  ;;  %v1184_v52 = vpop.f32.mrb[28].mxu0 }
 0x117   :  { %997 = vst.msk [vmem:[%s2118_s5 + $0x1d8] sm:$0xff] %vm937_vm2, %v914_v45  ;;  %v764_v54 = vadd.f32 %v1184_v52, %v320_v48  ;;  %v758_v56 = vpop.f32.mrb[29].mxu0 }
 0x118   :  { %996 = vst.msk [vmem:[%s2118_s5 + $0x1d0] sm:$0xff] %vm937_vm2, %v909_v49  ;;  %v1232_v55 = vpop.f32.mrb[28].mxu1  ;;  %v759_v58 = vadd.f32 %v758_v56, %v319_v51 }
 0x119   :  { %v924_v57 = vadd.f32 %v1232_v55, %v352_v50  ;;  %v918_v59 = vpop.f32.mrb[29].mxu1  ;;  %967 = vst.msk [vmem:[%s2118_s5 + $0xe8] sm:$0xff] %vm937_vm2, %v764_v54 }
 0x11a   :  { %v919_v61 = vadd.f32 %v918_v59, %v351_v53  ;;  %966 = vst.msk [vmem:[%s2118_s5 + $0xe0] sm:$0xff] %vm937_vm2, %v759_v58  ;;  %v1187_v0 = vpop.f32.mrb[30].mxu0 }
 0x11b   :  { %999 = vst.msk [vmem:[%s2118_s5 + $0x1e8] sm:$0xff] %vm937_vm2, %v924_v57  ;;  %v774_v3 = vadd.f32 %v1187_v0, %v322_v60  ;;  %v768_v6 = vpop.f32.mrb[31].mxu0 }
 0x11c   :  { %998 = vst.msk [vmem:[%s2118_s5 + $0x1e0] sm:$0xff] %vm937_vm2, %v919_v61  ;;  %v1235_v5 = vpop.f32.mrb[30].mxu1  ;;  %v769_v2 = vadd.f32 %v768_v6, %v321_v63 }
 0x11d   :  { %v934_v7 = vadd.f32 %v1235_v5, %v354_v62  ;;  %v928_v8 = vpop.f32.mrb[31].mxu1  ;;  %969 = vst.msk [vmem:[%s2118_s5 + $0xf8] sm:$0xff] %vm937_vm2, %v774_v3 }
 0x11e   :  { %v929_v9 = vadd.f32 %v928_v8, %v353_v1  ;;  %968 = vst.msk [vmem:[%s2118_s5 + $0xf0] sm:$0xff] %vm937_vm2, %v769_v2 }
 0x11f   :  { %1001 = vst.msk [vmem:[%s2118_s5 + $0x1f8] sm:$0xff] %vm937_vm2, %v934_v7 }
 0x120   :  { %1000 = vst.msk [vmem:[%s2118_s5 + $0x1f0] sm:$0xff] %vm937_vm2, %v929_v9 }

// kernel: preact_bottleneck_forward.4
= control target key start
LH: loop header
LB: loop body
LE: loop exit
PB: predicated region body
PF: predicated region fallthrough
CT: control target
= control target key end

     0   :  { %s2439_s15 = smov 0   ;;  %s3990_s0 = inlined_call_operand.vmem [shape: f32[2,16,16,4], index: 0, kind: input, shape index: {}]   ;;  %s3991_s1 = inlined_call_operand.vmem [shape: f32[1,4], index: 1, kind: input, shape index: {}]   ;;  %s3992_s2 = inlined_call_operand.vmem [shape: f32[1,4], index: 2, kind: input, shape index: {}]   ;;  %s3993_s3 = inlined_call_operand.vmem [shape: f32[36,4], index: 3, kind: input, shape index: {}]   ;;  %s3994_s4 = inlined_call_operand.vmem [shape: f32[2,16,16,4], index: 4, kind: output, shape index: {}]  }
   0x1 LB: > { %s2223_s16 = sadd.s32 4294967295, %s2403_s15   ;;  %p2227_p0 = scmp.ge.s32.totalorder %s2403_s15, 1  ;;  %s2403_s15 = sphi %s2439_s15, %s14_s15  }
   0x2   : > { %p162_p1 = scmp.lt.s32.totalorder %s2403_s15, 3 }
   0x4   : > { %p163_p2 = pnand %p2227_p0, %p162_p1 }
   0x6   : > { %166 = sbr.rel (%p163_p2) target bundleno = 894 (0x37e), region = 36 }
   0xd   : > { %vm198_vm0 = vcmask 24576   ;;  %vm235_vm1 = vcmask 31744   ;;  %p2449_p3 = scmp.lt.s32.totalorder %s2223_s16, 1  ;;  %v2405_v0 = vmov 0.0   ;;  %vm238_vm2 = vcmask 25600   ;;  %s2406_s26 = smov 4  }
   0xe   : > { %199 = vst.msk [vmem:[#allocation2] sm:$0x1] %vm198_vm0, %v2405_v0  ;;  %200 = vst.msk [vmem:[#allocation2 + $0x18] sm:$0x1] %vm198_vm0, %v2405_v0  ;;  %v2503_v1 = vld [vmem:[%s3991_s1] ss:$0 sm:$0xff] }
   0xf   : > { %237 = vst.msk [vmem:[#allocation2 + $0x8] sm:$0xff] %vm235_vm1, %v2405_v0  ;;  %242 = vst.msk [vmem:[#allocation2 + $0x1a0] sm:$0xff] %vm235_vm1, %v2405_v0  ;;  %s4131_s16 = smov (!%p2449_p3, %s2223_s16), 1  ;;  %v2515_v2 = vld [vmem:[%s3992_s2] ss:$0 sm:$0xff]  ;;  %vm553_vm3 = vcmask 1046528  }
  0x10   : > { %201 = vst.msk [vmem:[#allocation2 + $0x30] sm:$0x1] %vm198_vm0, %v2405_v0  ;;  %202 = vst.msk [vmem:[#allocation2 + $0x48] sm:$0x1] %vm198_vm0, %v2405_v0  ;;  %s2269_s18 = sshll.u32 %s4131_s16, 8  ;;  %vm763_vm4 = vcmask 1045504  }
  0x11   : > { %203 = vst.msk [vmem:[#allocation2 + $0x60] sm:$0x1] %vm198_vm0, %v2405_v0  ;;  %204 = vst.msk [vmem:[#allocation2 + $0x78] sm:$0x1] %vm198_vm0, %v2405_v0  ;;  %s2510_s23 = scalar_lea.vmem %s3990_s0, %s2269_s18  ;;  %s2407_s27 = smov 8   ;;  %vm730_vm5 = vcmask 64544  }
  0x12   : > { %205 = vst.msk [vmem:[#allocation2 + $0x90] sm:$0x1] %vm198_vm0, %v2405_v0  ;;  %206 = vst.msk [vmem:[#allocation2 + $0xa8] sm:$0x1] %vm198_vm0, %v2405_v0  ;;  %v244_v3 = vld [vmem:[%s2510_s23] sm:$0xff]  ;;  %v245_v4 = vld [vmem:[%s2510_s23 + $0x8] sm:$0xff] }
  0x13   : > { %207 = vst.msk [vmem:[#allocation2 + $0xc0] sm:$0x1] %vm198_vm0, %v2405_v0  ;;  %208 = vst.msk [vmem:[#allocation2 + $0xd8] sm:$0x1] %vm198_vm0, %v2405_v0  ;;  %v246_v5 = vld [vmem:[%s2510_s23 + $0x10] sm:$0xff]  ;;  %v284_v6 = vmul.f32 %v2503_v1, %v244_v3  ;;  %v285_v7 = vmul.f32 %v2503_v1, %v245_v4  ;;  %v247_v8 = vld [vmem:[%s2510_s23 + $0x18] sm:$0xff] }
  0x14   : > { %209 = vst.msk [vmem:[#allocation2 + $0xf0] sm:$0x1] %vm198_vm0, %v2405_v0  ;;  %210 = vst.msk [vmem:[#allocation2 + $0x108] sm:$0x1] %vm198_vm0, %v2405_v0  ;;  %v286_v9 = vmul.f32 %v2503_v1, %v246_v5  ;;  %v248_v10 = vld [vmem:[%s2510_s23 + $0x20] sm:$0xff]  ;;  %v249_v11 = vld [vmem:[%s2510_s23 + $0x28] sm:$0xff]  ;;  %v287_v13 = vmul.f32 %v2503_v1, %v247_v8 }
  0x15   : > { %211 = vst.msk [vmem:[#allocation2 + $0x120] sm:$0x1] %vm198_vm0, %v2405_v0  ;;  %212 = vst.msk [vmem:[#allocation2 + $0x138] sm:$0x1] %vm198_vm0, %v2405_v0  ;;  %v288_v14 = vmul.f32 %v2503_v1, %v248_v10  ;;  %v289_v15 = vmul.f32 %v2503_v1, %v249_v11  ;;  %v322_v18 = vadd.f32 %v2515_v2, %v284_v6  ;;  %v250_v22 = vld [vmem:[%s2510_s23 + $0x30] sm:$0xff]  ;;  %v251_v27 = vld [vmem:[%s2510_s23 + $0x38] sm:$0xff] }
  0x16   : > { %213 = vst.msk [vmem:[#allocation2 + $0x150] sm:$0x1] %vm198_vm0, %v2405_v0  ;;  %214 = vst.msk [vmem:[#allocation2 + $0x168] sm:$0x1] %vm198_vm0, %v2405_v0  ;;  %v2526_v12 = vld [vmem:[#allocation2 + $0x8] sm:$0xff]  ;;  %v323_v19 = vadd.f32 %v2515_v2, %v285_v7  ;;  %v324_v21 = vadd.f32 %v2515_v2, %v286_v9  ;;  %v325_v25 = vadd.f32 %v2515_v2, %v287_v13  ;;  %v252_v28 = vld [vmem:[%s2510_s23 + $0x40] sm:$0xff] }
  0x17   : > { %215 = vst.msk [vmem:[#allocation2 + $0x180] sm:$0x1] %vm198_vm0, %v2405_v0  ;;  %216 = vst.msk [vmem:[#allocation2 + $0x198] sm:$0x1] %vm198_vm0, %v2405_v0  ;;  %v555_v17 = vrot.slane %v2526_v12, 1  ;;  %v326_v26 = vadd.f32 %v2515_v2, %v288_v14  ;;  %v253_v29 = vld [vmem:[%s2510_s23 + $0x48] sm:$0xff]  ;;  %v327_v33 = vadd.f32 %v2515_v2, %v289_v15  ;;  %v290_v43 = vmul.f32 %v2503_v1, %v250_v22 }
  0x18   : > { %217 = vst.msk [vmem:[#allocation2 + $0x11] sm:$0x1] %vm198_vm0, %v2405_v0  ;;  %218 = vst.msk [vmem:[#allocation2 + $0x29] sm:$0x1] %vm198_vm0, %v2405_v0  ;;  %v354_v30 = vmax.f32 %v322_v18, 0.0  ;;  %v355_v31 = vmax.f32 %v323_v19, 0.0  ;;  %v291_v44 = vmul.f32 %v2503_v1, %v251_v27  ;;  %v292_v45 = vmul.f32 %v2503_v1, %v252_v28 }
  0x19   : > { %219 = vst.msk [vmem:[#allocation2 + $0x41] sm:$0x1] %vm198_vm0, %v2405_v0  ;;  %220 = vst.msk [vmem:[#allocation2 + $0x59] sm:$0x1] %vm198_vm0, %v2405_v0  ;;  %v356_v32 = vmax.f32 %v324_v21, 0.0  ;;  %v254_v34 = vld [vmem:[%s2510_s23 + $0x50] sm:$0xff]  ;;  %v293_v46 = vmul.f32 %v2503_v1, %v253_v29  ;;  %v328_v50 = vadd.f32 %v2515_v2, %v290_v43 }
  0x1a   : > { %221 = vst.msk [vmem:[#allocation2 + $0x71] sm:$0x1] %vm198_vm0, %v2405_v0  ;;  %222 = vst.msk [vmem:[#allocation2 + $0x89] sm:$0x1] %vm198_vm0, %v2405_v0  ;;  %v255_v35 = vld [vmem:[%s2510_s23 + $0x58] sm:$0xff]  ;;  %v256_v36 = vld [vmem:[%s2510_s23 + $0x60] sm:$0xff]  ;;  %v294_v47 = vmul.f32 %v2503_v1, %v254_v34  ;;  %v329_v51 = vadd.f32 %v2515_v2, %v291_v44  ;;  %v330_v52 = vadd.f32 %v2515_v2, %v292_v45 }
  0x1b   : > { %223 = vst.msk [vmem:[#allocation2 + $0xa1] sm:$0x1] %vm198_vm0, %v2405_v0  ;;  %224 = vst.msk [vmem:[#allocation2 + $0xb9] sm:$0x1] %vm198_vm0, %v2405_v0  ;;  %v357_v39 = vmax.f32 %v325_v25, 0.0  ;;  %v358_v40 = vmax.f32 %v326_v26, 0.0  ;;  %v295_v48 = vmul.f32 %v2503_v1, %v255_v35  ;;  %v296_v49 = vmul.f32 %v2503_v1, %v256_v36 }
  0x1c   : > { %225 = vst.msk [vmem:[#allocation2 + $0xd1] sm:$0x1] %vm198_vm0, %v2405_v0  ;;  %226 = vst.msk [vmem:[#allocation2 + $0xe9] sm:$0x1] %vm198_vm0, %v2405_v0  ;;  %v257_v41 = vld [vmem:[%s2510_s23 + $0x68] sm:$0xff]  ;;  %v359_v42 = vmax.f32 %v327_v33, 0.0  ;;  %v331_v54 = vadd.f32 %v2515_v2, %v293_v46  ;;  %v332_v55 = vadd.f32 %v2515_v2, %v294_v47 }
  0x1d   : > { %227 = vst.msk [vmem:[#allocation2 + $0x101] sm:$0x1] %vm198_vm0, %v2405_v0  ;;  %228 = vst.msk [vmem:[#allocation2 + $0x119] sm:$0x1] %vm198_vm0, %v2405_v0  ;;  %v297_v53 = vmul.f32 %v2503_v1, %v257_v41  ;;  %v333_v56 = vadd.f32 %v2515_v2, %v295_v48  ;;  %v334_v57 = vadd.f32 %v2515_v2, %v296_v49  ;;  %v258_v58 = vld [vmem:[%s2510_s23 + $0x70] sm:$0xff]  ;;  %v259_v59 = vld [vmem:[%s2510_s23 + $0x78] sm:$0xff] }
  0x1e   : > { %229 = vst.msk [vmem:[#allocation2 + $0x131] sm:$0x1] %vm198_vm0, %v2405_v0  ;;  %230 = vst.msk [vmem:[#allocation2 + $0x149] sm:$0x1] %vm198_vm0, %v2405_v0  ;;  %v360_v60 = vmax.f32 %v328_v50, 0.0  ;;  %v361_v61 = vmax.f32 %v329_v51, 0.0  ;;  %v298_v7 = vmul.f32 %v2503_v1, %v258_v58  ;;  %v299_v8 = vmul.f32 %v2503_v1, %v259_v59 }
  0x1f   : > { %231 = vst.msk [vmem:[#allocation2 + $0x161] sm:$0x1] %vm198_vm0, %v2405_v0  ;;  %232 = vst.msk [vmem:[#allocation2 + $0x179] sm:$0x1] %vm198_vm0, %v2405_v0  ;;  %v362_v62 = vmax.f32 %v330_v52, 0.0  ;;  %v335_v63 = vadd.f32 %v2515_v2, %v297_v53  ;;  %v364_v3 = vmax.f32 %v332_v55, 0.0 }
  0x20   : > { %233 = vst.msk [vmem:[#allocation2 + $0x191] sm:$0x1] %vm198_vm0, %v2405_v0  ;;  %234 = vst.msk [vmem:[#allocation2 + $0x1a9] sm:$0x1] %vm198_vm0, %v2405_v0  ;;  %v365_v4 = vmax.f32 %v333_v56, 0.0  ;;  %v366_v5 = vmax.f32 %v334_v57, 0.0  ;;  %v336_v26 = vadd.f32 %v2515_v2, %v298_v7 }
  0x21   : > { %236 = vst.msk [vmem:[#allocation2] sm:$0xff] %vm235_vm1, %v2405_v0  ;;  %241 = vst.msk [vmem:[#allocation2 + $0x198] sm:$0xff] %vm235_vm1, %v2405_v0  ;;  %v367_v6 = vmax.f32 %v335_v63, 0.0  ;;  %v260_v9 = vld [vmem:[%s2510_s23 + $0x80] sm:$0xff]  ;;  %v261_v10 = vld [vmem:[%s2510_s23 + $0x88] sm:$0xff]  ;;  %s2408_s28 = smov 12  }
  0x22   : > { %239 = vst.msk [vmem:[#allocation2 + $0x10] sm:$0x3] %vm238_vm2, %v2405_v0  ;;  %243 = vst.msk [vmem:[#allocation2 + $0x1a8] sm:$0x3] %vm238_vm2, %v2405_v0  ;;  %v363_v0 = vmax.f32 %v331_v54, 0.0  ;;  %v262_v11 = vld [vmem:[%s2510_s23 + $0x90] sm:$0xff]  ;;  %v300_v35 = vmul.f32 %v2503_v1, %v260_v9  ;;  %v301_v36 = vmul.f32 %v2503_v1, %v261_v10 }
  0x23   : > { %474 = vst.msk [vmem:[#allocation3 + $0x8] sm:$0xff] %vm235_vm1, %v2526_v12  ;;  %387 = vst.msk [vmem:[#allocation2 + $0x19] sm:$0xff] %vm235_vm1, %v354_v30  ;;  %v264_v18 = vld [vmem:[%s2510_s23 + $0xa0] sm:$0xff]  ;;  %v266_v10 = vld [vmem:[%s2510_s23 + $0xb0] sm:$0xff]  ;;  %vm940_vm6 = vcmask 97344   ;;  %s2409_s29 = smov 16  }
  0x24   : > { %388 = vst.msk [vmem:[#allocation2 + $0x21] sm:$0xff] %vm235_vm1, %v355_v31  ;;  %389 = vst.msk [vmem:[#allocation2 + $0x31] sm:$0xff] %vm235_vm1, %v356_v32  ;;  %v337_v32 = vadd.f32 %v2515_v2, %v299_v8  ;;  %v304_v46 = vmul.f32 %v2503_v1, %v264_v18  ;;  %v338_v58 = vadd.f32 %v2515_v2, %v300_v35  ;;  %s2410_s30 = smov 20   ;;  %s2411_s5 = smov 24   ;;  %vm1907_vm7 = vcmask 1043456  }
  0x25   : > { %390 = vst.msk [vmem:[#allocation2 + $0x39] sm:$0xff] %vm235_vm1, %v357_v39  ;;  %391 = vst.msk [vmem:[#allocation2 + $0x49] sm:$0xff] %vm235_vm1, %v358_v40  ;;  %v368_v40 = vmax.f32 %v336_v26, 0.0  ;;  %s2412_s6 = smov 28   ;;  %s2413_s11 = smov 32   ;;  %vm1071_vm8 = vcmask 130144  }
  0x26   : > { %392 = vst.msk [vmem:[#allocation2 + $0x51] sm:$0xff] %vm235_vm1, %v359_v42  ;;  %393 = vst.msk [vmem:[#allocation2 + $0x61] sm:$0xff] %vm235_vm1, %v360_v60  ;;  %v369_v41 = vmax.f32 %v337_v32, 0.0  ;;  %v302_v42 = vmul.f32 %v2503_v1, %v262_v11  ;;  %v339_v60 = vadd.f32 %v2515_v2, %v301_v36  ;;  %v370_v18 = vmax.f32 %v338_v58, 0.0  ;;  %v270_v32 = vld [vmem:[%s2510_s23 + $0xd0] sm:$0xff] }
  0x27   : > { %394 = vst.msk [vmem:[#allocation2 + $0x69] sm:$0xff] %vm235_vm1, %v361_v61  ;;  %395 = vst.msk [vmem:[#allocation2 + $0x79] sm:$0xff] %vm235_vm1, %v362_v62  ;;  %vm1206_vm9 = vcmask 162944   ;;  %vm1340_vm10 = vcmask 195744   ;;  %vm1471_vm11 = vcmask 228544   ;;  %vm1606_vm12 = vcmask 261344  }
  0x28   : > { %v2531_v16 = vld [vmem:[#allocation2] sm:$0xff]  ;;  %396 = vst.msk [vmem:[#allocation2 + $0x81] sm:$0xff] %vm235_vm1, %v363_v0  ;;  %397 = vst.msk [vmem:[#allocation2 + $0x91] sm:$0xff] %vm235_vm1, %v364_v3  ;;  %v340_v61 = vadd.f32 %v2515_v2, %v302_v42  ;;  %v271_v42 = vld [vmem:[%s2510_s23 + $0xd8] sm:$0xff]  ;;  %vm1740_vm13 = vcmask 294144   ;;  %vm1810_vm14 = vcmask 293888  }
  0x29   : > { %v2538_v20 = vld [vmem:[#allocation2 + $0x10] sm:$0x3]  ;;  %v554_v23 = vrot.slane %v2531_v16, 1  ;;  %473 = vst.msk [vmem:[#allocation3] sm:$0xff] %vm235_vm1, %v2531_v16  ;;  %398 = vst.msk [vmem:[#allocation2 + $0x99] sm:$0xff] %vm235_vm1, %v365_v4 }
  0x2a   : > { %v557_v24 = vrot.slane %v2538_v20, 1  ;;  %v2592_v13 = vld [vmem:[#allocation2 + $0x18] sm:$0xff]  ;;  %399 = vst.msk [vmem:[#allocation2 + $0xa9] sm:$0xff] %vm235_vm1, %v366_v5  ;;  %400 = vst.msk [vmem:[#allocation2 + $0xb1] sm:$0xff] %vm235_vm1, %v367_v6  ;;  %v342_v5 = vadd.f32 %v2515_v2, %v304_v46 }
  0x2b   : > { %v556_v37 = vsel %vm553_vm3, %v554_v23, %v555_v17  ;;  %v2594_v14 = vld [vmem:[#allocation2 + $0x20] sm:$0xff]  ;;  %v2596_v15 = vld [vmem:[#allocation2 + $0x28] sm:$0x3]  ;;  %v559_v19 = vrot.slane %v2592_v13, 1  ;;  %475 = vst.msk [vmem:[#allocation3 + $0x10] sm:$0xff] %vm235_vm1, %v2592_v13  ;;  %v2611_v23 = vld [vmem:[#allocation2 + $0x30] sm:$0xff] }
  0x2c   : > { %v558_v38 = vsel %vm553_vm3, %v555_v17, %v557_v24  ;;  %634 = vrot.lane.b32.xlu0 %v556_v37, %s2406_s26  ;;  %v263_v17 = vld [vmem:[%s2510_s23 + $0x98] sm:$0xff]  ;;  %v560_v21 = vrot.slane %v2594_v14, 1  ;;  %476 = vst.msk [vmem:[#allocation3 + $0x18] sm:$0xff] %vm235_vm1, %v2594_v14  ;;  %v562_v22 = vrot.slane %v2596_v15, 1  ;;  %v2615_v25 = vld [vmem:[#allocation2 + $0x48] sm:$0xff]  ;;  %v564_v27 = vrot.slane %v2611_v23, 1 }
  0x2d   : > { %v2613_v24 = vld [vmem:[#allocation2 + $0x38] sm:$0xff]  ;;  %477 = vst.msk [vmem:[#allocation3 + $0x20] sm:$0xff] %vm235_vm1, %v2611_v23  ;;  %v2625_v29 = vld [vmem:[#allocation2 + $0x40] sm:$0x3]  ;;  %v2627_v30 = vld [vmem:[#allocation2 + $0x50] sm:$0xff]  ;;  %v569_v31 = vrot.slane %v2615_v25, 1  ;;  %v303_v45 = vmul.f32 %v2503_v1, %v263_v17 }
  0x2e   : > { %v565_v28 = vrot.slane %v2613_v24, 1  ;;  %478 = vst.msk [vmem:[#allocation3 + $0x28] sm:$0xff] %vm235_vm1, %v2613_v24  ;;  %479 = vst.msk [vmem:[#allocation3 + $0x30] sm:$0xff] %vm235_vm1, %v2615_v25  ;;  %v2634_v33 = vsel %vm553_vm3, %v559_v19, %v560_v21  ;;  %v570_v34 = vrot.slane %v2627_v30, 1  ;;  %v265_v37 = vld [vmem:[%s2510_s23 + $0xa8] sm:$0xff]  ;;  %v2651_v43 = vsel %vm553_vm3, %v560_v21, %v562_v22  ;;  %v2661_v48 = vld [vmem:[#allocation2 + $0x60] sm:$0xff] }
  0x2f   : > { %4062 = vst [vmem:[#allocation4_spill] sm:$0xff] %v2634_v33  ;;  %480 = vst.msk [vmem:[#allocation3 + $0x38] sm:$0xff] %vm235_vm1, %v2627_v30  ;;  %638 = vrot.lane.b32.xlu1 %v2634_v33, %s2406_s26  ;;  %v2647_v39 = vld [vmem:[#allocation2 + $0x58] sm:$0x3]  ;;  %v567_v44 = vrot.slane %v2625_v29, 1  ;;  %v2663_v49 = vld [vmem:[#allocation2 + $0x68] sm:$0xff]  ;;  %v305_v51 = vmul.f32 %v2503_v1, %v265_v37  ;;  %v341_v4 = vadd.f32 %v2515_v2, %v303_v45 }
  0x30   : > { %636 = vrot.lane.b32.xlu0 %v558_v38, %s2406_s26  ;;  %v2645_v38 = vsel %vm553_vm3, %v564_v27, %v565_v28  ;;  %4064 = vst [vmem:[#allocation6_spill] sm:$0xff] %v2651_v43  ;;  %v2659_v47 = vsel %vm553_vm3, %v569_v31, %v570_v34  ;;  %v2665_v50 = vld [vmem:[#allocation2 + $0x70] sm:$0x3]  ;;  %401 = vst.msk [vmem:[#allocation2 + $0xc1] sm:$0xff] %vm235_vm1, %v368_v40  ;;  %v572_v52 = vrot.slane %v2647_v39, 1  ;;  %v574_v53 = vrot.slane %v2661_v48, 1 }
  0x31   : > { %4063 = vst [vmem:[#allocation5_spill] sm:$0xff] %v2645_v38  ;;  %4065 = vst [vmem:[#allocation7_spill] sm:$0xff] %v2659_v47  ;;  %v575_v54 = vrot.slane %v2663_v49, 1  ;;  %v2677_v55 = vld [vmem:[#allocation2 + $0x78] sm:$0xff]  ;;  %v2679_v56 = vld [vmem:[#allocation2 + $0x80] sm:$0xff]  ;;  %v2697_v62 = vsel %vm553_vm3, %v565_v28, %v567_v44  ;;  %v577_v63 = vrot.slane %v2665_v50, 1  ;;  %v343_v9 = vadd.f32 %v2515_v2, %v305_v51 }
  0x32   : > { %402 = vst.msk [vmem:[#allocation2 + $0xc9] sm:$0xff] %vm235_vm1, %v369_v41  ;;  %481 = vst.msk [vmem:[#allocation3 + $0x40] sm:$0xff] %vm235_vm1, %v2661_v48  ;;  %v2681_v57 = vld [vmem:[#allocation2 + $0x90] sm:$0xff]  ;;  %v2690_v59 = vld [vmem:[#allocation2 + $0x98] sm:$0xff]  ;;  %v579_v7 = vrot.slane %v2677_v55, 1  ;;  %v580_v8 = vrot.slane %v2679_v56, 1  ;;  %v2722_v11 = vsel %vm553_vm3, %v570_v34, %v572_v52  ;;  %v306_v41 = vmul.f32 %v2503_v1, %v266_v10 }
  0x33   : > { %482 = vst.msk [vmem:[#allocation3 + $0x48] sm:$0xff] %vm235_vm1, %v2663_v49  ;;  %640 = vrot.lane.b32.xlu1 %v2651_v43, %s2406_s26  ;;  %483 = vst.msk [vmem:[#allocation3 + $0x50] sm:$0xff] %vm235_vm1, %v2677_v55  ;;  %v2704_v0 = vld [vmem:[#allocation2 + $0xa8] sm:$0xff]  ;;  %v2706_v3 = vld [vmem:[#allocation2 + $0xb0] sm:$0xff]  ;;  %v2711_v6 = vsel %vm553_vm3, %v574_v53, %v575_v54  ;;  %v584_v22 = vrot.slane %v2681_v57, 1  ;;  %v585_v26 = vrot.slane %v2690_v59, 1  ;;  %v2737_v34 = vsel %vm553_vm3, %v575_v54, %v577_v63 }
  0x34   : > { %642 = vrot.lane.b32.xlu0 %v2645_v38, %s2406_s26  ;;  %484 = vst.msk [vmem:[#allocation3 + $0x58] sm:$0xff] %vm235_vm1, %v2679_v56  ;;  %485 = vst.msk [vmem:[#allocation3 + $0x60] sm:$0xff] %vm235_vm1, %v2681_v57  ;;  %v2724_v17 = vld [vmem:[#allocation2 + $0x88] sm:$0x3]  ;;  %v267_v19 = vld [vmem:[%s2510_s23 + $0xb8] sm:$0xff]  ;;  %v371_v27 = vmax.f32 %v339_v60, 0.0  ;;  %v2749_v44 = vsel %vm553_vm3, %v579_v7, %v580_v8  ;;  %v344_v53 = vadd.f32 %v2515_v2, %v306_v41 }
  0x35   : > { %4066 = vst [vmem:[#allocation8_spill] sm:$0xff] %v2697_v62  ;;  %486 = vst.msk [vmem:[#allocation3 + $0x68] sm:$0xff] %vm235_vm1, %v2690_v59  ;;  %v268_v21 = vld [vmem:[%s2510_s23 + $0xc0] sm:$0xff]  ;;  %v372_v28 = vmax.f32 %v340_v61, 0.0  ;;  %v269_v31 = vld [vmem:[%s2510_s23 + $0xc8] sm:$0xff]  ;;  %v373_v37 = vmax.f32 %v341_v4, 0.0  ;;  %v307_v52 = vmul.f32 %v2503_v1, %v267_v19  ;;  %v2772_v63 = vsel %vm553_vm3, %v584_v22, %v585_v26 }
  0x36   : > { %4067 = vst [vmem:[#allocation9_spill] sm:$0xff] %v2711_v6  ;;  %487 = vst.msk [vmem:[#allocation3 + $0x70] sm:$0xff] %vm235_vm1, %v2704_v0  ;;  %v374_v40 = vmax.f32 %v342_v5, 0.0  ;;  %v582_v45 = vrot.slane %v2724_v17, 1  ;;  %v589_v46 = vrot.slane %v2704_v0, 1  ;;  %v375_v51 = vmax.f32 %v343_v9, 0.0 }
  0x37   : > { %488 = vst.msk [vmem:[#allocation3 + $0x78] sm:$0xff] %vm235_vm1, %v2706_v3  ;;  %4068 = vst [vmem:[#allocation10_spill] sm:$0xff] %v2722_v11  ;;  %644 = vrot.lane.b32.xlu1 %v2697_v62, %s2406_s26  ;;  %v2739_v35 = vld [vmem:[#allocation2 + $0xc0] sm:$0xff]  ;;  %v308_v54 = vmul.f32 %v2503_v1, %v268_v21  ;;  %v309_v58 = vmul.f32 %v2503_v1, %v269_v31  ;;  %v273_v61 = vld [vmem:[%s2510_s23 + $0xe8] sm:$0xff]  ;;  %v590_v4 = vrot.slane %v2706_v3, 1  ;;  %v764_v41 = vrot.slane %v2531_v16, 2 }
  0x38   : > { %646 = vrot.lane.b32.xlu0 %v2659_v47, %s2406_s26  ;;  %4069 = vst [vmem:[#allocation11_spill] sm:$0xff] %v2737_v34  ;;  %403 = vst.msk [vmem:[#allocation2 + $0xd9] sm:$0xff] %vm235_vm1, %v370_v18  ;;  %v272_v60 = vld [vmem:[%s2510_s23 + $0xe0] sm:$0xff]  ;;  %v310_v5 = vmul.f32 %v2503_v1, %v270_v32  ;;  %v311_v7 = vmul.f32 %v2503_v1, %v271_v42  ;;  %v345_v10 = vadd.f32 %v2515_v2, %v307_v52 }
  0x39   : > { %v2741_v36 = vld [vmem:[#allocation2 + $0xc8] sm:$0xff]  ;;  %4070 = vst [vmem:[#allocation12_spill] sm:$0xff] %v2749_v44  ;;  %489 = vst.msk [vmem:[#allocation3 + $0x80] sm:$0xff] %vm235_vm1, %v2739_v35  ;;  %v2780_v9 = vld [vmem:[#allocation2 + $0xa0] sm:$0x3]  ;;  %v376_v18 = vmax.f32 %v344_v53, 0.0  ;;  %v346_v19 = vadd.f32 %v2515_v2, %v308_v54  ;;  %v347_v21 = vadd.f32 %v2515_v2, %v309_v58  ;;  %v313_v31 = vmul.f32 %v2503_v1, %v273_v61 }
  0x3a   : > { %490 = vst.msk [vmem:[#allocation3 + $0x88] sm:$0xff] %vm235_vm1, %v2741_v36  ;;  %404 = vst.msk [vmem:[#allocation2 + $0xe1] sm:$0xff] %vm235_vm1, %v371_v27  ;;  %v348_v22 = vadd.f32 %v2515_v2, %v310_v5  ;;  %v349_v27 = vadd.f32 %v2515_v2, %v311_v7  ;;  %v377_v32 = vmax.f32 %v345_v10, 0.0  ;;  %v2796_v42 = vsel %vm553_vm3, %v580_v8, %v582_v45  ;;  %v2821_v7 = vld [vmem:[#allocation2 + $0xb8] sm:$0x3] }
  0x3b   : > { %405 = vst.msk [vmem:[#allocation2 + $0xf1] sm:$0xff] %vm235_vm1, %v372_v28  ;;  %406 = vst.msk [vmem:[#allocation2 + $0xf9] sm:$0xff] %vm235_vm1, %v373_v37  ;;  %648 = vrot.lane.b32.xlu1 %v2722_v11, %s2406_s26  ;;  %v312_v28 = vmul.f32 %v2503_v1, %v272_v60  ;;  %v378_v37 = vmax.f32 %v346_v19, 0.0  ;;  %v594_v58 = vrot.slane %v2739_v35, 1  ;;  %v595_v16 = vrot.slane %v2741_v36, 1 }
  0x3c   : > { %650 = vrot.lane.b32.xlu0 %v2711_v6, %s2406_s26  ;;  %407 = vst.msk [vmem:[#allocation2 + $0x109] sm:$0xff] %vm235_vm1, %v374_v40  ;;  %4071 = vst [vmem:[#allocation13_spill] sm:$0xff] %v2772_v63  ;;  %v379_v40 = vmax.f32 %v347_v21, 0.0  ;;  %v380_v53 = vmax.f32 %v348_v22, 0.0  ;;  %v381_v54 = vmax.f32 %v349_v27, 0.0  ;;  %v765_v61 = vrot.slane %v2526_v12, 2 }
  0x3d   : > { %408 = vst.msk [vmem:[#allocation2 + $0x111] sm:$0xff] %vm235_vm1, %v375_v51  ;;  %409 = vst.msk [vmem:[#allocation2 + $0x121] sm:$0xff] %vm235_vm1, %v376_v18  ;;  %v587_v51 = vrot.slane %v2780_v9, 1  ;;  %v350_v45 = vadd.f32 %v2515_v2, %v312_v28  ;;  %v2819_v5 = vsel %vm553_vm3, %v589_v46, %v590_v4  ;;  %v351_v12 = vadd.f32 %v2515_v2, %v313_v31  ;;  %v2858_v28 = vld [vmem:[#allocation2 + $0xd0] sm:$0x3] }
  0x3e   : > { %4072 = vst [vmem:[#allocation14_spill] sm:$0xff] %v2796_v42  ;;  %410 = vst.msk [vmem:[#allocation2 + $0x129] sm:$0xff] %vm235_vm1, %v377_v32  ;;  %v2839_v19 = vsel %vm763_vm4, %v764_v41, %v765_v61  ;;  %v592_v22 = vrot.slane %v2821_v7, 1  ;;  %v2856_v27 = vsel %vm553_vm3, %v594_v58, %v595_v16  ;;  %v597_v58 = vrot.slane %v2858_v28, 1 }
  0x3f   : > { %652 = vrot.lane.b32.xlu1 %v2737_v34, %s2406_s26  ;;  %v2799_v52 = vld [vmem:[#allocation2 + $0xd8] sm:$0xff]  ;;  %411 = vst.msk [vmem:[#allocation2 + $0x139] sm:$0xff] %vm235_vm1, %v378_v37  ;;  %412 = vst.msk [vmem:[#allocation2 + $0x141] sm:$0xff] %vm235_vm1, %v379_v40  ;;  %v2850_v21 = vsel %vm553_vm3, %v585_v26, %v587_v51  ;;  %v382_v31 = vmax.f32 %v350_v45, 0.0  ;;  %v383_v41 = vmax.f32 %v351_v12, 0.0  ;;  %v767_v26 = vrot.slane %v2538_v20, 2 }
  0x40   : > { %654 = vrot.lane.b32.xlu0 %v2749_v44, %s2406_s26  ;;  %491 = vst.msk [vmem:[#allocation3 + $0x90] sm:$0xff] %vm235_vm1, %v2799_v52  ;;  %4073 = vst [vmem:[#allocation15_spill] sm:$0xff] %v2819_v5  ;;  %v599_v32 = vrot.slane %v2799_v52, 1  ;;  %v2881_v20 = vsel %vm553_vm3, %v590_v4, %v592_v22 }
  0x41   : > { %v2805_v60 = vld [vmem:[#allocation2 + $0xe0] sm:$0xff]  ;;  %413 = vst.msk [vmem:[#allocation2 + $0x151] sm:$0xff] %vm235_vm1, %v380_v53  ;;  %414 = vst.msk [vmem:[#allocation2 + $0x159] sm:$0xff] %vm235_vm1, %v381_v54  ;;  %v2876_v54 = vsel %vm763_vm4, %v765_v61, %v767_v26  ;;  %v2895_v12 = vld [vmem:[#allocation2 + $0xe8] sm:$0x3] }
  0x42   : > { %v2809_v8 = vld [vmem:[#allocation2 + $0xf0] sm:$0xff]  ;;  %492 = vst.msk [vmem:[#allocation3 + $0x98] sm:$0xff] %vm235_vm1, %v2805_v60  ;;  %v2825_v10 = vld [vmem:[#allocation2 + $0xf8] sm:$0xff]  ;;  %4074 = vst [vmem:[#allocation16_spill] sm:$0xff] %v2850_v21  ;;  %v600_v37 = vrot.slane %v2805_v60, 1  ;;  %v602_v26 = vrot.slane %v2895_v12, 1 }
  0x43   : > { %493 = vst.msk [vmem:[#allocation3 + $0xa0] sm:$0xff] %vm235_vm1, %v2809_v8  ;;  %494 = vst.msk [vmem:[#allocation3 + $0xa8] sm:$0xff] %vm235_vm1, %v2825_v10  ;;  %v2834_v46 = vld [vmem:[#allocation2 + $0x108] sm:$0xff]  ;;  %656 = vrot.lane.b32.xlu1 %v2796_v42, %s2406_s26  ;;  %v604_v4 = vrot.slane %v2809_v8, 1  ;;  %v605_v22 = vrot.slane %v2825_v10, 1 }
  0x44   : > { %658 = vrot.lane.b32.xlu0 %v2772_v63, %s2406_s26  ;;  %v2836_v18 = vld [vmem:[#allocation2 + $0x110] sm:$0xff]  ;;  %495 = vst.msk [vmem:[#allocation3 + $0xb0] sm:$0xff] %vm235_vm1, %v2834_v46  ;;  %4075 = vst [vmem:[#allocation17_spill] sm:$0xff] %v2856_v27  ;;  %v2862_v40 = vld [vmem:[#allocation2 + $0x120] sm:$0xff]  ;;  %v2893_v61 = vsel %vm553_vm3, %v599_v32, %v600_v37  ;;  %v2912_v32 = vsel %vm553_vm3, %v595_v16, %v597_v58  ;;  %v2935_v16 = vsel %vm553_vm3, %v600_v37, %v602_v26 }
  0x45   : > { %496 = vst.msk [vmem:[#allocation3 + $0xb8] sm:$0xff] %vm235_vm1, %v2836_v18  ;;  %497 = vst.msk [vmem:[#allocation3 + $0xc0] sm:$0xff] %vm235_vm1, %v2862_v40  ;;  %v2870_v51 = vld [vmem:[#allocation2 + $0x128] sm:$0xff]  ;;  %v610_v63 = vrot.slane %v2836_v18, 1  ;;  %v2943_v44 = vld [vmem:[#allocation2 + $0x118] sm:$0x3] }
  0x46   : > { %415 = vst.msk [vmem:[#allocation2 + $0x169] sm:$0xff] %vm235_vm1, %v382_v31  ;;  %v2872_v53 = vld [vmem:[#allocation2 + $0x138] sm:$0xff]  ;;  %416 = vst.msk [vmem:[#allocation2 + $0x171] sm:$0xff] %vm235_vm1, %v383_v41  ;;  %v2888_v45 = vld [vmem:[#allocation2 + $0x140] sm:$0xff]  ;;  %v614_v34 = vrot.slane %v2862_v40, 1  ;;  %v612_v26 = vrot.slane %v2943_v44, 1 }
  0x47   : > { %660 = vrot.lane.b32.xlu1 %v2850_v21, %s2406_s26  ;;  %4076 = vst [vmem:[#allocation18_spill] sm:$0xff] %v2881_v20  ;;  %498 = vst.msk [vmem:[#allocation3 + $0xc8] sm:$0xff] %vm235_vm1, %v2870_v51  ;;  %v609_v21 = vrot.slane %v2834_v46, 1  ;;  %v2958_v6 = vld [vmem:[#allocation2 + $0x130] sm:$0x3]  ;;  %v619_v11 = vrot.slane %v2872_v53, 1 }
  0x48   : > { %662 = vrot.lane.b32.xlu0 %v2819_v5, %s2406_s26  ;;  %499 = vst.msk [vmem:[#allocation3 + $0xd0] sm:$0xff] %vm235_vm1, %v2872_v53  ;;  %4077 = vst [vmem:[#allocation19_spill] sm:$0xff] %v2893_v61  ;;  %v2901_v31 = vld [vmem:[#allocation2 + $0x150] sm:$0xff]  ;;  %v2903_v41 = vld [vmem:[#allocation2 + $0x158] sm:$0xff]  ;;  %v620_v47 = vrot.slane %v2888_v45, 1 }
  0x49   : > { %500 = vst.msk [vmem:[#allocation3 + $0xd8] sm:$0xff] %vm235_vm1, %v2888_v45  ;;  %501 = vst.msk [vmem:[#allocation3 + $0xe0] sm:$0xff] %vm235_vm1, %v2901_v31  ;;  %v2920_v5 = vld [vmem:[#allocation2 + $0x100] sm:$0x3] }
  0x4a   : > { %502 = vst.msk [vmem:[#allocation3 + $0xe8] sm:$0xff] %vm235_vm1, %v2903_v41  ;;  %4078 = vst [vmem:[#allocation20_spill] sm:$0xff] %v2912_v32  ;;  %v607_v58 = vrot.slane %v2920_v5, 1  ;;  %v2990_v62 = vld [vmem:[#allocation2 + $0x160] sm:$0x3] }
  0x4b   : > { %664 = vrot.lane.b32.xlu1 %v2881_v20, %s2406_s26  ;;  %4080 = vst [vmem:[#allocation22_spill] sm:$0xff] %v2935_v16 }
  0x4c   : > { %666 = vrot.lane.b32.xlu0 %v2856_v27, %s2406_s26  ;;  %v2918_v27 = vsel %vm553_vm3, %v604_v4, %v605_v22  ;;  %v2941_v4 = vsel %vm553_vm3, %v609_v21, %v610_v63  ;;  %v2950_v37 = vsel %vm553_vm3, %v605_v22, %v607_v58  ;;  %v2965_v22 = vsel %vm553_vm3, %v610_v63, %v612_v26 }
  0x4d   : > { %4079 = vst [vmem:[#allocation21_spill] sm:$0xff] %v2918_v27  ;;  %v2924_v42 = vld [vmem:[#allocation2 + $0x168] sm:$0xff]  ;;  %v2926_v20 = vld [vmem:[#allocation2 + $0x170] sm:$0xff]  ;;  %4081 = vst [vmem:[#allocation23_spill] sm:$0xff] %v2941_v4  ;;  %v617_v58 = vrot.slane %v2958_v6, 1 }
  0x4e   : > { %503 = vst.msk [vmem:[#allocation3 + $0xf0] sm:$0xff] %vm235_vm1, %v2924_v42  ;;  %504 = vst.msk [vmem:[#allocation3 + $0xf8] sm:$0xff] %vm235_vm1, %v2926_v20  ;;  %v630_v43 = vrot.slane %v2926_v20, 1 }
  0x4f   : > { %668 = vrot.lane.b32.xlu1 %v2912_v32, %s2406_s26  ;;  %v615_v32 = vrot.slane %v2870_v51, 1  ;;  %4082 = vst [vmem:[#allocation24_spill] sm:$0xff] %v2950_v37  ;;  %4084 = vst [vmem:[#allocation26_spill] sm:$0xff] %v2965_v22 }
  0x50   : > { %670 = vrot.lane.b32.xlu0 %v2893_v61, %s2406_s26  ;;  %v629_v61 = vrot.slane %v2924_v42, 1 }
  0x51   : > { %v2956_v21 = vsel %vm553_vm3, %v614_v34, %v615_v32  ;;  %v2971_v34 = vsel %vm553_vm3, %v619_v11, %v620_v47  ;;  %v2981_v63 = vsel %vm553_vm3, %v615_v32, %v617_v58  ;;  %v275_v11 = vld [vmem:[%s2510_s23 + $0xf8] sm:$0xff] }
  0x52   : > { %4083 = vst [vmem:[#allocation25_spill] sm:$0xff] %v2956_v21  ;;  %4085 = vst [vmem:[#allocation27_spill] sm:$0xff] %v2971_v34  ;;  %v315_v32 = vmul.f32 %v2503_v1, %v275_v11  ;;  %v3007_v33 = vsel %vm553_vm3, %v629_v61, %v630_v43  ;;  %v769_v61 = vrot.slane %v2592_v13, 2 }
  0x53   : > { %672 = vrot.lane.b32.xlu1 %v2935_v16, %s2406_s26  ;;  %v625_v16 = vrot.slane %v2903_v41, 1  ;;  %4087 = vst [vmem:[#allocation29_spill] sm:$0xff] %v3007_v33 }
  0x54   : > { %674 = vrot.lane.b32.xlu0 %v2918_v27, %s2406_s26  ;;  %v624_v27 = vrot.slane %v2901_v31, 1  ;;  %v353_v38 = vadd.f32 %v2515_v2, %v315_v32  ;;  %v775_v32 = vrot.slane %v2613_v24, 2 }
  0x56   : > { %v385_v11 = vmax.f32 %v353_v38, 0.0 }
  0x57   : > { %676 = vrot.lane.b32.xlu1 %v2950_v37, %s2406_s26  ;;  %v274_v37 = vld [vmem:[%s2510_s23 + $0xf0] sm:$0xff]  ;;  %s3885_s23 = scalar_lea.vmem %s3994_s4, %s2269_s18 }
  0x58   : > { %678 = vrot.lane.b32.xlu0 %v2941_v4, %s2406_s26  ;;  %v2973_v4 = vld [vmem:[#allocation2 + $0x148] sm:$0x3]  ;;  %418 = vst.msk [vmem:[#allocation2 + $0x189] sm:$0xff] %vm235_vm1, %v385_v11  ;;  %v777_v11 = vrot.slane %v2625_v29, 2 }
  0x59   : > { %v622_v26 = vrot.slane %v2973_v4, 1 }
  0x5b   : > { %680 = vrot.lane.b32.xlu1 %v2965_v22, %s2406_s26  ;;  %v314_v22 = vmul.f32 %v2503_v1, %v274_v37  ;;  %v3009_v37 = vld [vmem:[#allocation2 + $0x178] sm:$0x3] }
  0x5c   : > { %682 = vrot.lane.b32.xlu0 %v2956_v21, %s2406_s26  ;;  %v2988_v21 = vsel %vm553_vm3, %v624_v27, %v625_v16  ;;  %v627_v27 = vrot.slane %v2990_v62, 1 }
  0x5d   : > { %4086 = vst [vmem:[#allocation28_spill] sm:$0xff] %v2988_v21  ;;  %v352_v58 = vadd.f32 %v2515_v2, %v314_v22  ;;  %v632_v2 = vrot.slane %v3009_v37, 1  ;;  %v770_v22 = vrot.slane %v2594_v14, 2 }
  0x5f   : > { %684 = vrot.lane.b32.xlu1 %v2981_v63, %s2406_s26  ;;  %v384_v1 = vmax.f32 %v352_v58, 0.0  ;;  %v3026_v38 = vsel %vm553_vm3, %v630_v43, %v632_v2  ;;  %v772_v43 = vrot.slane %v2596_v15, 2  ;;  %v784_v2 = vrot.slane %v2661_v48, 2 }
  0x60   : > { %686 = vrot.lane.b32.xlu0 %v2971_v34, %s2406_s26  ;;  %v3000_v34 = vsel %vm553_vm3, %v620_v47, %v622_v26  ;;  %v3015_v47 = vsel %vm553_vm3, %v625_v16, %v627_v27  ;;  %4089 = vst [vmem:[#allocation31_spill] sm:$0xff] %v3026_v38  ;;  %v3031_v16 = vsel %vm763_vm4, %v769_v61, %v770_v22  ;;  %v774_v26 = vrot.slane %v2611_v23, 2 }
  0x61   : > { %417 = vst.msk [vmem:[#allocation2 + $0x181] sm:$0xff] %vm235_vm1, %v384_v1  ;;  %4088 = vst [vmem:[#allocation30_spill] sm:$0xff] %v3015_v47  ;;  %v780_v27 = vrot.slane %v2627_v30, 2  ;;  %v3048_v1 = vsel %vm763_vm4, %v770_v22, %v772_v43  ;;  %v785_v61 = vrot.slane %v2663_v49, 2  ;;  %v782_v22 = vrot.slane %v2647_v39, 2 }
  0x62   : > { %v3041_v58 = vsel %vm763_vm4, %v774_v26, %v775_v32  ;;  %v789_v26 = vrot.slane %v2677_v55, 2  ;;  %v790_v43 = vrot.slane %v2679_v56, 2 }
  0x63   : > { %688 = vrot.lane.b32.xlu1 %v3000_v34, %s2406_s26  ;;  %v3067_v29 = vsel %vm763_vm4, %v784_v2, %v785_v61  ;;  %v795_v2 = vrot.slane %v2690_v59, 2 }
  0x64   : > { %690 = vrot.lane.b32.xlu0 %v2988_v21, %s2406_s26  ;;  %v3080_v39 = vsel %vm763_vm4, %v789_v26, %v790_v43  ;;  %v800_v26 = vrot.slane %v2706_v3, 2 }
  0x67   : > { %692 = vrot.lane.b32.xlu1 %v3015_v47, %s2406_s26 }
  0x68   : > { %694 = vrot.lane.b32.xlu0 %v3007_v33, %s2406_s26 }
  0x6b   : > { %696 = vrot.lane.b32.xlu1 %v3026_v38, %s2406_s26 }
  0x6c   : > { %844 = vrot.lane.b32.xlu0 %v2839_v19, %s2407_s27  ;;  %v779_v19 = vrot.slane %v2615_v25, 2 }
  0x6e   : > { %v3054_v15 = vsel %vm763_vm4, %v779_v19, %v780_v27  ;;  %v3074_v19 = vsel %vm763_vm4, %v780_v27, %v782_v22  ;;  %v792_v27 = vrot.slane %v2724_v17, 2  ;;  %v799_v22 = vrot.slane %v2704_v0, 2 }
  0x6f   : > { %846 = vrot.lane.b32.xlu1 %v2876_v54, %s2407_s27  ;;  %v3061_v54 = vsel %vm763_vm4, %v775_v32, %v777_v11  ;;  %v787_v32 = vrot.slane %v2665_v50, 2  ;;  %v794_v11 = vrot.slane %v2681_v57, 2 }
  0x70   : > { %848 = vrot.lane.b32.xlu0 %v3031_v16, %s2407_s27  ;;  %v3100_v33 = vsel %vm763_vm4, %v790_v43, %v792_v27  ;;  %v3106_v17 = vsel %vm763_vm4, %v799_v22, %v800_v26  ;;  %v802_v43 = vrot.slane %v2821_v7, 2  ;;  %v809_v27 = vrot.slane %v2799_v52, 2 }
  0x71   : > { %v3087_v38 = vsel %vm763_vm4, %v785_v61, %v787_v32  ;;  %v3093_v50 = vsel %vm763_vm4, %v794_v11, %v795_v2  ;;  %v797_v61 = vrot.slane %v2780_v9, 2  ;;  %4091 = vst [vmem:[#allocation33_spill] sm:$0xff] %v3106_v17  ;;  %v804_v32 = vrot.slane %v2739_v35, 2 }
  0x72   : > { %4090 = vst [vmem:[#allocation32_spill] sm:$0xff] %v3093_v50  ;;  %v805_v11 = vrot.slane %v2741_v36, 2  ;;  %v810_v22 = vrot.slane %v2805_v60, 2 }
  0x73   : > { %850 = vrot.lane.b32.xlu1 %v3048_v1, %s2407_s27  ;;  %v3113_v47 = vsel %vm763_vm4, %v795_v2, %v797_v61  ;;  %v807_v2 = vrot.slane %v2858_v28, 2  ;;  %v814_v61 = vrot.slane %v2809_v8, 2 }
  0x74   : > { %852 = vrot.lane.b32.xlu0 %v3041_v58, %s2407_s27  ;;  %4092 = vst [vmem:[#allocation34_spill] sm:$0xff] %v3113_v47  ;;  %v3119_v9 = vsel %vm763_vm4, %v804_v32, %v805_v11  ;;  %v3132_v7 = vsel %vm763_vm4, %v809_v27, %v810_v22  ;;  %v815_v32 = vrot.slane %v2825_v10, 2  ;;  %v820_v27 = vrot.slane %v2836_v18, 2 }
  0x75   : > { %4093 = vst [vmem:[#allocation35_spill] sm:$0xff] %v3119_v9 }
  0x76   : > { %v3145_v28 = vsel %vm763_vm4, %v814_v61, %v815_v32  ;;  %v825_v61 = vrot.slane %v2870_v51, 2 }
  0x77   : > { %854 = vrot.lane.b32.xlu1 %v3061_v54, %s2407_s27 }
  0x78   : > { %856 = vrot.lane.b32.xlu0 %v3054_v15, %s2407_s27 }
  0x7b   : > { %858 = vrot.lane.b32.xlu1 %v3074_v19, %s2407_s27 }
  0x7c   : > { %860 = vrot.lane.b32.xlu0 %v3067_v29, %s2407_s27 }
  0x7f   : > { %862 = vrot.lane.b32.xlu1 %v3087_v38, %s2407_s27 }
  0x80   : > { %864 = vrot.lane.b32.xlu0 %v3080_v39, %s2407_s27 }
  0x83   : > { %866 = vrot.lane.b32.xlu1 %v3100_v33, %s2407_s27 }
  0x84   : > { %868 = vrot.lane.b32.xlu0 %v3093_v50, %s2407_s27  ;;  %v3126_v50 = vsel %vm763_vm4, %v800_v26, %v802_v43  ;;  %v812_v26 = vrot.slane %v2895_v12, 2  ;;  %v819_v43 = vrot.slane %v2834_v46, 2 }
  0x85   : > { %4094 = vst [vmem:[#allocation36_spill] sm:$0xff] %v3126_v50 }
  0x86   : > { %v3158_v12 = vsel %vm763_vm4, %v819_v43, %v820_v27  ;;  %v830_v43 = vrot.slane %v2888_v45, 2 }
  0x87   : > { %870 = vrot.lane.b32.xlu1 %v3113_v47, %s2407_s27  ;;  %v835_v47 = vrot.slane %v2903_v41, 2 }
  0x88   : > { %872 = vrot.lane.b32.xlu0 %v3106_v17, %s2407_s27  ;;  %v3139_v17 = vsel %vm763_vm4, %v805_v11, %v807_v2  ;;  %v817_v11 = vrot.slane %v2920_v5, 2  ;;  %v824_v2 = vrot.slane %v2862_v40, 2 }
  0x89   : > { %4095 = vst [vmem:[#allocation37_spill] sm:$0xff] %v3139_v17 }
  0x8a   : > { %v3171_v5 = vsel %vm763_vm4, %v824_v2, %v825_v61  ;;  %v834_v2 = vrot.slane %v2901_v31, 2 }
  0x8b   : > { %874 = vrot.lane.b32.xlu1 %v3126_v50, %s2407_s27 }
  0x8c   : > { %876 = vrot.lane.b32.xlu0 %v3119_v9, %s2407_s27  ;;  %v3152_v9 = vsel %vm763_vm4, %v810_v22, %v812_v26  ;;  %v822_v22 = vrot.slane %v2943_v44, 2  ;;  %v829_v26 = vrot.slane %v2872_v53, 2  ;;  %v827_v44 = vrot.slane %v2958_v6, 2 }
  0x8d   : > { %v832_v6 = vrot.slane %v2973_v4, 2 }
  0x8f   : > { %878 = vrot.lane.b32.xlu1 %v3139_v17, %s2407_s27  ;;  %v3165_v17 = vsel %vm763_vm4, %v815_v32, %v817_v11  ;;  %v3179_v32 = vsel %vm763_vm4, %v820_v27, %v822_v22  ;;  %v3185_v11 = vsel %vm763_vm4, %v829_v26, %v830_v43  ;;  %v3199_v27 = vsel %vm763_vm4, %v834_v2, %v835_v47 }
  0x90   : > { %880 = vrot.lane.b32.xlu0 %v3132_v7, %s2407_s27  ;;  %v839_v22 = vrot.slane %v2924_v42, 2  ;;  %v840_v26 = vrot.slane %v2926_v20, 2 }
  0x92   : > { %v3212_v4 = vsel %vm763_vm4, %v839_v22, %v840_v26 }
  0x93   : > { %882 = vrot.lane.b32.xlu1 %v3152_v9, %s2407_s27 }
  0x94   : > { %884 = vrot.lane.b32.xlu0 %v3145_v28, %s2407_s27 }
  0x97   : > { %886 = vrot.lane.b32.xlu1 %v3165_v17, %s2407_s27 }
  0x98   : > { %888 = vrot.lane.b32.xlu0 %v3158_v12, %s2407_s27 }
  0x9b   : > { %890 = vrot.lane.b32.xlu1 %v3179_v32, %s2407_s27 }
  0x9c   : > { %892 = vrot.lane.b32.xlu0 %v3171_v5, %s2407_s27 }
  0x9e   : > { %v635_v50 = vpop.permute.xlu0 %634 }
  0x9f   : > { %731 = vst.msk [vmem:[#allocation3] sm:$0xff] %vm730_vm5, %v635_v50  ;;  %v3193_v50 = vsel %vm763_vm4, %v825_v61, %v827_v44  ;;  %v837_v61 = vrot.slane %v2990_v62, 2  ;;  %v842_v62 = vrot.slane %v3009_v37, 2 }
  0xa0   : > { %896 = vrot.lane.b32.xlu0 %v3185_v11, %s2407_s27  ;;  %894 = vrot.lane.b32.xlu1 %v3193_v50, %s2407_s27 }
  0xa1   : > { %v639_v44 = vpop.permute.xlu1 %638 }
  0xa2   : > { %v637_v21 = vpop.permute.xlu0 %636  ;;  %733 = vst.msk [vmem:[#allocation3 + $0x10] sm:$0xff] %vm730_vm5, %v639_v44  ;;  %v3229_v44 = vsel %vm763_vm4, %v840_v26, %v842_v62 }
  0xa3   : > { %732 = vst.msk [vmem:[#allocation3 + $0x8] sm:$0xff] %vm730_vm5, %v637_v21  ;;  %v3206_v21 = vsel %vm763_vm4, %v830_v43, %v832_v6  ;;  %v3219_v43 = vsel %vm763_vm4, %v835_v47, %v837_v61 }
  0xa4   : > { %900 = vrot.lane.b32.xlu0 %v3199_v27, %s2407_s27  ;;  %898 = vrot.lane.b32.xlu1 %v3206_v21, %s2407_s27 }
  0xa5   : > { %v641_v6 = vpop.permute.xlu1 %640 }
  0xa6   : > { %v643_v2 = vpop.permute.xlu0 %642  ;;  %734 = vst.msk [vmem:[#allocation3 + $0x18] sm:$0xff] %vm730_vm5, %v641_v6 }
  0xa7   : > { %735 = vst.msk [vmem:[#allocation3 + $0x20] sm:$0xff] %vm730_vm5, %v643_v2 }
  0xa8   : > { %904 = vrot.lane.b32.xlu0 %v3212_v4, %s2407_s27  ;;  %902 = vrot.lane.b32.xlu1 %v3219_v43, %s2407_s27 }
  0xa9   : > { %v645_v47 = vpop.permute.xlu1 %644 }
  0xaa   : > { %v647_v22 = vpop.permute.xlu0 %646  ;;  %736 = vst.msk [vmem:[#allocation3 + $0x28] sm:$0xff] %vm730_vm5, %v645_v47 }
  0xab   : > { %737 = vst.msk [vmem:[#allocation3 + $0x30] sm:$0xff] %vm730_vm5, %v647_v22 }
  0xac   : > { %975 = vrot.lane.b32.xlu0 %v2592_v13, %s2408_s28  ;;  %906 = vrot.lane.b32.xlu1 %v3229_v44, %s2407_s27 }
  0xad   : > { %v649_v61 = vpop.permute.xlu1 %648 }
  0xae   : > { %v651_v37 = vpop.permute.xlu0 %650  ;;  %738 = vst.msk [vmem:[#allocation3 + $0x38] sm:$0xff] %vm730_vm5, %v649_v61 }
  0xaf   : > { %739 = vst.msk [vmem:[#allocation3 + $0x40] sm:$0xff] %vm730_vm5, %v651_v37 }
  0xb0   : > { %979 = vrot.lane.b32.xlu0 %v2611_v23, %s2408_s28  ;;  %977 = vrot.lane.b32.xlu1 %v2594_v14, %s2408_s28 }
  0xb1   : > { %v653_v13 = vpop.permute.xlu1 %652 }
  0xb2   : > { %v655_v26 = vpop.permute.xlu0 %654  ;;  %740 = vst.msk [vmem:[#allocation3 + $0x48] sm:$0xff] %vm730_vm5, %v653_v13 }
  0xb3   : > { %741 = vst.msk [vmem:[#allocation3 + $0x50] sm:$0xff] %vm730_vm5, %v655_v26 }
  0xb4   : > { %983 = vrot.lane.b32.xlu0 %v2615_v25, %s2408_s28  ;;  %981 = vrot.lane.b32.xlu1 %v2613_v24, %s2408_s28 }
  0xb5   : > { %v657_v62 = vpop.permute.xlu1 %656 }
  0xb6   : > { %v659_v2 = vpop.permute.xlu0 %658  ;;  %742 = vst.msk [vmem:[#allocation3 + $0x58] sm:$0xff] %vm730_vm5, %v657_v62 }
  0xb7   : > { %743 = vst.msk [vmem:[#allocation3 + $0x60] sm:$0xff] %vm730_vm5, %v659_v2 }
  0xb8   : > { %987 = vrot.lane.b32.xlu0 %v2661_v48, %s2408_s28  ;;  %985 = vrot.lane.b32.xlu1 %v2627_v30, %s2408_s28 }
  0xb9   : > { %v661_v6 = vpop.permute.xlu1 %660 }
  0xba   : > { %v663_v14 = vpop.permute.xlu0 %662  ;;  %744 = vst.msk [vmem:[#allocation3 + $0x68] sm:$0xff] %vm730_vm5, %v661_v6 }
  0xbb   : > { %745 = vst.msk [vmem:[#allocation3 + $0x70] sm:$0xff] %vm730_vm5, %v663_v14 }
  0xbc   : > { %991 = vrot.lane.b32.xlu0 %v2677_v55, %s2408_s28  ;;  %989 = vrot.lane.b32.xlu1 %v2663_v49, %s2408_s28 }
  0xbd   : > { %v665_v47 = vpop.permute.xlu1 %664 }
  0xbe   : > { %v667_v22 = vpop.permute.xlu0 %666  ;;  %746 = vst.msk [vmem:[#allocation3 + $0x78] sm:$0xff] %vm730_vm5, %v665_v47 }
  0xbf   : > { %747 = vst.msk [vmem:[#allocation3 + $0x80] sm:$0xff] %vm730_vm5, %v667_v22 }
  0xc0   : > { %995 = vrot.lane.b32.xlu0 %v2681_v57, %s2408_s28  ;;  %993 = vrot.lane.b32.xlu1 %v2679_v56, %s2408_s28 }
  0xc1   : > { %v669_v61 = vpop.permute.xlu1 %668 }
  0xc2   : > { %v671_v37 = vpop.permute.xlu0 %670  ;;  %748 = vst.msk [vmem:[#allocation3 + $0x88] sm:$0xff] %vm730_vm5, %v669_v61 }
  0xc3   : > { %749 = vst.msk [vmem:[#allocation3 + $0x90] sm:$0xff] %vm730_vm5, %v671_v37 }
  0xc4   : > { %999 = vrot.lane.b32.xlu0 %v2704_v0, %s2408_s28  ;;  %997 = vrot.lane.b32.xlu1 %v2690_v59, %s2408_s28 }
  0xc5   : > { %v673_v13 = vpop.permute.xlu1 %672 }
  0xc6   : > { %v675_v26 = vpop.permute.xlu0 %674  ;;  %750 = vst.msk [vmem:[#allocation3 + $0x98] sm:$0xff] %vm730_vm5, %v673_v13 }
  0xc7   : > { %751 = vst.msk [vmem:[#allocation3 + $0xa0] sm:$0xff] %vm730_vm5, %v675_v26 }
  0xc8   : > { %1003 = vrot.lane.b32.xlu0 %v2739_v35, %s2408_s28  ;;  %1001 = vrot.lane.b32.xlu1 %v2706_v3, %s2408_s28 }
  0xc9   : > { %v677_v62 = vpop.permute.xlu1 %676 }
  0xca   : > { %v679_v2 = vpop.permute.xlu0 %678  ;;  %752 = vst.msk [vmem:[#allocation3 + $0xa8] sm:$0xff] %vm730_vm5, %v677_v62 }
  0xcb   : > { %753 = vst.msk [vmem:[#allocation3 + $0xb0] sm:$0xff] %vm730_vm5, %v679_v2 }
  0xcc   : > { %1007 = vrot.lane.b32.xlu0 %v2799_v52, %s2408_s28  ;;  %1005 = vrot.lane.b32.xlu1 %v2741_v36, %s2408_s28 }
  0xcd   : > { %v681_v6 = vpop.permute.xlu1 %680 }
  0xce   : > { %v683_v14 = vpop.permute.xlu0 %682  ;;  %754 = vst.msk [vmem:[#allocation3 + $0xb8] sm:$0xff] %vm730_vm5, %v681_v6 }
  0xcf   : > { %755 = vst.msk [vmem:[#allocation3 + $0xc0] sm:$0xff] %vm730_vm5, %v683_v14 }
  0xd0   : > { %1011 = vrot.lane.b32.xlu0 %v2809_v8, %s2408_s28  ;;  %1009 = vrot.lane.b32.xlu1 %v2805_v60, %s2408_s28 }
  0xd1   : > { %v685_v47 = vpop.permute.xlu1 %684 }
  0xd2   : > { %v687_v22 = vpop.permute.xlu0 %686  ;;  %756 = vst.msk [vmem:[#allocation3 + $0xc8] sm:$0xff] %vm730_vm5, %v685_v47 }
  0xd3   : > { %757 = vst.msk [vmem:[#allocation3 + $0xd0] sm:$0xff] %vm730_vm5, %v687_v22  ;;  %v3317_v22 = vld [vmem:[#allocation2 + $0x180] sm:$0xff] }
  0xd4   : > { %1015 = vrot.lane.b32.xlu0 %v2834_v46, %s2408_s28  ;;  %1013 = vrot.lane.b32.xlu1 %v2825_v10, %s2408_s28 }
  0xd5   : > { %v689_v61 = vpop.permute.xlu1 %688 }
  0xd6   : > { %v691_v37 = vpop.permute.xlu0 %690  ;;  %758 = vst.msk [vmem:[#allocation3 + $0xd8] sm:$0xff] %vm730_vm5, %v689_v61 }
  0xd7   : > { %759 = vst.msk [vmem:[#allocation3 + $0xe0] sm:$0xff] %vm730_vm5, %v691_v37 }
  0xd8   : > { %1019 = vrot.lane.b32.xlu0 %v2862_v40, %s2408_s28  ;;  %1017 = vrot.lane.b32.xlu1 %v2836_v18, %s2408_s28 }
  0xd9   : > { %v693_v13 = vpop.permute.xlu1 %692 }
  0xda   : > { %v695_v26 = vpop.permute.xlu0 %694  ;;  %760 = vst.msk [vmem:[#allocation3 + $0xe8] sm:$0xff] %vm730_vm5, %v693_v13  ;;  %v4096_v13 = vld [vmem:[#allocation4_spill] sm:$0xff] }
  0xdb   : > { %761 = vst.msk [vmem:[#allocation3 + $0xf0] sm:$0xff] %vm730_vm5, %v695_v26  ;;  %v3329_v26 = vld [vmem:[#allocation2 + $0x188] sm:$0xff] }
  0xdc   : > { %1023 = vrot.lane.b32.xlu0 %v2872_v53, %s2408_s28  ;;  %1021 = vrot.lane.b32.xlu1 %v2870_v51, %s2408_s28 }
  0xdd   : > { %v697_v62 = vpop.permute.xlu1 %696 }
  0xde   : > { %v845_v2 = vpop.permute.xlu0 %844  ;;  %762 = vst.msk [vmem:[#allocation3 + $0xf8] sm:$0xff] %vm730_vm5, %v697_v62 }
  0xdf   : > { %941 = vst.msk [vmem:[#allocation3] sm:$0xff] %vm940_vm6, %v845_v2 }
  0xe0   : > { %1027 = vrot.lane.b32.xlu0 %v2901_v31, %s2408_s28  ;;  %1025 = vrot.lane.b32.xlu1 %v2888_v45, %s2408_s28 }
  0xe1   : > { %v847_v6 = vpop.permute.xlu1 %846 }
  0xe2   : > { %v849_v14 = vpop.permute.xlu0 %848  ;;  %942 = vst.msk [vmem:[#allocation3 + $0x8] sm:$0xff] %vm940_vm6, %v847_v6 }
  0xe3   : > { %943 = vst.msk [vmem:[#allocation3 + $0x10] sm:$0xff] %vm940_vm6, %v849_v14  ;;  %v4097_v14 = vld [vmem:[#allocation5_spill] sm:$0xff] }
  0xe4   : > { %1031 = vrot.lane.b32.xlu0 %v2924_v42, %s2408_s28  ;;  %1029 = vrot.lane.b32.xlu1 %v2903_v41, %s2408_s28 }
  0xe5   : > { %v851_v37 = vpop.permute.xlu1 %850 }
  0xe6   : > { %v853_v47 = vpop.permute.xlu0 %852  ;;  %944 = vst.msk [vmem:[#allocation3 + $0x18] sm:$0xff] %vm940_vm6, %v851_v37  ;;  %v4098_v37 = vld [vmem:[#allocation6_spill] sm:$0xff] }
  0xe7   : > { %945 = vst.msk [vmem:[#allocation3 + $0x20] sm:$0xff] %vm940_vm6, %v853_v47 }
  0xe8   : > { %1035 = vrot.lane.b32.xlu0 %v3317_v22, %s2408_s28  ;;  %1033 = vrot.lane.b32.xlu1 %v2926_v20, %s2408_s28 }
  0xe9   : > { %v855_v2 = vpop.permute.xlu1 %854 }
  0xea   : > { %v857_v61 = vpop.permute.xlu0 %856  ;;  %946 = vst.msk [vmem:[#allocation3 + $0x28] sm:$0xff] %vm940_vm6, %v855_v2 }
  0xeb   : > { %947 = vst.msk [vmem:[#allocation3 + $0x30] sm:$0xff] %vm940_vm6, %v857_v61  ;;  %v4099_v61 = vld [vmem:[#allocation19_spill] sm:$0xff] }
  0xec   : > { %1110 = vrot.lane.b32.xlu0 %v4096_v13, %s2409_s29  ;;  %1037 = vrot.lane.b32.xlu1 %v3329_v26, %s2408_s28 }
  0xed   : > { %v859_v6 = vpop.permute.xlu1 %858 }
  0xee   : > { %v861_v62 = vpop.permute.xlu0 %860  ;;  %948 = vst.msk [vmem:[#allocation3 + $0x38] sm:$0xff] %vm940_vm6, %v859_v6 }
  0xef   : > { %949 = vst.msk [vmem:[#allocation3 + $0x40] sm:$0xff] %vm940_vm6, %v861_v62  ;;  %v4100_v62 = vld [vmem:[#allocation8_spill] sm:$0xff] }
  0xf0   : > { %1114 = vrot.lane.b32.xlu0 %v4097_v14, %s2409_s29  ;;  %1112 = vrot.lane.b32.xlu1 %v4098_v37, %s2409_s29  ;;  %v4101_v37 = vld [vmem:[#allocation22_spill] sm:$0xff] }
  0xf1   : > { %v863_v13 = vpop.permute.xlu1 %862 }
  0xf2   : > { %v865_v47 = vpop.permute.xlu0 %864  ;;  %950 = vst.msk [vmem:[#allocation3 + $0x48] sm:$0xff] %vm940_vm6, %v863_v13 }
  0xf3   : > { %951 = vst.msk [vmem:[#allocation3 + $0x50] sm:$0xff] %vm940_vm6, %v865_v47 }
  0xf4   : > { %1142 = vrot.lane.b32.xlu0 %v4099_v61, %s2409_s29  ;;  %1116 = vrot.lane.b32.xlu1 %v4100_v62, %s2409_s29 }
  0xf5   : > { %v867_v6 = vpop.permute.xlu1 %866 }
  0xf6   : > { %v869_v2 = vpop.permute.xlu0 %868  ;;  %952 = vst.msk [vmem:[#allocation3 + $0x58] sm:$0xff] %vm940_vm6, %v867_v6 }
  0xf7   : > { %953 = vst.msk [vmem:[#allocation3 + $0x60] sm:$0xff] %vm940_vm6, %v869_v2 }
  0xf8   : > { %1244 = vrot.lane.b32.xlu0 %v3031_v16, %s2410_s30  ;;  %1144 = vrot.lane.b32.xlu1 %v4101_v37, %s2409_s29 }
  0xf9   : > { %v871_v13 = vpop.permute.xlu1 %870 }
  0xfa   : > { %v873_v47 = vpop.permute.xlu0 %872  ;;  %954 = vst.msk [vmem:[#allocation3 + $0x68] sm:$0xff] %vm940_vm6, %v871_v13 }
  0xfb   : > { %955 = vst.msk [vmem:[#allocation3 + $0x70] sm:$0xff] %vm940_vm6, %v873_v47 }
  0xfc   : > { %1246 = vrot.lane.b32.xlu0 %v3048_v1, %s2410_s30  ;;  %1276 = vrot.lane.b32.xlu1 %v3132_v7, %s2410_s30 }
  0xfd   : > { %v875_v16 = vpop.permute.xlu1 %874 }
  0xfe   : > { %v877_v2 = vpop.permute.xlu0 %876  ;;  %956 = vst.msk [vmem:[#allocation3 + $0x78] sm:$0xff] %vm940_vm6, %v875_v16  ;;  %v1806_v16 = vld [vmem:[%s3993_s3 + $0x8] sm:$0xff] }
  0xff   : > { %957 = vst.msk [vmem:[#allocation3 + $0x80] sm:$0xff] %vm940_vm6, %v877_v2 }
 0x100   : > { %1375 = vrot.lane.b32.xlu0 %v2611_v23, %s2411_s5  ;;  %1278 = vrot.lane.b32.xlu1 %v3152_v9, %s2410_s30 }
 0x101   : > { %v879_v1 = vpop.permute.xlu1 %878 }
 0x102   : > { %v881_v6 = vpop.permute.xlu0 %880  ;;  %958 = vst.msk [vmem:[#allocation3 + $0x88] sm:$0xff] %vm940_vm6, %v879_v1 }
 0x103   : > { %959 = vst.msk [vmem:[#allocation3 + $0x90] sm:$0xff] %vm940_vm6, %v881_v6 }
 0x104   : > { %1377 = vrot.lane.b32.xlu0 %v2613_v24, %s2411_s5  ;;  %1407 = vrot.lane.b32.xlu1 %v2809_v8, %s2411_s5  ;;  %v4102_v24 = vld [vmem:[#allocation21_spill] sm:$0xff] }
 0x105   : > { %v883_v23 = vpop.permute.xlu1 %882 }
 0x106   : > { %v885_v47 = vpop.permute.xlu0 %884  ;;  %960 = vst.msk [vmem:[#allocation3 + $0x98] sm:$0xff] %vm940_vm6, %v883_v23  ;;  %v1807_v23 = vld [vmem:[%s3993_s3 + $0x10] sm:$0xff] }
 0x107   : > { %961 = vst.msk [vmem:[#allocation3 + $0xa0] sm:$0xff] %vm940_vm6, %v885_v47 }
 0x108   : > { %1510 = vrot.lane.b32.xlu0 %v4097_v14, %s2412_s6  ;;  %1409 = vrot.lane.b32.xlu1 %v2825_v10, %s2411_s5  ;;  %v4103_v14 = vld [vmem:[#allocation24_spill] sm:$0xff]  ;;  %v1805_v10 = vld [vmem:[%s3993_s3] sm:$0xff] }
 0x109   : > { %v887_v2 = vpop.permute.xlu1 %886  ;;  %v2366_v1 = vpack.c.bf16 %v1806_v16, %v1805_v10  ;;  %v1809_v16 = vld [vmem:[%s3993_s3 + $0x20] sm:$0xf] }
 0x10a   : > { %v889_v13 = vpop.permute.xlu0 %888  ;;  %962 = vst.msk [vmem:[#allocation3 + $0xa8] sm:$0xff] %vm940_vm6, %v887_v2 }
 0x10b   : > { %963 = vst.msk [vmem:[#allocation3 + $0xb0] sm:$0xff] %vm940_vm6, %v889_v13  ;;  %2367 = vmatprep.subr.bf16.mxu0 %v2366_v1  ;;  %2374 = vmatprep.subr.bf16.mxu1 %v2366_v1  ;;  %v1808_v13 = vld [vmem:[%s3993_s3 + $0x18] sm:$0xff] }
 0x10c   : > { %1146 = vrot.lane.b32.xlu0 %v4102_v24, %s2409_s29  ;;  %1542 = vrot.lane.b32.xlu1 %v4102_v24, %s2412_s6 }
 0x10d   : > { %v891_v6 = vpop.permute.xlu1 %890  ;;  %2369 = vmatpush3.bf16.msra.mxu0 %v2366_v1  ;;  %2377 = vmatpush3.bf16.msra.mxu1 %v2366_v1 }
 0x10e   : > { %v893_v8 = vpop.permute.xlu0 %892  ;;  %964 = vst.msk [vmem:[#allocation3 + $0xb8] sm:$0xff] %vm940_vm6, %v891_v6 }
 0x10f   : > { %965 = vst.msk [vmem:[#allocation3 + $0xc0] sm:$0xff] %vm940_vm6, %v893_v8 }
 0x110   : > { %1544 = vrot.lane.b32.xlu0 %v4103_v14, %s2412_s6  ;;  %1512 = vrot.lane.b32.xlu1 %v4100_v62, %s2412_s6  ;;  %v2370_v62 = vpack.c.bf16 %v1808_v13, %v1807_v23 }
 0x112   : > { %v897_v47 = vpop.permute.xlu0 %896  ;;  %v895_v24 = vpop.permute.xlu1 %894  ;;  %2371 = vmatprep.subr.bf16.mxu0 %v2370_v62  ;;  %2375 = vmatprep.subr.bf16.mxu1 %v2370_v62 }
 0x113   : > { %967 = vst.msk [vmem:[#allocation3 + $0xd0] sm:$0xff] %vm940_vm6, %v897_v47  ;;  %966 = vst.msk [vmem:[#allocation3 + $0xc8] sm:$0xff] %vm940_vm6, %v895_v24  ;;  %2373 = vmatpush3.bf16.msra.mxu0 %v2370_v62  ;;  %2378 = vmatpush3.bf16.msra.mxu1 %v2370_v62  ;;  %v4105_v24 = vld [vmem:[#allocation23_spill] sm:$0xff]  ;;  %v4106_v62 = vld [vmem:[#allocation10_spill] sm:$0xff] }
 0x114   : > { %1676 = vrot.lane.b32.xlu0 %v3145_v28, %s2413_s11  ;;  %1644 = vrot.lane.b32.xlu1 %v3041_v58, %s2413_s11 }
 0x115   : > { %2316 = vmatprep.subr.msk.mxu0 %vm1907_vm7, %v1809_v16  ;;  %2376 = vmatprep.subr.msk.mxu1 %vm1907_vm7, %v1809_v16 }
 0x116   : > { %v901_v2 = vpop.permute.xlu0 %900  ;;  %v899_v8 = vpop.permute.xlu1 %898 }
 0x117   : > { %969 = vst.msk [vmem:[#allocation3 + $0xe0] sm:$0xff] %vm940_vm6, %v901_v2  ;;  %968 = vst.msk [vmem:[#allocation3 + $0xd8] sm:$0xff] %vm940_vm6, %v899_v8  ;;  %2317 = vmatpush3.msk.msra.mxu0 %vm1907_vm7, %v1809_v16  ;;  %2379 = vmatpush3.msk.msra.mxu1 %vm1907_vm7, %v1809_v16  ;;  %v4107_v16 = vld [vmem:[#allocation26_spill] sm:$0xff] }
 0x118   : > { %1248 = vrot.lane.b32.xlu0 %v3041_v58, %s2410_s30  ;;  %1148 = vrot.lane.b32.xlu1 %v4103_v14, %s2409_s29 }
 0x11a   : > { %v905_v10 = vpop.permute.xlu0 %904  ;;  %v903_v58 = vpop.permute.xlu1 %902 }
 0x11b   : > { %971 = vst.msk [vmem:[#allocation3 + $0xf0] sm:$0xff] %vm940_vm6, %v905_v10  ;;  %970 = vst.msk [vmem:[#allocation3 + $0xe8] sm:$0xff] %vm940_vm6, %v903_v58 }
 0x11c   : > { %1646 = vrot.lane.b32.xlu0 %v3061_v54, %s2413_s11  ;;  %1280 = vrot.lane.b32.xlu1 %v3145_v28, %s2410_s30 }
 0x11e   : > { %v976_v6 = vpop.permute.xlu0 %975  ;;  %v907_v14 = vpop.permute.xlu1 %906 }
 0x11f   : > { %1072 = vst.msk [vmem:[#allocation3] sm:$0xff] %vm1071_vm8, %v976_v6 }
 0x120   : > { %1250 = vrot.lane.b32.xlu0 %v3061_v54, %s2410_s30  ;;  %972 = vst.msk [vmem:[#allocation3 + $0xf8] sm:$0xff] %vm940_vm6, %v907_v14  ;;  %1678 = vrot.lane.b32.xlu1 %v3165_v17, %s2413_s11 }
 0x122   : > { %v980_v1 = vpop.permute.xlu0 %979  ;;  %v978_v47 = vpop.permute.xlu1 %977 }
 0x123   : > { %1074 = vst.msk [vmem:[#allocation3 + $0x10] sm:$0xff] %vm1071_vm8, %v980_v1  ;;  %1073 = vst.msk [vmem:[#allocation3 + $0x8] sm:$0xff] %vm1071_vm8, %v978_v47 }
 0x124   : > { %1379 = vrot.lane.b32.xlu0 %v2615_v25, %s2411_s5  ;;  %1282 = vrot.lane.b32.xlu1 %v3165_v17, %s2410_s30  ;;  %v4104_v25 = vld [vmem:[#allocation7_spill] sm:$0xff] }
 0x126   : > { %v984_v28 = vpop.permute.xlu0 %983  ;;  %v982_v54 = vpop.permute.xlu1 %981 }
 0x127   : > { %1076 = vst.msk [vmem:[#allocation3 + $0x20] sm:$0xff] %vm1071_vm8, %v984_v28  ;;  %1075 = vst.msk [vmem:[#allocation3 + $0x18] sm:$0xff] %vm1071_vm8, %v982_v54 }
 0x128   : > { %1381 = vrot.lane.b32.xlu0 %v2627_v30, %s2411_s5  ;;  %1411 = vrot.lane.b32.xlu1 %v2834_v46, %s2411_s5 }
 0x12a   : > { %v988_v23 = vpop.permute.xlu0 %987  ;;  %v986_v13 = vpop.permute.xlu1 %985 }
 0x12b   : > { %1078 = vst.msk [vmem:[#allocation3 + $0x30] sm:$0xff] %vm1071_vm8, %v988_v23  ;;  %1077 = vst.msk [vmem:[#allocation3 + $0x28] sm:$0xff] %vm1071_vm8, %v986_v13 }
 0x12c   : > { %1514 = vrot.lane.b32.xlu0 %v4104_v25, %s2412_s6  ;;  %1413 = vrot.lane.b32.xlu1 %v2836_v18, %s2411_s5 }
 0x12e   : > { %v992_v17 = vpop.permute.xlu0 %991  ;;  %v990_v30 = vpop.permute.xlu1 %989 }
 0x12f   : > { %1080 = vst.msk [vmem:[#allocation3 + $0x40] sm:$0xff] %vm1071_vm8, %v992_v17  ;;  %1079 = vst.msk [vmem:[#allocation3 + $0x38] sm:$0xff] %vm1071_vm8, %v990_v30  ;;  %v4109_v17 = vld [vmem:[#allocation25_spill] sm:$0xff]  ;;  %v4110_v30 = vld [vmem:[#allocation11_spill] sm:$0xff] }
 0x130   : > { %1118 = vrot.lane.b32.xlu0 %v4104_v25, %s2409_s29  ;;  %1546 = vrot.lane.b32.xlu1 %v4105_v24, %s2412_s6 }
 0x132   : > { %v996_v46 = vpop.permute.xlu0 %995  ;;  %v994_v2 = vpop.permute.xlu1 %993 }
 0x133   : > { %1082 = vst.msk [vmem:[#allocation3 + $0x50] sm:$0xff] %vm1071_vm8, %v996_v46  ;;  %1081 = vst.msk [vmem:[#allocation3 + $0x48] sm:$0xff] %vm1071_vm8, %v994_v2 }
 0x134   : > { %1516 = vrot.lane.b32.xlu0 %v4106_v62, %s2412_s6  ;;  %1150 = vrot.lane.b32.xlu1 %v4105_v24, %s2409_s29 }
 0x136   : > { %v1000_v18 = vpop.permute.xlu0 %999  ;;  %v998_v8 = vpop.permute.xlu1 %997 }
 0x137   : > { %1084 = vst.msk [vmem:[#allocation3 + $0x60] sm:$0xff] %vm1071_vm8, %v1000_v18  ;;  %1083 = vst.msk [vmem:[#allocation3 + $0x58] sm:$0xff] %vm1071_vm8, %v998_v8 }
 0x138   : > { %1648 = vrot.lane.b32.xlu0 %v3054_v15, %s2413_s11  ;;  %1548 = vrot.lane.b32.xlu1 %v4107_v16, %s2412_s6 }
 0x13a   : > { %v1004_v10 = vpop.permute.xlu0 %1003  ;;  %v1002_v58 = vpop.permute.xlu1 %1001 }
 0x13b   : > { %1086 = vst.msk [vmem:[#allocation3 + $0x70] sm:$0xff] %vm1071_vm8, %v1004_v10  ;;  %1085 = vst.msk [vmem:[#allocation3 + $0x68] sm:$0xff] %vm1071_vm8, %v1002_v58 }
 0x13c   : > { %1120 = vrot.lane.b32.xlu0 %v4106_v62, %s2409_s29  ;;  %1680 = vrot.lane.b32.xlu1 %v3158_v12, %s2413_s11 }
 0x13e   : > { %v1008_v6 = vpop.permute.xlu0 %1007  ;;  %v1006_v14 = vpop.permute.xlu1 %1005 }
 0x13f   : > { %1088 = vst.msk [vmem:[#allocation3 + $0x80] sm:$0xff] %vm1071_vm8, %v1008_v6  ;;  %1087 = vst.msk [vmem:[#allocation3 + $0x78] sm:$0xff] %vm1071_vm8, %v1006_v14 }
 0x140   : > { %1252 = vrot.lane.b32.xlu0 %v3054_v15, %s2410_s30  ;;  %1152 = vrot.lane.b32.xlu1 %v4107_v16, %s2409_s29 }
 0x142   : > { %v1012_v1 = vpop.permute.xlu0 %1011  ;;  %v1010_v47 = vpop.permute.xlu1 %1009 }
 0x143   : > { %1090 = vst.msk [vmem:[#allocation3 + $0x90] sm:$0xff] %vm1071_vm8, %v1012_v1  ;;  %1089 = vst.msk [vmem:[#allocation3 + $0x88] sm:$0xff] %vm1071_vm8, %v1010_v47  ;;  %v4112_v47 = vld [vmem:[#allocation27_spill] sm:$0xff] }
 0x144   : > { %1650 = vrot.lane.b32.xlu0 %v3074_v19, %s2413_s11  ;;  %1284 = vrot.lane.b32.xlu1 %v3158_v12, %s2410_s30 }
 0x146   : > { %v1016_v28 = vpop.permute.xlu0 %1015  ;;  %v1014_v15 = vpop.permute.xlu1 %1013 }
 0x147   : > { %1092 = vst.msk [vmem:[#allocation3 + $0xa0] sm:$0xff] %vm1071_vm8, %v1016_v28  ;;  %1091 = vst.msk [vmem:[#allocation3 + $0x98] sm:$0xff] %vm1071_vm8, %v1014_v15  ;;  %v4113_v28 = vld [vmem:[#allocation14_spill] sm:$0xff] }
 0x148   : > { %1254 = vrot.lane.b32.xlu0 %v3074_v19, %s2410_s30  ;;  %1682 = vrot.lane.b32.xlu1 %v3179_v32, %s2413_s11 }
 0x14a   : > { %v1020_v54 = vpop.permute.xlu0 %1019  ;;  %v1018_v23 = vpop.permute.xlu1 %1017 }
 0x14b   : > { %1094 = vst.msk [vmem:[#allocation3 + $0xb0] sm:$0xff] %vm1071_vm8, %v1020_v54  ;;  %1093 = vst.msk [vmem:[#allocation3 + $0xa8] sm:$0xff] %vm1071_vm8, %v1018_v23 }
 0x14c   : > { %1383 = vrot.lane.b32.xlu0 %v2661_v48, %s2411_s5  ;;  %1286 = vrot.lane.b32.xlu1 %v3179_v32, %s2410_s30  ;;  %v4108_v48 = vld [vmem:[#allocation9_spill] sm:$0xff] }
 0x14e   : > { %v1024_v12 = vpop.permute.xlu0 %1023  ;;  %v1022_v19 = vpop.permute.xlu1 %1021 }
 0x14f   : > { %1096 = vst.msk [vmem:[#allocation3 + $0xc0] sm:$0xff] %vm1071_vm8, %v1024_v12  ;;  %1095 = vst.msk [vmem:[#allocation3 + $0xb8] sm:$0xff] %vm1071_vm8, %v1022_v19 }
 0x150   : > { %1385 = vrot.lane.b32.xlu0 %v2663_v49, %s2411_s5  ;;  %1415 = vrot.lane.b32.xlu1 %v2862_v40, %s2411_s5 }
 0x152   : > { %v1028_v25 = vpop.permute.xlu0 %1027  ;;  %v1026_v13 = vpop.permute.xlu1 %1025 }
 0x153   : > { %1098 = vst.msk [vmem:[#allocation3 + $0xd0] sm:$0xff] %vm1071_vm8, %v1028_v25  ;;  %1097 = vst.msk [vmem:[#allocation3 + $0xc8] sm:$0xff] %vm1071_vm8, %v1026_v13 }
 0x154   : > { %1518 = vrot.lane.b32.xlu0 %v4108_v48, %s2412_s6  ;;  %1417 = vrot.lane.b32.xlu1 %v2870_v51, %s2411_s5 }
 0x156   : > { %v1032_v32 = vpop.permute.xlu0 %1031  ;;  %v1030_v49 = vpop.permute.xlu1 %1029 }
 0x157   : > { %1100 = vst.msk [vmem:[#allocation3 + $0xe0] sm:$0xff] %vm1071_vm8, %v1032_v32  ;;  %1099 = vst.msk [vmem:[#allocation3 + $0xd8] sm:$0xff] %vm1071_vm8, %v1030_v49 }
 0x158   : > { %1122 = vrot.lane.b32.xlu0 %v4108_v48, %s2409_s29  ;;  %1550 = vrot.lane.b32.xlu1 %v4109_v17, %s2412_s6 }
 0x15a   : > { %v1036_v40 = vpop.permute.xlu0 %1035  ;;  %v1034_v46 = vpop.permute.xlu1 %1033 }
 0x15b   : > { %1102 = vst.msk [vmem:[#allocation3 + $0xf0] sm:$0xff] %vm1071_vm8, %v1036_v40  ;;  %1101 = vst.msk [vmem:[#allocation3 + $0xe8] sm:$0xff] %vm1071_vm8, %v1034_v46 }
 0x15c   : > { %1520 = vrot.lane.b32.xlu0 %v4110_v30, %s2412_s6  ;;  %1154 = vrot.lane.b32.xlu1 %v4109_v17, %s2409_s29 }
 0x15e   : > { %v1111_v51 = vpop.permute.xlu0 %1110  ;;  %v1038_v24 = vpop.permute.xlu1 %1037 }
 0x15f   : > { %1207 = vst.msk [vmem:[#allocation3] sm:$0xff] %vm1206_vm9, %v1111_v51 }
 0x160   : > { %1652 = vrot.lane.b32.xlu0 %v3067_v29, %s2413_s11  ;;  %1103 = vst.msk [vmem:[#allocation3 + $0xf8] sm:$0xff] %vm1071_vm8, %v1038_v24  ;;  %1552 = vrot.lane.b32.xlu1 %v2981_v63, %s2412_s6 }
 0x162   : > { %v1115_v62 = vpop.permute.xlu0 %1114  ;;  %v1113_v2 = vpop.permute.xlu1 %1112 }
 0x163   : > { %1209 = vst.msk [vmem:[#allocation3 + $0x10] sm:$0xff] %vm1206_vm9, %v1115_v62  ;;  %1208 = vst.msk [vmem:[#allocation3 + $0x8] sm:$0xff] %vm1206_vm9, %v1113_v2  ;;  %v4115_v62 = vld [vmem:[#allocation28_spill] sm:$0xff] }
 0x164   : > { %1124 = vrot.lane.b32.xlu0 %v4110_v30, %s2409_s29  ;;  %1684 = vrot.lane.b32.xlu1 %v3171_v5, %s2413_s11  ;;  %v4116_v2 = vld [vmem:[#allocation16_spill] sm:$0xff] }
 0x166   : > { %v1143_v18 = vpop.permute.xlu0 %1142  ;;  %v1117_v8 = vpop.permute.xlu1 %1116 }
 0x167   : > { %1223 = vst.msk [vmem:[#allocation3 + $0x80] sm:$0xff] %vm1206_vm9, %v1143_v18  ;;  %1210 = vst.msk [vmem:[#allocation3 + $0x18] sm:$0xff] %vm1206_vm9, %v1117_v8  ;;  %v4117_v8 = vld [vmem:[#allocation32_spill] sm:$0xff] }
 0x168   : > { %1256 = vrot.lane.b32.xlu0 %v3067_v29, %s2410_s30  ;;  %1156 = vrot.lane.b32.xlu1 %v2981_v63, %s2409_s29 }
 0x16a   : > { %v1245_v10 = vpop.permute.xlu0 %1244  ;;  %v1145_v16 = vpop.permute.xlu1 %1144 }
 0x16b   : > { %1341 = vst.msk [vmem:[#allocation3] sm:$0xff] %vm1340_vm10, %v1245_v10 }
 0x16c   : > { %1654 = vrot.lane.b32.xlu0 %v3087_v38, %s2413_s11  ;;  %1224 = vst.msk [vmem:[#allocation3 + $0x88] sm:$0xff] %vm1206_vm9, %v1145_v16  ;;  %1288 = vrot.lane.b32.xlu1 %v3171_v5, %s2410_s30 }
 0x16e   : > { %v1247_v58 = vpop.permute.xlu0 %1246  ;;  %v1277_v29 = vpop.permute.xlu1 %1276 }
 0x16f   : > { %1342 = vst.msk [vmem:[#allocation3 + $0x8] sm:$0xff] %vm1340_vm10, %v1247_v58  ;;  %1357 = vst.msk [vmem:[#allocation3 + $0x80] sm:$0xff] %vm1340_vm10, %v1277_v29  ;;  %v4118_v29 = vld [vmem:[#allocation30_spill] sm:$0xff] }
 0x170   : > { %1258 = vrot.lane.b32.xlu0 %v3087_v38, %s2410_s30  ;;  %1686 = vrot.lane.b32.xlu1 %v3193_v50, %s2413_s11 }
 0x172   : > { %v1376_v63 = vpop.permute.xlu0 %1375  ;;  %v1279_v6 = vpop.permute.xlu1 %1278 }
 0x173   : > { %1472 = vst.msk [vmem:[#allocation3] sm:$0xff] %vm1471_vm11, %v1376_v63 }
 0x174   : > { %1387 = vrot.lane.b32.xlu0 %v2677_v55, %s2411_s5  ;;  %1358 = vst.msk [vmem:[#allocation3 + $0x88] sm:$0xff] %vm1340_vm10, %v1279_v6  ;;  %1290 = vrot.lane.b32.xlu1 %v3193_v50, %s2410_s30  ;;  %v4111_v55 = vld [vmem:[#allocation12_spill] sm:$0xff] }
 0x176   : > { %v1378_v5 = vpop.permute.xlu0 %1377  ;;  %v1408_v38 = vpop.permute.xlu1 %1407 }
 0x177   : > { %1473 = vst.msk [vmem:[#allocation3 + $0x8] sm:$0xff] %vm1471_vm11, %v1378_v5  ;;  %1488 = vst.msk [vmem:[#allocation3 + $0x80] sm:$0xff] %vm1471_vm11, %v1408_v38 }
 0x178   : > { %1389 = vrot.lane.b32.xlu0 %v2679_v56, %s2411_s5  ;;  %1419 = vrot.lane.b32.xlu1 %v2872_v53, %s2411_s5 }
 0x17a   : > { %v1511_v14 = vpop.permute.xlu0 %1510  ;;  %v1410_v1 = vpop.permute.xlu1 %1409 }
 0x17b   : > { %1607 = vst.msk [vmem:[#allocation3] sm:$0xff] %vm1606_vm12, %v1511_v14 }
 0x17c   : > { %1522 = vrot.lane.b32.xlu0 %v4111_v55, %s2412_s6  ;;  %1489 = vst.msk [vmem:[#allocation3 + $0x88] sm:$0xff] %vm1471_vm11, %v1410_v1  ;;  %1421 = vrot.lane.b32.xlu1 %v2888_v45, %s2411_s5 }
 0x17e   : > { %v1147_v50 = vpop.permute.xlu0 %1146  ;;  %v1543_v56 = vpop.permute.xlu1 %1542 }
 0x17f   : > { %1225 = vst.msk [vmem:[#allocation3 + $0x90] sm:$0xff] %vm1206_vm9, %v1147_v50 }
 0x180   : > { %1126 = vrot.lane.b32.xlu0 %v4111_v55, %s2409_s29  ;;  %1623 = vst.msk [vmem:[#allocation3 + $0x80] sm:$0xff] %vm1606_vm12, %v1543_v56  ;;  %1554 = vrot.lane.b32.xlu1 %v4112_v47, %s2412_s6  ;;  %v4119_v55 = vld [vmem:[#allocation34_spill] sm:$0xff] }
 0x182   : > { %v1545_v53 = vpop.permute.xlu0 %1544  ;;  %v1513_v15 = vpop.permute.xlu1 %1512 }
 0x183   : > { %1624 = vst.msk [vmem:[#allocation3 + $0x88] sm:$0xff] %vm1606_vm12, %v1545_v53  ;;  %1608 = vst.msk [vmem:[#allocation3 + $0x8] sm:$0xff] %vm1606_vm12, %v1513_v15 }
 0x184   : > { %1524 = vrot.lane.b32.xlu0 %v4113_v28, %s2412_s6  ;;  %1158 = vrot.lane.b32.xlu1 %v4112_v47, %s2409_s29 }
 0x186   : > { %v1677_v45 = vpop.permute.xlu0 %1676  ;;  %v1645_v54 = vpop.permute.xlu1 %1644 }
 0x187   : > { %1757 = vst.msk [vmem:[#allocation3 + $0x80] sm:$0xff] %vm1740_vm13, %v1677_v45  ;;  %1741 = vst.msk [vmem:[#allocation3] sm:$0xff] %vm1740_vm13, %v1645_v54 }
 0x188   : > { %1656 = vrot.lane.b32.xlu0 %v3080_v39, %s2413_s11  ;;  %1556 = vrot.lane.b32.xlu1 %v3000_v34, %s2412_s6 }
 0x18a   : > { %v1249_v23 = vpop.permute.xlu0 %1248  ;;  %v1149_v12 = vpop.permute.xlu1 %1148 }
 0x18b   : > { %1343 = vst.msk [vmem:[#allocation3 + $0x10] sm:$0xff] %vm1340_vm10, %v1249_v23 }
 0x18c   : > { %1128 = vrot.lane.b32.xlu0 %v4113_v28, %s2409_s29  ;;  %1226 = vst.msk [vmem:[#allocation3 + $0x98] sm:$0xff] %vm1206_vm9, %v1149_v12  ;;  %1688 = vrot.lane.b32.xlu1 %v3185_v11, %s2413_s11  ;;  %v4121_v12 = vld [vmem:[#allocation29_spill] sm:$0xff] }
 0x18e   : > { %v1647_v19 = vpop.permute.xlu0 %1646  ;;  %v1789_v25 = vld [vmem:[#allocation3 + $0x80] sm:$0xff]  ;;  %v1281_v48 = vpop.permute.xlu1 %1280 }
 0x18f   : > { %1742 = vst.msk [vmem:[#allocation3 + $0x8] sm:$0xff] %vm1740_vm13, %v1647_v19  ;;  %2342 = vmatprep.mubr.msk.f32.mxu1 %vm1810_vm14, %v1789_v25  ;;  %v1773_v13 = vld [vmem:[#allocation3] sm:$0xff]  ;;  %v4122_v19 = vld [vmem:[#allocation18_spill] sm:$0xff] }
 0x190   : > { %1260 = vrot.lane.b32.xlu0 %v3080_v39, %s2410_s30  ;;  %1359 = vst.msk [vmem:[#allocation3 + $0x90] sm:$0xff] %vm1340_vm10, %v1281_v48  ;;  %2318 = vmatprep.mubr.msk.f32.mxu0 %vm1810_vm14, %v1773_v13  ;;  %v4123_v48 = vld [vmem:[#allocation33_spill] sm:$0xff] }
 0x191   : > { %1160 = vrot.lane.b32.xlu1 %v3000_v34, %s2409_s29 }
 0x192   : > { %v1251_v32 = vpop.permute.xlu0 %1250  ;;  %v1679_v49 = vpop.permute.xlu1 %1678 }
 0x193   : > { %1344 = vst.msk [vmem:[#allocation3 + $0x18] sm:$0xff] %vm1340_vm10, %v1251_v32 }
 0x194   : > { %1658 = vrot.lane.b32.xlu0 %v3100_v33, %s2413_s11  ;;  %1758 = vst.msk [vmem:[#allocation3 + $0x88] sm:$0xff] %vm1740_vm13, %v1679_v49 }
 0x195   : > { %1292 = vrot.lane.b32.xlu1 %v3185_v11, %s2410_s30 }
 0x196   : > { %v1380_v40 = vpop.permute.xlu0 %1379  ;;  %v1774_v39 = vld [vmem:[#allocation3 + $0x8] sm:$0xff]  ;;  %v1283_v34 = vpop.permute.xlu1 %1282 }
 0x197   : > { %1474 = vst.msk [vmem:[#allocation3 + $0x10] sm:$0xff] %vm1471_vm11, %v1380_v40  ;;  %2319 = vmatmul.mubr.msk.f32.vlgmr.msra.gmra.mrb[0].mxu0 %vm1810_vm14, %v1774_v39  ;;  %v4124_v40 = vld [vmem:[#allocation31_spill] sm:$0xff] }
 0x198   : > { %1262 = vrot.lane.b32.xlu0 %v3100_v33, %s2410_s30  ;;  %1360 = vst.msk [vmem:[#allocation3 + $0x98] sm:$0xff] %vm1340_vm10, %v1283_v34 }
 0x199   : > { %1690 = vrot.lane.b32.xlu1 %v3206_v21, %s2413_s11 }
 0x19a   : > { %v1382_v17 = vpop.permute.xlu0 %1381  ;;  %v1412_v11 = vpop.permute.xlu1 %1411 }
 0x19b   : > { %1475 = vst.msk [vmem:[#allocation3 + $0x18] sm:$0xff] %vm1471_vm11, %v1382_v17  ;;  %v1790_v30 = vld [vmem:[#allocation3 + $0x88] sm:$0xff]  ;;  %1490 = vst.msk [vmem:[#allocation3 + $0x90] sm:$0xff] %vm1471_vm11, %v1412_v11 }
 0x19c   : > { %1391 = vrot.lane.b32.xlu0 %v2681_v57, %s2411_s5  ;;  %2343 = vmatmul.mubr.msk.f32.vlgmr.msra.gmra.mrb[0].mxu1 %vm1810_vm14, %v1790_v30  ;;  %v4114_v57 = vld [vmem:[#allocation13_spill] sm:$0xff] }
 0x19d   : > { %1294 = vrot.lane.b32.xlu1 %v3206_v21, %s2410_s30 }
 0x19e   : > { %v1515_v46 = vpop.permute.xlu0 %1514  ;;  %v1414_v33 = vpop.permute.xlu1 %1413 }
 0x19f   : > { %1609 = vst.msk [vmem:[#allocation3 + $0x10] sm:$0xff] %vm1606_vm12, %v1515_v46  ;;  %v4125_v46 = vld [vmem:[#allocation36_spill] sm:$0xff] }
 0x1a0   : > { %1393 = vrot.lane.b32.xlu0 %v2690_v59, %s2411_s5  ;;  %1491 = vst.msk [vmem:[#allocation3 + $0x98] sm:$0xff] %vm1471_vm11, %v1414_v33 }
 0x1a1   : > { %1423 = vrot.lane.b32.xlu1 %v2901_v31, %s2411_s5 }
 0x1a2   : > { %v1119_v51 = vpop.permute.xlu0 %1118  ;;  %v1547_v24 = vpop.permute.xlu1 %1546 }
 0x1a3   : > { %1211 = vst.msk [vmem:[#allocation3 + $0x20] sm:$0xff] %vm1206_vm9, %v1119_v51 }
 0x1a4   : > { %1526 = vrot.lane.b32.xlu0 %v4114_v57, %s2412_s6  ;;  %1625 = vst.msk [vmem:[#allocation3 + $0x90] sm:$0xff] %vm1606_vm12, %v1547_v24 }
 0x1a5   : > { %1425 = vrot.lane.b32.xlu1 %v2903_v41, %s2411_s5 }
 0x1a6   : > { %v1517_v21 = vpop.permute.xlu0 %1516  ;;  %v1151_v59 = vpop.permute.xlu1 %1150 }
 0x1a7   : > { %1610 = vst.msk [vmem:[#allocation3 + $0x18] sm:$0xff] %vm1606_vm12, %v1517_v21 }
 0x1a8   : > { %1130 = vrot.lane.b32.xlu0 %v4114_v57, %s2409_s29  ;;  %1227 = vst.msk [vmem:[#allocation3 + $0xa0] sm:$0xff] %vm1206_vm9, %v1151_v59 }
 0x1a9   : > { %1558 = vrot.lane.b32.xlu1 %v4115_v62, %s2412_s6 }
 0x1aa   : > { %v1649_v31 = vpop.permute.xlu0 %1648  ;;  %v1549_v18 = vpop.permute.xlu1 %1548 }
 0x1ab   : > { %1743 = vst.msk [vmem:[#allocation3 + $0x10] sm:$0xff] %vm1740_vm13, %v1649_v31 }
 0x1ac   : > { %1528 = vrot.lane.b32.xlu0 %v4116_v2, %s2412_s6  ;;  %1626 = vst.msk [vmem:[#allocation3 + $0x98] sm:$0xff] %vm1606_vm12, %v1549_v18  ;;  %v1106_v18 = vrot.slane %v3329_v26, 1 }
 0x1ad   : > { %1162 = vrot.lane.b32.xlu1 %v4115_v62, %s2409_s29 }
 0x1ae   : > { %v1121_v41 = vpop.permute.xlu0 %1120  ;;  %v1681_v10 = vpop.permute.xlu1 %1680 }
 0x1af   : > { %1212 = vst.msk [vmem:[#allocation3 + $0x28] sm:$0xff] %vm1206_vm9, %v1121_v41 }
 0x1b0   : > { %1660 = vrot.lane.b32.xlu0 %v4117_v8, %s2413_s11  ;;  %1759 = vst.msk [vmem:[#allocation3 + $0x90] sm:$0xff] %vm1740_vm13, %v1681_v10 }
 0x1b1   : > { %1560 = vrot.lane.b32.xlu1 %v4118_v29, %s2412_s6 }
 0x1b2   : > { %v1253_v16 = vpop.permute.xlu0 %1252  ;;  %v1775_v58 = vld [vmem:[#allocation3 + $0x10] sm:$0xff]  ;;  %v1153_v63 = vpop.permute.xlu1 %1152 }
 0x1b3   : > { %1345 = vst.msk [vmem:[#allocation3 + $0x20] sm:$0xff] %vm1340_vm10, %v1253_v16  ;;  %2321 = vmatprep.mubr.msk.f32.mxu0 %vm1810_vm14, %v1775_v58  ;;  %v469_v16 = vld [vmem:[#allocation2 + $0x190] sm:$0x3] }
 0x1b4   : > { %1132 = vrot.lane.b32.xlu0 %v4116_v2, %s2409_s29  ;;  %1228 = vst.msk [vmem:[#allocation3 + $0xa8] sm:$0xff] %vm1206_vm9, %v1153_v63  ;;  %v1108_v63 = vrot.slane %v469_v16, 1 }
 0x1b5   : > { %1692 = vrot.lane.b32.xlu1 %v3199_v27, %s2413_s11 }
 0x1b6   : > { %v1651_v6 = vpop.permute.xlu0 %1650  ;;  %v1285_v5 = vpop.permute.xlu1 %1284 }
 0x1b7   : > { %1744 = vst.msk [vmem:[#allocation3 + $0x18] sm:$0xff] %vm1740_vm13, %v1651_v6  ;;  %v1791_v38 = vld [vmem:[#allocation3 + $0x90] sm:$0xff] }
 0x1b8   : > { %1264 = vrot.lane.b32.xlu0 %v4117_v8, %s2410_s30  ;;  %1361 = vst.msk [vmem:[#allocation3 + $0xa0] sm:$0xff] %vm1340_vm10, %v1285_v5  ;;  %2345 = vmatprep.mubr.msk.f32.mxu1 %vm1810_vm14, %v1791_v38  ;;  %v1239_v38 = vrot.slane %v3317_v22, 2 }
 0x1b9   : > { %1164 = vrot.lane.b32.xlu1 %v4118_v29, %s2409_s29  ;;  %v4127_v29 = vld [vmem:[#allocation20_spill] sm:$0xff] }
 0x1ba   : > { %v1255_v14 = vpop.permute.xlu0 %1254  ;;  %v1683_v1 = vpop.permute.xlu1 %1682 }
 0x1bb   : > { %1346 = vst.msk [vmem:[#allocation3 + $0x28] sm:$0xff] %vm1340_vm10, %v1255_v14  ;;  %v1240_v14 = vrot.slane %v3329_v26, 2 }
 0x1bc   : > { %1662 = vrot.lane.b32.xlu0 %v4119_v55, %s2413_s11  ;;  %1760 = vst.msk [vmem:[#allocation3 + $0x98] sm:$0xff] %vm1740_vm13, %v1683_v1  ;;  %v4128_v1 = vld [vmem:[#allocation35_spill] sm:$0xff] }
 0x1bd   : > { %1296 = vrot.lane.b32.xlu1 %v3199_v27, %s2410_s30 }
 0x1be   : > { %v1384_v50 = vpop.permute.xlu0 %1383  ;;  %v1776_v56 = vld [vmem:[#allocation3 + $0x18] sm:$0xff]  ;;  %v1287_v53 = vpop.permute.xlu1 %1286 }
 0x1bf   : > { %1476 = vst.msk [vmem:[#allocation3 + $0x20] sm:$0xff] %vm1471_vm11, %v1384_v50  ;;  %2322 = vmatmul.mubr.msk.f32.gmra.mrb[2].mxu0 %vm1810_vm14, %v1776_v56 }
 0x1c0   : > { %1266 = vrot.lane.b32.xlu0 %v4119_v55, %s2410_s30  ;;  %1362 = vst.msk [vmem:[#allocation3 + $0xa8] sm:$0xff] %vm1340_vm10, %v1287_v53  ;;  %v1109_v55 = vsel %vm553_vm3, %v1106_v18, %v1108_v63 }
 0x1c1   : > { %1694 = vrot.lane.b32.xlu1 %v3219_v43, %s2413_s11 }
 0x1c2   : > { %v1386_v47 = vpop.permute.xlu0 %1385  ;;  %v1416_v27 = vpop.permute.xlu1 %1415 }
 0x1c3   : > { %1477 = vst.msk [vmem:[#allocation3 + $0x28] sm:$0xff] %vm1471_vm11, %v1386_v47  ;;  %v1792_v28 = vld [vmem:[#allocation3 + $0x98] sm:$0xff]  ;;  %1492 = vst.msk [vmem:[#allocation3 + $0xa0] sm:$0xff] %vm1471_vm11, %v1416_v27 }
 0x1c4   : > { %1395 = vrot.lane.b32.xlu0 %v2704_v0, %s2411_s5  ;;  %2346 = vmatmul.mubr.msk.f32.gmra.mrb[2].mxu1 %vm1810_vm14, %v1792_v28  ;;  %v4120_v0 = vld [vmem:[#allocation15_spill] sm:$0xff] }
 0x1c5   : > { %1298 = vrot.lane.b32.xlu1 %v3219_v43, %s2410_s30 }
 0x1c6   : > { %v1519_v15 = vpop.permute.xlu0 %1518  ;;  %v1418_v45 = vpop.permute.xlu1 %1417 }
 0x1c7   : > { %1611 = vst.msk [vmem:[#allocation3 + $0x20] sm:$0xff] %vm1606_vm12, %v1519_v15 }
 0x1c8   : > { %1397 = vrot.lane.b32.xlu0 %v2706_v3, %s2411_s5  ;;  %1493 = vst.msk [vmem:[#allocation3 + $0xa8] sm:$0xff] %vm1471_vm11, %v1418_v45  ;;  %v4129_v45 = vld [vmem:[#allocation37_spill] sm:$0xff] }
 0x1c9   : > { %1427 = vrot.lane.b32.xlu1 %v2924_v42, %s2411_s5 }
 0x1ca   : > { %v1123_v54 = vpop.permute.xlu0 %1122  ;;  %v1551_v23 = vpop.permute.xlu1 %1550 }
 0x1cb   : > { %1213 = vst.msk [vmem:[#allocation3 + $0x30] sm:$0xff] %vm1206_vm9, %v1123_v54  ;;  %v1242_v54 = vrot.slane %v469_v16, 2 }
 0x1cc   : > { %1530 = vrot.lane.b32.xlu0 %v4120_v0, %s2412_s6  ;;  %1627 = vst.msk [vmem:[#allocation3 + $0xa0] sm:$0xff] %vm1606_vm12, %v1551_v23 }
 0x1cd   : > { %1429 = vrot.lane.b32.xlu1 %v2926_v20, %s2411_s5 }
 0x1ce   : > { %v1521_v43 = vpop.permute.xlu0 %1520  ;;  %v1155_v3 = vpop.permute.xlu1 %1154 }
 0x1cf   : > { %1612 = vst.msk [vmem:[#allocation3 + $0x28] sm:$0xff] %vm1606_vm12, %v1521_v43 }
 0x1d0   : > { %1134 = vrot.lane.b32.xlu0 %v4120_v0, %s2409_s29  ;;  %1229 = vst.msk [vmem:[#allocation3 + $0xb0] sm:$0xff] %vm1206_vm9, %v1155_v3  ;;  %v1243_v3 = vsel %vm763_vm4, %v1240_v14, %v1242_v54 }
 0x1d1   : > { %1562 = vrot.lane.b32.xlu1 %v4121_v12, %s2412_s6 }
 0x1d2   : > { %v1653_v42 = vpop.permute.xlu0 %1652  ;;  %v1553_v25 = vpop.permute.xlu1 %1552 }
 0x1d3   : > { %1745 = vst.msk [vmem:[#allocation3 + $0x20] sm:$0xff] %vm1740_vm13, %v1653_v42 }
 0x1d4   : > { %1532 = vrot.lane.b32.xlu0 %v4122_v19, %s2412_s6  ;;  %1628 = vst.msk [vmem:[#allocation3 + $0xa8] sm:$0xff] %vm1606_vm12, %v1553_v25 }
 0x1d5   : > { %1166 = vrot.lane.b32.xlu1 %v4121_v12, %s2409_s29 }
 0x1d6   : > { %v1125_v20 = vpop.permute.xlu0 %1124  ;;  %v1685_v13 = vpop.permute.xlu1 %1684 }
 0x1d7   : > { %1214 = vst.msk [vmem:[#allocation3 + $0x38] sm:$0xff] %vm1206_vm9, %v1125_v20 }
 0x1d8   : > { %1664 = vrot.lane.b32.xlu0 %v4123_v48, %s2413_s11  ;;  %1761 = vst.msk [vmem:[#allocation3 + $0xa0] sm:$0xff] %vm1740_vm13, %v1685_v13 }
 0x1d9   : > { %1564 = vrot.lane.b32.xlu1 %v4124_v40, %s2412_s6 }
 0x1da   : > { %v1257_v32 = vpop.permute.xlu0 %1256  ;;  %v1777_v49 = vld [vmem:[#allocation3 + $0x20] sm:$0xff]  ;;  %v1157_v39 = vpop.permute.xlu1 %1156 }
 0x1db   : > { %1347 = vst.msk [vmem:[#allocation3 + $0x30] sm:$0xff] %vm1340_vm10, %v1257_v32  ;;  %2324 = vmatprep.mubr.msk.f32.mxu0 %vm1810_vm14, %v1777_v49  ;;  %v471_v32 = vld [vmem:[#allocation2 + $0x1a0] sm:$0xff] }
 0x1dc   : > { %1136 = vrot.lane.b32.xlu0 %v4122_v19, %s2409_s29  ;;  %1230 = vst.msk [vmem:[#allocation3 + $0xb8] sm:$0xff] %vm1206_vm9, %v1157_v39 }
 0x1dd   : > { %1696 = vrot.lane.b32.xlu1 %v3212_v4, %s2413_s11 }
 0x1de   : > { %v1655_v34 = vpop.permute.xlu0 %1654  ;;  %v1289_v17 = vpop.permute.xlu1 %1288 }
 0x1df   : > { %1746 = vst.msk [vmem:[#allocation3 + $0x28] sm:$0xff] %vm1740_vm13, %v1655_v34  ;;  %v1793_v11 = vld [vmem:[#allocation3 + $0xa0] sm:$0xff]  ;;  %v472_v34 = vld [vmem:[#allocation2 + $0x1a8] sm:$0x3] }
 0x1e0   : > { %1268 = vrot.lane.b32.xlu0 %v4123_v48, %s2410_s30  ;;  %1363 = vst.msk [vmem:[#allocation3 + $0xb0] sm:$0xff] %vm1340_vm10, %v1289_v17  ;;  %2348 = vmatprep.mubr.msk.f32.mxu1 %vm1810_vm14, %v1793_v11  ;;  %v470_v48 = vld [vmem:[#allocation2 + $0x198] sm:$0xff]  ;;  %v1508_v11 = vrot.slane %v472_v34, 1 }
 0x1e1   : > { %1168 = vrot.lane.b32.xlu1 %v4124_v40, %s2409_s29  ;;  %v1505_v49 = vrot.slane %v470_v48, 1  ;;  %v1506_v40 = vrot.slane %v471_v32, 1 }
 0x1e2   : > { %v1259_v30 = vpop.permute.xlu0 %1258  ;;  %v1687_v33 = vpop.permute.xlu1 %1686 }
 0x1e3   : > { %1348 = vst.msk [vmem:[#allocation3 + $0x38] sm:$0xff] %vm1340_vm10, %v1259_v30 }
 0x1e4   : > { %1666 = vrot.lane.b32.xlu0 %v4125_v46, %s2413_s11  ;;  %1762 = vst.msk [vmem:[#allocation3 + $0xa8] sm:$0xff] %vm1740_vm13, %v1687_v33  ;;  %v1640_v33 = vrot.slane %v471_v32, 2 }
 0x1e5   : > { %1300 = vrot.lane.b32.xlu1 %v3212_v4, %s2410_s30 }
 0x1e6   : > { %v1388_v51 = vpop.permute.xlu0 %1387  ;;  %v1778_v57 = vld [vmem:[#allocation3 + $0x28] sm:$0xff]  ;;  %v1291_v24 = vpop.permute.xlu1 %1290 }
 0x1e7   : > { %1478 = vst.msk [vmem:[#allocation3 + $0x30] sm:$0xff] %vm1471_vm11, %v1388_v51  ;;  %2325 = vmatmul.mubr.msk.f32.gmra.mrb[4].mxu0 %vm1810_vm14, %v1778_v57  ;;  %v1509_v51 = vsel %vm553_vm3, %v1506_v40, %v1508_v11 }
 0x1e8   : > { %1270 = vrot.lane.b32.xlu0 %v4125_v46, %s2410_s30  ;;  %1364 = vst.msk [vmem:[#allocation3 + $0xb8] sm:$0xff] %vm1340_vm10, %v1291_v24 }
 0x1e9   : > { %1698 = vrot.lane.b32.xlu1 %v3229_v44, %s2413_s11 }
 0x1ea   : > { %v1390_v21 = vpop.permute.xlu0 %1389  ;;  %v1420_v4 = vpop.permute.xlu1 %1419 }
 0x1eb   : > { %1479 = vst.msk [vmem:[#allocation3 + $0x38] sm:$0xff] %vm1471_vm11, %v1390_v21  ;;  %v1794_v59 = vld [vmem:[#allocation3 + $0xa8] sm:$0xff]  ;;  %1494 = vst.msk [vmem:[#allocation3 + $0xb0] sm:$0xff] %vm1471_vm11, %v1420_v4  ;;  %v1642_v21 = vrot.slane %v472_v34, 2 }
 0x1ec   : > { %1399 = vrot.lane.b32.xlu0 %v2739_v35, %s2411_s5  ;;  %2349 = vmatmul.mubr.msk.f32.gmra.mrb[4].mxu1 %vm1810_vm14, %v1794_v59  ;;  %v1105_v35 = vrot.slane %v3317_v22, 1 }
 0x1ed   : > { %1302 = vrot.lane.b32.xlu1 %v3229_v44, %s2410_s30  ;;  %v4126_v44 = vld [vmem:[#allocation17_spill] sm:$0xff] }
 0x1ee   : > { %v1523_v31 = vpop.permute.xlu0 %1522  ;;  %v1422_v62 = vpop.permute.xlu1 %1421  ;;  %v1107_v8 = vsel %vm553_vm3, %v1105_v35, %v1106_v18 }
 0x1ef   : > { %1613 = vst.msk [vmem:[#allocation3 + $0x30] sm:$0xff] %vm1606_vm12, %v1523_v31 }
 0x1f0   : > { %1401 = vrot.lane.b32.xlu0 %v2741_v36, %s2411_s5  ;;  %1495 = vst.msk [vmem:[#allocation3 + $0xb8] sm:$0xff] %vm1471_vm11, %v1422_v62 }
 0x1f1   : > { %1431 = vrot.lane.b32.xlu1 %v3317_v22, %s2411_s5  ;;  %v1241_v22 = vsel %vm763_vm4, %v1239_v38, %v1240_v14 }
 0x1f2   : > { %v1127_v2 = vpop.permute.xlu0 %1126  ;;  %v1555_v41 = vpop.permute.xlu1 %1554 }
 0x1f3   : > { %1215 = vst.msk [vmem:[#allocation3 + $0x40] sm:$0xff] %vm1206_vm9, %v1127_v2 }
 0x1f4   : > { %1534 = vrot.lane.b32.xlu0 %v4126_v44, %s2412_s6  ;;  %1629 = vst.msk [vmem:[#allocation3 + $0xb0] sm:$0xff] %vm1606_vm12, %v1555_v41 }
 0x1f5   : > { %1433 = vrot.lane.b32.xlu1 %v3329_v26, %s2411_s5 }
 0x1f6   : > { %v1525_v36 = vpop.permute.xlu0 %1524  ;;  %v1159_v10 = vpop.permute.xlu1 %1158 }
 0x1f7   : > { %1614 = vst.msk [vmem:[#allocation3 + $0x38] sm:$0xff] %vm1606_vm12, %v1525_v36 }
 0x1f8   : > { %1138 = vrot.lane.b32.xlu0 %v4126_v44, %s2409_s29  ;;  %1231 = vst.msk [vmem:[#allocation3 + $0xc0] sm:$0xff] %vm1206_vm9, %v1159_v10 }
 0x1f9   : > { %1566 = vrot.lane.b32.xlu1 %v1107_v8, %s2412_s6 }
 0x1fa   : > { %v1657_v58 = vpop.permute.xlu0 %1656  ;;  %v1557_v6 = vpop.permute.xlu1 %1556 }
 0x1fb   : > { %1747 = vst.msk [vmem:[#allocation3 + $0x30] sm:$0xff] %vm1740_vm13, %v1657_v58 }
 0x1fc   : > { %1536 = vrot.lane.b32.xlu0 %v4127_v29, %s2412_s6  ;;  %1630 = vst.msk [vmem:[#allocation3 + $0xb8] sm:$0xff] %vm1606_vm12, %v1557_v6 }
 0x1fd   : > { %1170 = vrot.lane.b32.xlu1 %v1107_v8, %s2409_s29 }
 0x1fe   : > { %v1129_v5 = vpop.permute.xlu0 %1128  ;;  %v1689_v50 = vpop.permute.xlu1 %1688 }
 0x1ff   : > { %1216 = vst.msk [vmem:[#allocation3 + $0x48] sm:$0xff] %vm1206_vm9, %v1129_v5 }
 0x200   : > { %1668 = vrot.lane.b32.xlu0 %v4128_v1, %s2413_s11  ;;  %1763 = vst.msk [vmem:[#allocation3 + $0xb0] sm:$0xff] %vm1740_vm13, %v1689_v50 }
 0x201   : > { %1568 = vrot.lane.b32.xlu1 %v1109_v55, %s2412_s6 }
 0x202   : > { %v1261_v56 = vpop.permute.xlu0 %1260  ;;  %v1779_v53 = vld [vmem:[#allocation3 + $0x30] sm:$0xff] }
 0x203   : > { %1349 = vst.msk [vmem:[#allocation3 + $0x40] sm:$0xff] %vm1340_vm10, %v1261_v56  ;;  %2327 = vmatprep.mubr.msk.f32.mxu0 %vm1810_vm14, %v1779_v53  ;;  %v1161_v26 = vpop.permute.xlu1 %1160 }
 0x204   : > { %1140 = vrot.lane.b32.xlu0 %v4127_v29, %s2409_s29  ;;  %1232 = vst.msk [vmem:[#allocation3 + $0xc8] sm:$0xff] %vm1206_vm9, %v1161_v26 }
 0x205   : > { %1700 = vrot.lane.b32.xlu1 %v1241_v22, %s2413_s11 }
 0x206   : > { %v1659_v47 = vpop.permute.xlu0 %1658 }
 0x207   : > { %1748 = vst.msk [vmem:[#allocation3 + $0x38] sm:$0xff] %vm1740_vm13, %v1659_v47  ;;  %v1293_v27 = vpop.permute.xlu1 %1292  ;;  %v1795_v28 = vld [vmem:[#allocation3 + $0xb0] sm:$0xff] }
 0x208   : > { %1272 = vrot.lane.b32.xlu0 %v4128_v1, %s2410_s30  ;;  %1365 = vst.msk [vmem:[#allocation3 + $0xc0] sm:$0xff] %vm1340_vm10, %v1293_v27  ;;  %2351 = vmatprep.mubr.msk.f32.mxu1 %vm1810_vm14, %v1795_v28 }
 0x209   : > { %1172 = vrot.lane.b32.xlu1 %v1109_v55, %s2409_s29 }
 0x20a   : > { %v1263_v15 = vpop.permute.xlu0 %1262 }
 0x20b   : > { %1350 = vst.msk [vmem:[#allocation3 + $0x48] sm:$0xff] %vm1340_vm10, %v1263_v15  ;;  %v1691_v0 = vpop.permute.xlu1 %1690 }
 0x20c   : > { %1670 = vrot.lane.b32.xlu0 %v4129_v45, %s2413_s11  ;;  %1764 = vst.msk [vmem:[#allocation3 + $0xb8] sm:$0xff] %vm1740_vm13, %v1691_v0 }
 0x20d   : > { %1304 = vrot.lane.b32.xlu1 %v1241_v22, %s2410_s30 }
 0x20e   : > { %v1392_v23 = vpop.permute.xlu0 %1391  ;;  %v1780_v43 = vld [vmem:[#allocation3 + $0x38] sm:$0xff] }
 0x20f   : > { %1480 = vst.msk [vmem:[#allocation3 + $0x40] sm:$0xff] %vm1471_vm11, %v1392_v23  ;;  %2328 = vmatmul.mubr.msk.f32.gmra.mrb[6].mxu0 %vm1810_vm14, %v1780_v43  ;;  %v1295_v42 = vpop.permute.xlu1 %1294 }
 0x210   : > { %1274 = vrot.lane.b32.xlu0 %v4129_v45, %s2410_s30  ;;  %1366 = vst.msk [vmem:[#allocation3 + $0xc8] sm:$0xff] %vm1340_vm10, %v1295_v42 }
 0x211   : > { %1702 = vrot.lane.b32.xlu1 %v1243_v3, %s2413_s11 }
 0x212   : > { %v1394_v12 = vpop.permute.xlu0 %1393 }
 0x213   : > { %1481 = vst.msk [vmem:[#allocation3 + $0x48] sm:$0xff] %vm1471_vm11, %v1394_v12  ;;  %v1424_v19 = vpop.permute.xlu1 %1423  ;;  %v1796_v25 = vld [vmem:[#allocation3 + $0xb8] sm:$0xff] }
 0x214   : > { %1403 = vrot.lane.b32.xlu0 %v2799_v52, %s2411_s5  ;;  %1496 = vst.msk [vmem:[#allocation3 + $0xc0] sm:$0xff] %vm1471_vm11, %v1424_v19  ;;  %2352 = vmatmul.mubr.msk.f32.gmra.mrb[6].mxu1 %vm1810_vm14, %v1796_v25 }
 0x215   : > { %1306 = vrot.lane.b32.xlu1 %v1243_v3, %s2410_s30 }
 0x216   : > { %v1527_v20 = vpop.permute.xlu0 %1526 }
 0x217   : > { %1615 = vst.msk [vmem:[#allocation3 + $0x40] sm:$0xff] %vm1606_vm12, %v1527_v20  ;;  %v1426_v13 = vpop.permute.xlu1 %1425 }
 0x218   : > { %1405 = vrot.lane.b32.xlu0 %v2805_v60, %s2411_s5  ;;  %1497 = vst.msk [vmem:[#allocation3 + $0xc8] sm:$0xff] %vm1471_vm11, %v1426_v13  ;;  %v1507_v60 = vsel %vm553_vm3, %v1505_v49, %v1506_v40 }
 0x219   : > { %1435 = vrot.lane.b32.xlu1 %v470_v48, %s2411_s5 }
 0x21a   : > { %v1131_v52 = vpop.permute.xlu0 %1130 }
 0x21b   : > { %1217 = vst.msk [vmem:[#allocation3 + $0x50] sm:$0xff] %vm1206_vm9, %v1131_v52  ;;  %v1559_v39 = vpop.permute.xlu1 %1558 }
 0x21c   : > { %1538 = vrot.lane.b32.xlu0 %v4099_v61, %s2412_s6  ;;  %1631 = vst.msk [vmem:[#allocation3 + $0xc0] sm:$0xff] %vm1606_vm12, %v1559_v39  ;;  %v1639_v61 = vrot.slane %v470_v48, 2 }
 0x21d   : > { %1437 = vrot.lane.b32.xlu1 %v471_v32, %s2411_s5 }
 0x21e   : > { %v1529_v17 = vpop.permute.xlu0 %1528  ;;  %v1641_v24 = vsel %vm763_vm4, %v1639_v61, %v1640_v33 }
 0x21f   : > { %1616 = vst.msk [vmem:[#allocation3 + $0x48] sm:$0xff] %vm1606_vm12, %v1529_v17  ;;  %v1163_v30 = vpop.permute.xlu1 %1162 }
 0x220   : > { %1540 = vrot.lane.b32.xlu0 %v4101_v37, %s2412_s6  ;;  %1233 = vst.msk [vmem:[#allocation3 + $0xd0] sm:$0xff] %vm1206_vm9, %v1163_v30 }
 0x221   : > { %1570 = vrot.lane.b32.xlu1 %v1507_v60, %s2412_s6 }
 0x222   : > { %v1661_v46 = vpop.permute.xlu0 %1660 }
 0x223   : > { %1749 = vst.msk [vmem:[#allocation3 + $0x40] sm:$0xff] %vm1740_vm13, %v1661_v46  ;;  %v1561_v57 = vpop.permute.xlu1 %1560 }
 0x224   : > { %1672 = vrot.lane.b32.xlu0 %v3132_v7, %s2413_s11  ;;  %1632 = vst.msk [vmem:[#allocation3 + $0xc8] sm:$0xff] %vm1606_vm12, %v1561_v57  ;;  %v1643_v7 = vsel %vm763_vm4, %v1640_v33, %v1642_v21 }
 0x225   : > { %1572 = vrot.lane.b32.xlu1 %v1509_v51, %s2412_s6 }
 0x226   : > { %v1133_v37 = vpop.permute.xlu0 %1132 }
 0x227   : > { %1218 = vst.msk [vmem:[#allocation3 + $0x58] sm:$0xff] %vm1206_vm9, %v1133_v37  ;;  %v1693_v4 = vpop.permute.xlu1 %1692 }
 0x228   : > { %1674 = vrot.lane.b32.xlu0 %v3152_v9, %s2413_s11  ;;  %1765 = vst.msk [vmem:[#allocation3 + $0xc0] sm:$0xff] %vm1740_vm13, %v1693_v4 }
 0x229   : > { %1704 = vrot.lane.b32.xlu1 %v1641_v24, %s2413_s11 }
 0x22a   : > { %v1265_v59 = vpop.permute.xlu0 %1264  ;;  %v1781_v31 = vld [vmem:[#allocation3 + $0x40] sm:$0xff] }
 0x22b   : > { %1351 = vst.msk [vmem:[#allocation3 + $0x50] sm:$0xff] %vm1340_vm10, %v1265_v59  ;;  %2330 = vmatprep.mubr.msk.f32.mxu0 %vm1810_vm14, %v1781_v31  ;;  %v1165_v62 = vpop.permute.xlu1 %1164 }
 0x22c   : > { %1234 = vst.msk [vmem:[#allocation3 + $0xd8] sm:$0xff] %vm1206_vm9, %v1165_v62 }
 0x22d   : > { %1706 = vrot.lane.b32.xlu1 %v1643_v7, %s2413_s11 }
 0x22e   : > { %v1663_v2 = vpop.permute.xlu0 %1662 }
 0x22f   : > { %1750 = vst.msk [vmem:[#allocation3 + $0x48] sm:$0xff] %vm1740_vm13, %v1663_v2  ;;  %v1297_v9 = vpop.permute.xlu1 %1296  ;;  %v1797_v35 = vld [vmem:[#allocation3 + $0xc0] sm:$0xff] }
 0x230   : > { %1367 = vst.msk [vmem:[#allocation3 + $0xd0] sm:$0xff] %vm1340_vm10, %v1297_v9  ;;  %2354 = vmatprep.mubr.msk.f32.mxu1 %vm1810_vm14, %v1797_v35 }
 0x232   : > { %v1267_v18 = vpop.permute.xlu0 %1266 }
 0x233   : > { %1352 = vst.msk [vmem:[#allocation3 + $0x58] sm:$0xff] %vm1340_vm10, %v1267_v18  ;;  %v1695_v44 = vpop.permute.xlu1 %1694 }
 0x234   : > { %1766 = vst.msk [vmem:[#allocation3 + $0xc8] sm:$0xff] %vm1740_vm13, %v1695_v44 }
 0x236   : > { %v1396_v41 = vpop.permute.xlu0 %1395  ;;  %v1782_v36 = vld [vmem:[#allocation3 + $0x48] sm:$0xff] }
 0x237   : > { %1482 = vst.msk [vmem:[#allocation3 + $0x50] sm:$0xff] %vm1471_vm11, %v1396_v41  ;;  %2331 = vmatmul.mubr.msk.f32.gmra.mrb[8].mxu0 %vm1810_vm14, %v1782_v36  ;;  %v1299_v8 = vpop.permute.xlu1 %1298 }
 0x238   : > { %1368 = vst.msk [vmem:[#allocation3 + $0xd8] sm:$0xff] %vm1340_vm10, %v1299_v8 }
 0x23a   : > { %v1398_v10 = vpop.permute.xlu0 %1397 }
 0x23b   : > { %1483 = vst.msk [vmem:[#allocation3 + $0x58] sm:$0xff] %vm1471_vm11, %v1398_v10  ;;  %v1428_v16 = vpop.permute.xlu1 %1427  ;;  %v1798_v58 = vld [vmem:[#allocation3 + $0xc8] sm:$0xff] }
 0x23c   : > { %1498 = vst.msk [vmem:[#allocation3 + $0xd0] sm:$0xff] %vm1471_vm11, %v1428_v16  ;;  %2355 = vmatmul.mubr.msk.f32.gmra.mrb[8].mxu1 %vm1810_vm14, %v1798_v58 }
 0x23e   : > { %v1531_v29 = vpop.permute.xlu0 %1530 }
 0x23f   : > { %1617 = vst.msk [vmem:[#allocation3 + $0x50] sm:$0xff] %vm1606_vm12, %v1531_v29  ;;  %v1430_v63 = vpop.permute.xlu1 %1429 }
 0x240   : > { %1499 = vst.msk [vmem:[#allocation3 + $0xd8] sm:$0xff] %vm1471_vm11, %v1430_v63 }
 0x242   : > { %v1135_v6 = vpop.permute.xlu0 %1134 }
 0x243   : > { %1219 = vst.msk [vmem:[#allocation3 + $0x60] sm:$0xff] %vm1206_vm9, %v1135_v6  ;;  %v1563_v5 = vpop.permute.xlu1 %1562 }
 0x244   : > { %1633 = vst.msk [vmem:[#allocation3 + $0xd0] sm:$0xff] %vm1606_vm12, %v1563_v5 }
 0x246   : > { %v1533_v38 = vpop.permute.xlu0 %1532 }
 0x247   : > { %1618 = vst.msk [vmem:[#allocation3 + $0x58] sm:$0xff] %vm1606_vm12, %v1533_v38  ;;  %v1167_v14 = vpop.permute.xlu1 %1166 }
 0x248   : > { %1235 = vst.msk [vmem:[#allocation3 + $0xe0] sm:$0xff] %vm1206_vm9, %v1167_v14 }
 0x24a   : > { %v1665_v55 = vpop.permute.xlu0 %1664 }
 0x24b   : > { %1751 = vst.msk [vmem:[#allocation3 + $0x50] sm:$0xff] %vm1740_vm13, %v1665_v55  ;;  %v1565_v1 = vpop.permute.xlu1 %1564 }
 0x24c   : > { %1634 = vst.msk [vmem:[#allocation3 + $0xd8] sm:$0xff] %vm1606_vm12, %v1565_v1 }
 0x24e   : > { %v1137_v50 = vpop.permute.xlu0 %1136 }
 0x24f   : > { %1220 = vst.msk [vmem:[#allocation3 + $0x68] sm:$0xff] %vm1206_vm9, %v1137_v50  ;;  %v1697_v56 = vpop.permute.xlu1 %1696 }
 0x250   : > { %1767 = vst.msk [vmem:[#allocation3 + $0xd0] sm:$0xff] %vm1740_vm13, %v1697_v56 }
 0x252   : > { %v1269_v53 = vpop.permute.xlu0 %1268  ;;  %v1783_v22 = vld [vmem:[#allocation3 + $0x50] sm:$0xff] }
 0x253   : > { %1353 = vst.msk [vmem:[#allocation3 + $0x60] sm:$0xff] %vm1340_vm10, %v1269_v53  ;;  %2333 = vmatprep.mubr.msk.f32.mxu0 %vm1810_vm14, %v1783_v22  ;;  %v1169_v26 = vpop.permute.xlu1 %1168 }
 0x254   : > { %1236 = vst.msk [vmem:[#allocation3 + $0xe8] sm:$0xff] %vm1206_vm9, %v1169_v26 }
 0x256   : > { %v1667_v47 = vpop.permute.xlu0 %1666 }
 0x257   : > { %1752 = vst.msk [vmem:[#allocation3 + $0x58] sm:$0xff] %vm1740_vm13, %v1667_v47  ;;  %v1301_v27 = vpop.permute.xlu1 %1300  ;;  %v1799_v28 = vld [vmem:[#allocation3 + $0xd0] sm:$0xff] }
 0x258   : > { %1369 = vst.msk [vmem:[#allocation3 + $0xe0] sm:$0xff] %vm1340_vm10, %v1301_v27  ;;  %2357 = vmatprep.mubr.msk.f32.mxu1 %vm1810_vm14, %v1799_v28 }
 0x25a   : > { %v1271_v15 = vpop.permute.xlu0 %1270 }
 0x25b   : > { %1354 = vst.msk [vmem:[#allocation3 + $0x68] sm:$0xff] %vm1340_vm10, %v1271_v15  ;;  %v1699_v45 = vpop.permute.xlu1 %1698 }
 0x25c   : > { %1768 = vst.msk [vmem:[#allocation3 + $0xd8] sm:$0xff] %vm1740_vm13, %v1699_v45 }
 0x25e   : > { %v1400_v54 = vpop.permute.xlu0 %1399  ;;  %v1784_v0 = vld [vmem:[#allocation3 + $0x58] sm:$0xff] }
 0x25f   : > { %1484 = vst.msk [vmem:[#allocation3 + $0x60] sm:$0xff] %vm1471_vm11, %v1400_v54  ;;  %2334 = vmatmul.mubr.msk.f32.gmra.mrb[10].mxu0 %vm1810_vm14, %v1784_v0  ;;  %v1303_v23 = vpop.permute.xlu1 %1302 }
 0x260   : > { %1370 = vst.msk [vmem:[#allocation3 + $0xe8] sm:$0xff] %vm1340_vm10, %v1303_v23 }
 0x262   : > { %v1402_v43 = vpop.permute.xlu0 %1401 }
 0x263   : > { %1485 = vst.msk [vmem:[#allocation3 + $0x68] sm:$0xff] %vm1471_vm11, %v1402_v43  ;;  %v1432_v3 = vpop.permute.xlu1 %1431  ;;  %v1800_v42 = vld [vmem:[#allocation3 + $0xd8] sm:$0xff] }
 0x264   : > { %1500 = vst.msk [vmem:[#allocation3 + $0xe0] sm:$0xff] %vm1471_vm11, %v1432_v3  ;;  %2358 = vmatmul.mubr.msk.f32.gmra.mrb[10].mxu1 %vm1810_vm14, %v1800_v42 }
 0x266   : > { %v1535_v12 = vpop.permute.xlu0 %1534 }
 0x267   : > { %1619 = vst.msk [vmem:[#allocation3 + $0x60] sm:$0xff] %vm1606_vm12, %v1535_v12  ;;  %v1434_v19 = vpop.permute.xlu1 %1433 }
 0x268   : > { %1501 = vst.msk [vmem:[#allocation3 + $0xe8] sm:$0xff] %vm1471_vm11, %v1434_v19 }
 0x26a   : > { %v1139_v25 = vpop.permute.xlu0 %1138  ;;  %v2320_v20 = vpop.f32.mrb[0].mxu0 }
 0x26b   : > { %1221 = vst.msk [vmem:[#allocation3 + $0x70] sm:$0xff] %vm1206_vm9, %v1139_v25  ;;  %v1977_v48 = vpop.f32.mrb[1].mxu0  ;;  %v1567_v13 = vpop.permute.xlu1 %1566 }
 0x26c   : > { %2137 = vst.msk [vmem:[%s3885_s23 + $0x8] sm:$0xff] %vm235_vm1, %v2320_v20  ;;  %2136 = vst.msk [vmem:[%s3885_s23] sm:$0xff] %vm235_vm1, %v1977_v48 }
 0x26d   : > { %1635 = vst.msk [vmem:[#allocation3 + $0xe0] sm:$0xff] %vm1606_vm12, %v1567_v13 }
 0x26e   : > { %v1537_v32 = vpop.permute.xlu0 %1536 }
 0x26f   : > { %1620 = vst.msk [vmem:[#allocation3 + $0x68] sm:$0xff] %vm1606_vm12, %v1537_v32  ;;  %v2344_v52 = vpop.f32.mrb[0].mxu1  ;;  %v1171_v49 = vpop.permute.xlu1 %1170 }
 0x270   : > { %2153 = vst.msk [vmem:[%s3885_s23 + $0x88] sm:$0xff] %vm235_vm1, %v2344_v52  ;;  %v2057_v40 = vpop.f32.mrb[1].mxu1 }
 0x271   : > { %1237 = vst.msk [vmem:[#allocation3 + $0xf0] sm:$0xff] %vm1206_vm9, %v1171_v49 }
 0x272   : > { %v1669_v39 = vpop.permute.xlu0 %1668  ;;  %2152 = vst.msk [vmem:[%s3885_s23 + $0x80] sm:$0xff] %vm235_vm1, %v2057_v40 }
 0x273   : > { %1753 = vst.msk [vmem:[#allocation3 + $0x60] sm:$0xff] %vm1740_vm13, %v1669_v39  ;;  %v1569_v34 = vpop.permute.xlu1 %1568 }
 0x274   : > { %1636 = vst.msk [vmem:[#allocation3 + $0xe8] sm:$0xff] %vm1606_vm12, %v1569_v34 }
 0x276   : > { %v1141_v17 = vpop.permute.xlu0 %1140 }
 0x277   : > { %1222 = vst.msk [vmem:[#allocation3 + $0x78] sm:$0xff] %vm1206_vm9, %v1141_v17  ;;  %v1701_v60 = vpop.permute.xlu1 %1700 }
 0x278   : > { %1769 = vst.msk [vmem:[#allocation3 + $0xe0] sm:$0xff] %vm1740_vm13, %v1701_v60 }
 0x27a   : > { %v1273_v11 = vpop.permute.xlu0 %1272  ;;  %v1785_v30 = vld [vmem:[#allocation3 + $0x60] sm:$0xff] }
 0x27b   : > { %1355 = vst.msk [vmem:[#allocation3 + $0x70] sm:$0xff] %vm1340_vm10, %v1273_v11  ;;  %2336 = vmatprep.mubr.msk.f32.mxu0 %vm1810_vm14, %v1785_v30  ;;  %v1173_v46 = vpop.permute.xlu1 %1172 }
 0x27c   : > { %1238 = vst.msk [vmem:[#allocation3 + $0xf8] sm:$0xff] %vm1206_vm9, %v1173_v46 }
 0x27e   : > { %v1671_v61 = vpop.permute.xlu0 %1670 }
 0x27f   : > { %1754 = vst.msk [vmem:[#allocation3 + $0x68] sm:$0xff] %vm1740_vm13, %v1671_v61  ;;  %v1305_v33 = vpop.permute.xlu1 %1304  ;;  %v1801_v51 = vld [vmem:[#allocation3 + $0xe0] sm:$0xff] }
 0x280   : > { %1371 = vst.msk [vmem:[#allocation3 + $0xf0] sm:$0xff] %vm1340_vm10, %v1305_v33  ;;  %2360 = vmatprep.mubr.msk.f32.mxu1 %vm1810_vm14, %v1801_v51 }
 0x282   : > { %v1275_v57 = vpop.permute.xlu0 %1274 }
 0x283   : > { %1356 = vst.msk [vmem:[#allocation3 + $0x78] sm:$0xff] %vm1340_vm10, %v1275_v57  ;;  %v1703_v37 = vpop.permute.xlu1 %1702 }
 0x284   : > { %1770 = vst.msk [vmem:[#allocation3 + $0xe8] sm:$0xff] %vm1740_vm13, %v1703_v37 }
 0x286   : > { %v1404_v24 = vpop.permute.xlu0 %1403  ;;  %v1786_v21 = vld [vmem:[#allocation3 + $0x68] sm:$0xff] }
 0x287   : > { %1486 = vst.msk [vmem:[#allocation3 + $0x70] sm:$0xff] %vm1471_vm11, %v1404_v24  ;;  %2337 = vmatmul.mubr.msk.f32.gmra.mrb[12].mxu0 %vm1810_vm14, %v1786_v21  ;;  %v1307_v4 = vpop.permute.xlu1 %1306 }
 0x288   : > { %1372 = vst.msk [vmem:[#allocation3 + $0xf8] sm:$0xff] %vm1340_vm10, %v1307_v4 }
 0x28a   : > { %v1406_v59 = vpop.permute.xlu0 %1405 }
 0x28b   : > { %1487 = vst.msk [vmem:[#allocation3 + $0x78] sm:$0xff] %vm1471_vm11, %v1406_v59  ;;  %v1436_v31 = vpop.permute.xlu1 %1435  ;;  %v1802_v7 = vld [vmem:[#allocation3 + $0xe8] sm:$0xff] }
 0x28c   : > { %1502 = vst.msk [vmem:[#allocation3 + $0xf0] sm:$0xff] %vm1471_vm11, %v1436_v31  ;;  %2361 = vmatmul.mubr.msk.f32.gmra.mrb[12].mxu1 %vm1810_vm14, %v1802_v7 }
 0x28e   : > { %v1539_v62 = vpop.permute.xlu0 %1538 }
 0x28f   : > { %1621 = vst.msk [vmem:[#allocation3 + $0x70] sm:$0xff] %vm1606_vm12, %v1539_v62  ;;  %v1438_v2 = vpop.permute.xlu1 %1437 }
 0x290   : > { %1503 = vst.msk [vmem:[#allocation3 + $0xf8] sm:$0xff] %vm1471_vm11, %v1438_v2 }
 0x292   : > { %v1541_v9 = vpop.permute.xlu0 %1540  ;;  %v2323_v35 = vpop.f32.mrb[2].mxu0 }
 0x293   : > { %1622 = vst.msk [vmem:[#allocation3 + $0x78] sm:$0xff] %vm1606_vm12, %v1541_v9  ;;  %v1987_v18 = vpop.f32.mrb[3].mxu0  ;;  %v1571_v44 = vpop.permute.xlu1 %1570 }
 0x294   : > { %2139 = vst.msk [vmem:[%s3885_s23 + $0x18] sm:$0xff] %vm235_vm1, %v2323_v35  ;;  %2138 = vst.msk [vmem:[%s3885_s23 + $0x10] sm:$0xff] %vm235_vm1, %v1987_v18 }
 0x295   : > { %1637 = vst.msk [vmem:[#allocation3 + $0xf0] sm:$0xff] %vm1606_vm12, %v1571_v44 }
 0x296   : > { %v1673_v41 = vpop.permute.xlu0 %1672 }
 0x297   : > { %1755 = vst.msk [vmem:[#allocation3 + $0x70] sm:$0xff] %vm1740_vm13, %v1673_v41  ;;  %v2347_v36 = vpop.f32.mrb[2].mxu1  ;;  %v1573_v8 = vpop.permute.xlu1 %1572 }
 0x298   : > { %2155 = vst.msk [vmem:[%s3885_s23 + $0x98] sm:$0xff] %vm235_vm1, %v2347_v36  ;;  %v2067_v10 = vpop.f32.mrb[3].mxu1 }
 0x299   : > { %1638 = vst.msk [vmem:[#allocation3 + $0xf8] sm:$0xff] %vm1606_vm12, %v1573_v8 }
 0x29a   : > { %v1675_v16 = vpop.permute.xlu0 %1674  ;;  %2154 = vst.msk [vmem:[%s3885_s23 + $0x90] sm:$0xff] %vm235_vm1, %v2067_v10 }
 0x29b   : > { %1756 = vst.msk [vmem:[#allocation3 + $0x78] sm:$0xff] %vm1740_vm13, %v1675_v16  ;;  %v1705_v58 = vpop.permute.xlu1 %1704 }
 0x29c   : > { %1771 = vst.msk [vmem:[#allocation3 + $0xf0] sm:$0xff] %vm1740_vm13, %v1705_v58 }
 0x29e   : > { %v1787_v29 = vld [vmem:[#allocation3 + $0x70] sm:$0xff] }
 0x29f   : > { %2339 = vmatprep.mubr.msk.f32.mxu0 %vm1810_vm14, %v1787_v29  ;;  %v1707_v63 = vpop.permute.xlu1 %1706 }
 0x2a0   : > { %1772 = vst.msk [vmem:[#allocation3 + $0xf8] sm:$0xff] %vm1740_vm13, %v1707_v63 }
 0x2a2   : > { %v1788_v6 = vld [vmem:[#allocation3 + $0x78] sm:$0xff] }
 0x2a3   : > { %2340 = vmatmul.mubr.msk.f32.gmra.mrb[14].mxu0 %vm1810_vm14, %v1788_v6  ;;  %v1803_v5 = vld [vmem:[#allocation3 + $0xf0] sm:$0xff] }
 0x2a4   : > { %2363 = vmatprep.mubr.msk.f32.mxu1 %vm1810_vm14, %v1803_v5 }
 0x2a7   : > { %v1804_v38 = vld [vmem:[#allocation3 + $0xf8] sm:$0xff] }
 0x2a8   : > { %2364 = vmatmul.mubr.msk.f32.gmra.mrb[14].mxu1 %vm1810_vm14, %v1804_v38 }
 0x2ba   : > { %v2326_v14 = vpop.f32.mrb[4].mxu0 }
 0x2bb   : > { %2141 = vst.msk [vmem:[%s3885_s23 + $0x28] sm:$0xff] %vm235_vm1, %v2326_v14  ;;  %v1997_v55 = vpop.f32.mrb[5].mxu0 }
 0x2bc   : > { %2140 = vst.msk [vmem:[%s3885_s23 + $0x20] sm:$0xff] %vm235_vm1, %v1997_v55 }
 0x2bf   : > { %v2350_v1 = vpop.f32.mrb[4].mxu1 }
 0x2c0   : > { %2157 = vst.msk [vmem:[%s3885_s23 + $0xa8] sm:$0xff] %vm235_vm1, %v2350_v1  ;;  %v2077_v50 = vpop.f32.mrb[5].mxu1 }
 0x2c1   : > { %2156 = vst.msk [vmem:[%s3885_s23 + $0xa0] sm:$0xff] %vm235_vm1, %v2077_v50 }
 0x2e2   : > { %v2329_v56 = vpop.f32.mrb[6].mxu0 }
 0x2e3   : > { %2143 = vst.msk [vmem:[%s3885_s23 + $0x38] sm:$0xff] %vm235_vm1, %v2329_v56  ;;  %v2007_v53 = vpop.f32.mrb[7].mxu0 }
 0x2e4   : > { %2142 = vst.msk [vmem:[%s3885_s23 + $0x30] sm:$0xff] %vm235_vm1, %v2007_v53 }
 0x2e7   : > { %v2353_v22 = vpop.f32.mrb[6].mxu1 }
 0x2e8   : > { %2159 = vst.msk [vmem:[%s3885_s23 + $0xb8] sm:$0xff] %vm235_vm1, %v2353_v22  ;;  %v2087_v26 = vpop.f32.mrb[7].mxu1 }
 0x2e9   : > { %2158 = vst.msk [vmem:[%s3885_s23 + $0xb0] sm:$0xff] %vm235_vm1, %v2087_v26 }
 0x30a   : > { %v2332_v47 = vpop.f32.mrb[8].mxu0 }
 0x30b   : > { %2145 = vst.msk [vmem:[%s3885_s23 + $0x48] sm:$0xff] %vm235_vm1, %v2332_v47  ;;  %v2017_v27 = vpop.f32.mrb[9].mxu0 }
 0x30c   : > { %2144 = vst.msk [vmem:[%s3885_s23 + $0x40] sm:$0xff] %vm235_vm1, %v2017_v27 }
 0x30f   : > { %v2356_v28 = vpop.f32.mrb[8].mxu1 }
 0x310   : > { %2161 = vst.msk [vmem:[%s3885_s23 + $0xc8] sm:$0xff] %vm235_vm1, %v2356_v28  ;;  %v2097_v15 = vpop.f32.mrb[9].mxu1 }
 0x311   : > { %2160 = vst.msk [vmem:[%s3885_s23 + $0xc0] sm:$0xff] %vm235_vm1, %v2097_v15 }
 0x332   : > { %v2335_v45 = vpop.f32.mrb[10].mxu0 }
 0x333   : > { %2147 = vst.msk [vmem:[%s3885_s23 + $0x58] sm:$0xff] %vm235_vm1, %v2335_v45  ;;  %v2027_v54 = vpop.f32.mrb[11].mxu0 }
 0x334   : > { %2146 = vst.msk [vmem:[%s3885_s23 + $0x50] sm:$0xff] %vm235_vm1, %v2027_v54 }
 0x337   : > { %v2359_v0 = vpop.f32.mrb[10].mxu1 }
 0x338   : > { %2163 = vst.msk [vmem:[%s3885_s23 + $0xd8] sm:$0xff] %vm235_vm1, %v2359_v0  ;;  %v2107_v23 = vpop.f32.mrb[11].mxu1 }
 0x339   : > { %2162 = vst.msk [vmem:[%s3885_s23 + $0xd0] sm:$0xff] %vm235_vm1, %v2107_v23 }
 0x35a   : > { %v2338_v43 = vpop.f32.mrb[12].mxu0 }
 0x35b   : > { %2149 = vst.msk [vmem:[%s3885_s23 + $0x68] sm:$0xff] %vm235_vm1, %v2338_v43  ;;  %v2037_v3 = vpop.f32.mrb[13].mxu0 }
 0x35c   : > { %2148 = vst.msk [vmem:[%s3885_s23 + $0x60] sm:$0xff] %vm235_vm1, %v2037_v3 }
 0x35f   : > { %v2362_v42 = vpop.f32.mrb[12].mxu1 }
 0x360   : > { %2165 = vst.msk [vmem:[%s3885_s23 + $0xe8] sm:$0xff] %vm235_vm1, %v2362_v42  ;;  %v2117_v12 = vpop.f32.mrb[13].mxu1 }
 0x361   : > { %2164 = vst.msk [vmem:[%s3885_s23 + $0xe0] sm:$0xff] %vm235_vm1, %v2117_v12 }
 0x376   : > { %v2341_v19 = vpop.f32.mrb[14].mxu0 }
 0x377   : > { %2151 = vst.msk [vmem:[%s3885_s23 + $0x78] sm:$0xff] %vm235_vm1, %v2341_v19  ;;  %v2047_v25 = vpop.f32.mrb[15].mxu0 }
 0x378   : > { %2150 = vst.msk [vmem:[%s3885_s23 + $0x70] sm:$0xff] %vm235_vm1, %v2047_v25 }
 0x37b   : > { %v2365_v20 = vpop.f32.mrb[14].mxu1 }
 0x37c   : > { %2167 = vst.msk [vmem:[%s3885_s23 + $0xf8] sm:$0xff] %vm235_vm1, %v2365_v20  ;;  %v2127_v48 = vpop.f32.mrb[15].mxu1 }
 0x37d   : > { %2166 = vst.msk [vmem:[%s3885_s23 + $0xf0] sm:$0xff] %vm235_vm1, %v2127_v48 }
 0x37e PF: > { %s14_s15 = sadd.s32 1, %s2403_s15  }
 0x37f   : > { %p11_p4 = scmp.ge.s32.totalorder %s14_s15, 4  }
 0x381   :  { %13 = sbr.rel (!%p11_p4) target bundleno = 1 (0x1), region = 68 }

</bundles_post_ra>
